<compile_context>
chip_gen: v7x
topology: tpu7x:2x2x1
jax: 0.10.0
libtpu: 0.0.40
codegen_flags: <defaults>
</compile_context>

<pallas_src>
import functools

import jax
import jax.numpy as jnp
from jax.experimental import pallas as pl
from jax.experimental.pallas import tpu as pltpu

BF16 = jnp.bfloat16
F32 = jnp.float32
EPS = 1e-5

# Scoped-VMEM budget handed to Mosaic.  64 MiB == v7x physical ceiling and
# comfortably covers the fused weight blocks on v5e/v6e, whose *default*
# scoped limit (16/32 MiB) would otherwise reject them at production D.
_VMEM_LIMIT = 64 * 1024 * 1024


# ---------------------------------------------------------------------------
# tiling helpers
# ---------------------------------------------------------------------------
def _divisor_tile(n, cap, mult):
    """Largest multiple of `mult` that divides `n` and is <= cap, else `n`.

    NOTE: silently falls back to the full axis when no divisor exists; for a
    very large, awkwardly-factored N this can blow the VMEM budget (pad N
    up-front in that case).
    """
    if n <= cap:
        return n
    t = (cap // mult) * mult
    while t >= mult:
        if n % t == 0:
            return t
        t -= mult
    return n


# ---------------------------------------------------------------------------
# LayerNorm (no affine) — used stand-alone only for s (once per forward)
# ---------------------------------------------------------------------------
def _ln0(x):
    mu = jnp.mean(x, axis=-1, keepdims=True)
    xc = x - mu
    var = jnp.mean(xc * xc, axis=-1, keepdims=True)
    return xc * jax.lax.rsqrt(var + EPS)


def _ln0_kernel(x_ref, o_ref):
    o_ref[...] = _ln0(x_ref[...].astype(F32)).astype(o_ref.dtype)


def layernorm_noaffine(x2d):
    R, C = x2d.shape
    tr = _divisor_tile(R, 1024, 8)
    return pl.pallas_call(
        _ln0_kernel,
        out_shape=jax.ShapeDtypeStruct((R, C), BF16),
        grid=(R // tr,),
        in_specs=[pl.BlockSpec((tr, C), lambda i: (i, 0))],
        out_specs=pl.BlockSpec((tr, C), lambda i: (i, 0)),
        compiler_params=pltpu.CompilerParams(dimension_semantics=("parallel",)),
    )(x2d)


# ---------------------------------------------------------------------------
# Pair-bias projection for ALL layers at once:
#   LN0(z) @ [stacked folded weights] + [stacked consts]  -> [B, L*H, N, N]
# LayerNorm(z) is fused (zn0 is never materialized) and the output is written
# head-major so attention can read per-layer (b, l, qi, ki) blocks directly.
# ---------------------------------------------------------------------------
def _make_zbias_call(B, N, Cz, LH, TQ, TK):
    def kernel(z_ref, w_ref, c_ref, out_ref):
        zt = z_ref[0].astype(F32).reshape(TQ * TK, Cz)
        zn = _ln0(zt).astype(BF16)                                    # LN(z), affine folded
        zb = jnp.dot(zn, w_ref[...], preferred_element_type=F32) + c_ref[...]
        zb = zb.reshape(TQ, TK, LH)
        # head-major relayout in-kernel (XLU work hidden under the MXU matmul)
        out_ref[0] = jnp.transpose(zb, (2, 0, 1)).astype(out_ref.dtype)

    return pl.pallas_call(
        kernel,
        out_shape=jax.ShapeDtypeStruct((B, LH, N, N), BF16),
        grid=(B, N // TQ, N // TK),
        in_specs=[
            pl.BlockSpec((1, TQ, TK, Cz), lambda b, qi, ki: (b, qi, ki, 0)),
            pl.BlockSpec((Cz, LH), lambda b, qi, ki: (0, 0)),
            pl.BlockSpec((1, LH), lambda b, qi, ki: (0, 0)),
        ],
        out_specs=pl.BlockSpec((1, LH, TQ, TK), lambda b, qi, ki: (b, 0, qi, ki)),
        compiler_params=pltpu.CompilerParams(
            dimension_semantics=("parallel", "parallel", "parallel"),
            vmem_limit_bytes=_VMEM_LIMIT),
    )


# ---------------------------------------------------------------------------
# AdaLN + fused q|g|k|v projection (per layer)
# ---------------------------------------------------------------------------
def _make_proj_call(B, N, D, TQ):
    def kernel(a_ref, sn0_ref, w_ada_ref, b_ada_ref, w_qgkv_ref, b_qgkv_ref,
               qg_ref, kv_ref):
        an = _ln0(a_ref[0].astype(F32))                                   # (TQ, D)
        ada = (jnp.dot(sn0_ref[0], w_ada_ref[...], preferred_element_type=F32)
               + b_ada_ref[...].astype(F32))                              # (TQ, 2D)
        b2 = (an * jax.nn.sigmoid(ada[:, :D]) + ada[:, D:]).astype(BF16)  # AdaLN out
        qgkv = (jnp.dot(b2, w_qgkv_ref[...], preferred_element_type=F32)
                + b_qgkv_ref[...].astype(F32))                            # (TQ, 4D)
        qg_ref[0] = qgkv[:, :2 * D].astype(qg_ref.dtype)
        kv_ref[0] = qgkv[:, 2 * D:].astype(kv_ref.dtype)

    row = lambda b, i: (b, i, 0)
    cst = lambda b, i: (0, 0)
    # TODO(synk): mark the constant-index weight specs pipeline_mode=pl.Buffered(1)
    # (single-buffered) once verified on the deployed jax version.
    return pl.pallas_call(
        kernel,
        out_shape=(jax.ShapeDtypeStruct((B, N, 2 * D), BF16),
                   jax.ShapeDtypeStruct((B, N, 2 * D), BF16)),
        grid=(B, N // TQ),
        in_specs=[
            pl.BlockSpec((1, TQ, D), row),       # a
            pl.BlockSpec((1, TQ, D), row),       # LN0(s)
            pl.BlockSpec((D, 2 * D), cst),       # fused AdaLN scale|bias weight
            pl.BlockSpec((1, 2 * D), cst),       # fused AdaLN scale|bias bias
            pl.BlockSpec((D, 4 * D), cst),       # fused q|g|k|v weight
            pl.BlockSpec((1, 4 * D), cst),       # fused q|g|k|v bias (q only)
        ],
        out_specs=[pl.BlockSpec((1, TQ, 2 * D), row),
                   pl.BlockSpec((1, TQ, 2 * D), row)],
        compiler_params=pltpu.CompilerParams(
            dimension_semantics=("parallel", "parallel"),
            vmem_limit_bytes=_VMEM_LIMIT),
    )


# ---------------------------------------------------------------------------
# Pair-bias attention: flash-style online softmax, batched over heads,
# gating + output projection fused into the final k-step.  The per-layer bias
# slice of the stacked [B, L*H, N, N] tensor is selected via a scalar-prefetched
# layer index, so one compiled kernel serves every layer.
# ---------------------------------------------------------------------------
def _make_attn_call(B, N, D, H, TQ, TK):
    HD = D // H
    scale = float(HD) ** -0.5

    def kernel(lidx_ref, qg_ref, kv_ref, zb_ref, wo_ref, x_ref,
               qh_ref, m_ref, l_ref, acc_ref):
        del lidx_ref  # only used by the index maps
        ki = pl.program_id(2)

        @pl.when(ki == 0)
        def _():
            # cache the scaled, head-split q once per (batch, q-tile)
            qf = qg_ref[0, :, :D].astype(F32) * scale                 # (TQ, D)
            qh_ref[...] = jnp.transpose(
                qf.reshape(TQ, H, HD), (1, 0, 2)).astype(BF16)        # (H, TQ, HD)
            m_ref[...] = jnp.full_like(m_ref, -jnp.inf)
            l_ref[...] = jnp.zeros_like(l_ref)
            acc_ref[...] = jnp.zeros_like(acc_ref)

        # single reshape+transpose head split (no per-head lane slices/stack)
        k = jnp.transpose(kv_ref[0, :, :D].reshape(TK, H, HD), (1, 0, 2))
        v = jnp.transpose(kv_ref[0, :, D:].reshape(TK, H, HD), (1, 0, 2))

        logits = jnp.einsum('hqd,hkd->hqk', qh_ref[...], k,
                            preferred_element_type=F32)               # (H,TQ,TK)
        logits = logits + zb_ref[0].astype(F32)                       # pair bias

        m_prev = m_ref[...]
        m_new = jnp.maximum(m_prev, jnp.max(logits, axis=-1, keepdims=True))
        alpha = jnp.exp(m_prev - m_new)
        p = jnp.exp(logits - m_new)
        l_ref[...] = alpha * l_ref[...] + jnp.sum(p, axis=-1, keepdims=True)
        acc_ref[...] = alpha * acc_ref[...] + jnp.einsum(
            'hqk,hkd->hqd', p.astype(BF16), v, preferred_element_type=F32)
        m_ref[...] = m_new

        @pl.when(ki == pl.num_programs(2) - 1)
        def _():
            inv_l = pl.reciprocal(l_ref[...], approx=True)             # (H,TQ,1)
            o = acc_ref[...] * inv_l                                   # (H,TQ,HD)
            o = jnp.transpose(o, (1, 0, 2)).reshape(TQ, D)             # (TQ, D)
            g = jax.nn.sigmoid(qg_ref[0, :, D:].astype(F32))           # gate
            og = (o * g).astype(BF16)
            x_ref[0] = jnp.dot(og, wo_ref[...],
                               preferred_element_type=F32).astype(x_ref.dtype)
            # TODO(synk): fold the post (gated residual + conditioned transition)
            # step into this epilogue to drop another full activation HBM pass.

    grid_spec = pltpu.PrefetchScalarGridSpec(
        num_scalar_prefetch=1,
        grid=(B, N // TQ, N // TK),
        in_specs=[
            pl.BlockSpec((1, TQ, 2 * D), lambda b, qi, ki, lidx: (b, qi, 0)),   # q|g
            pl.BlockSpec((1, TK, 2 * D), lambda b, qi, ki, lidx: (b, ki, 0)),   # k|v
            pl.BlockSpec((1, H, TQ, TK),
                         lambda b, qi, ki, lidx: (b, lidx[0], qi, ki)),         # bias
            pl.BlockSpec((D, D), lambda b, qi, ki, lidx: (0, 0)),               # proj_o
        ],
        out_specs=pl.BlockSpec((1, TQ, D), lambda b, qi, ki, lidx: (b, qi, 0)),
        scratch_shapes=[
            pltpu.VMEM((H, TQ, HD), BF16),   # cached scaled q heads
            pltpu.VMEM((H, TQ, 1), F32),     # running max
            pltpu.VMEM((H, TQ, 1), F32),     # running denom
            pltpu.VMEM((H, TQ, HD), F32),    # running numerator
        ],
    )
    return pl.pallas_call(
        kernel,
        out_shape=jax.ShapeDtypeStruct((B, N, D), BF16),
        grid_spec=grid_spec,
        compiler_params=pltpu.CompilerParams(
            dimension_semantics=("parallel", "parallel", "arbitrary"),
            vmem_limit_bytes=_VMEM_LIMIT),
    )


# ---------------------------------------------------------------------------
# Gated residual + ConditionedTransitionBlock (per layer); output aliases `a`.
# (Both sigmoid gates are computed from the raw, un-normalized s, matching
#  the reference's output_projection_linear / output_projection.0.)
# ---------------------------------------------------------------------------
def _make_post_call(B, N, D, HID, TQ):
    def kernel(a_ref, s_ref, sn0_ref, x_ref, w_g_ref, b_g_ref,
               w_adaT_ref, b_adaT_ref, w_swab_ref, w_ba_ref, out_ref):
        a0 = a_ref[0].astype(F32)
        gates = jax.nn.sigmoid(
            jnp.dot(s_ref[0], w_g_ref[...], preferred_element_type=F32)
            + b_g_ref[...].astype(F32))                                   # (TQ, 2D)
        s_o = gates[:, :D]          # gate on attention output
        sg = gates[:, D:]           # gate on transition output
        a1 = a0 + s_o * x_ref[0].astype(F32)

        adaT = (jnp.dot(sn0_ref[0], w_adaT_ref[...], preferred_element_type=F32)
                + b_adaT_ref[...].astype(F32))                            # (TQ, 2D)
        t = (_ln0(a1) * jax.nn.sigmoid(adaT[:, :D]) + adaT[:, D:]).astype(BF16)

        swab = jnp.dot(t, w_swab_ref[...], preferred_element_type=F32)    # (TQ, 3H')
        first = swab[:, :HID]
        gate = swab[:, HID:2 * HID]
        ab = swab[:, 2 * HID:]
        bmat = ((gate * jax.nn.sigmoid(gate)) * first * ab).astype(BF16)  # silu(g)*x*ab
        ba = jnp.dot(bmat, w_ba_ref[...], preferred_element_type=F32)     # (TQ, D)
        out_ref[0] = (a1 + sg * ba).astype(out_ref.dtype)

    row = lambda b, i: (b, i, 0)
    cst = lambda b, i: (0, 0)
    # TODO(synk): single-buffer the constant weight specs (pl.Buffered(1)) and/or
    # fuse this kernel into the attention epilogue per the perf review.
    return pl.pallas_call(
        kernel,
        out_shape=jax.ShapeDtypeStruct((B, N, D), BF16),
        grid=(B, N // TQ),
        in_specs=[
            pl.BlockSpec((1, TQ, D), row),        # a (aliased with output)
            pl.BlockSpec((1, TQ, D), row),        # s (raw)
            pl.BlockSpec((1, TQ, D), row),        # LN0(s)
            pl.BlockSpec((1, TQ, D), row),        # attention output x
            pl.BlockSpec((D, 2 * D), cst),        # fused s_o|sg gate weight
            pl.BlockSpec((1, 2 * D), cst),        # fused s_o|sg gate bias
            pl.BlockSpec((D, 2 * D), cst),        # transition AdaLN scale|bias weight
            pl.BlockSpec((1, 2 * D), cst),        # transition AdaLN scale|bias bias
            pl.BlockSpec((D, 3 * HID), cst),      # fused swish|gate|a_to_b weight
            pl.BlockSpec((HID, D), cst),          # b_to_a weight
        ],
        out_specs=pl.BlockSpec((1, TQ, D), row),
        input_output_aliases={0: 0},
        compiler_params=pltpu.CompilerParams(
            dimension_semantics=("parallel", "parallel"),
            vmem_limit_bytes=_VMEM_LIMIT),
    )


# ---------------------------------------------------------------------------
# Parameter construction (synthetic, bf16, "torch_to_tt"-like layouts) and the
# one-time fusing/folding pass (all in f32, stored bf16).
# ---------------------------------------------------------------------------
def init_layer_params(key, D, H, Cz, HID):
    """Raw parameters for one DiffusionTransformerLayer.
    Linear weights are [in, out]; proj_z.1 weight kept in torch layout [H, Cz];
    LayerNorm weights and all biases are [1, dim]."""
    keys = iter(jax.random.split(key, 32))

    def nrm(shape, scl=0.1):
        return (jax.random.normal(next(keys), shape, F32) * scl).astype(BF16)

    def lnw(shape):
        return (1.0 + 0.02 * jax.random.normal(next(keys), shape, F32)).astype(BF16)

    return [
        # AdaLN (pre-attention): s_norm.w, s_scale.w, s_scale.b, s_bias.w
        lnw((1, D)), nrm((D, D)), nrm((1, D)), nrm((D, D)),
        # AttentionPairBias: proj_q.{w,b}, proj_k.w, proj_v.w, proj_g.w
        nrm((D, D)), nrm((1, D)), nrm((D, D)), nrm((D, D)), nrm((D, D)),
        # proj_z.0 (LayerNorm w, b), proj_z.1.weight [H, Cz], proj_o.weight
        lnw((1, Cz)), nrm((1, Cz)), nrm((H, Cz)), nrm((D, D)),
        # output_projection_linear.{w, b}
        nrm((D, D)), nrm((1, D)),
        # transition AdaLN: s_norm.w, s_scale.w, s_scale.b, s_bias.w
        lnw((1, D)), nrm((D, D)), nrm((1, D)), nrm((D, D)),
        # transition: swish_gate.0.w [D,2H'], a_to_b.w [D,H'], b_to_a.w [H',D],
        # output_projection.0.{w, b}
        nrm((D, 2 * HID)), nrm((D, HID)), nrm((HID, D)), nrm((D, D)), nrm((1, D)),
    ]


def prepare_layer_params(raw, D, H, Cz, HID):
    (a1_snw, a1_ssw, a1_ssb, a1_sbw,
     wq, bq, wk, wv, wg,
     znw, znb, wz, wo,
     wop, bop,
     t_snw, t_ssw, t_ssb, t_sbw,
     w_sw, w_ab, w_ba, w_out, b_out) = raw

    def fold(ln_w, lin_w):
        # LN(x, w) @ M == LN0(x) @ (w[:,None] * M)
        return (ln_w.astype(F32).reshape(-1, 1) * lin_w.astype(F32)).astype(BF16)

    cat = lambda xs: jnp.concatenate(xs, axis=-1)
    zeros = lambda r, c: jnp.zeros((r, c), BF16)
    wz32 = wz.astype(F32)                      # [H, Cz] torch layout
    znw32 = znw.astype(F32)
    znb32 = znb.astype(F32)

    return dict(
        w_ada1=cat([fold(a1_snw, a1_ssw), fold(a1_snw, a1_sbw)]),   # [D, 2D]
        b_ada1=cat([a1_ssb, zeros(1, D)]),                          # [1, 2D]
        w_qgkv=cat([wq, wg, wk, wv]),                               # [D, 4D]
        b_qgkv=cat([bq, zeros(1, 3 * D)]),                          # [1, 4D]
        wzT=((wz32 * znw32).T).astype(BF16),                        # [Cz, H]
        zbc=(wz32 @ znb32.reshape(Cz, 1)).reshape(1, H),            # [1, H] f32
        wo=wo,                                                      # [D, D]
        w_gates=cat([wop, w_out]),                                  # [D, 2D]
        b_gates=cat([bop, b_out]),                                  # [1, 2D]
        w_adaT=cat([fold(t_snw, t_ssw), fold(t_snw, t_sbw)]),       # [D, 2D]
        b_adaT=cat([t_ssb, zeros(1, D)]),                           # [1, 2D]
        w_swab=cat([w_sw, w_ab]),                                   # [D, 3H']
        w_ba=w_ba,                                                  # [H', D]
    )


# ---------------------------------------------------------------------------
# Full forward pass
# ---------------------------------------------------------------------------
@functools.partial(jax.jit, static_argnames=("n_heads", "hidden"))
def diffusion_transformer_forward(a, s, z, layers, n_heads, hidden):
    B, N, D = a.shape
    Cz = z.shape[-1]
    H = n_heads
    L = len(layers)

    a = a.astype(BF16)
    s = s.astype(BF16)
    z = z.astype(BF16)

    # row/kv tiles for the token-parallel kernels (mem/overhead bound -> 256)
    TQ = _divisor_tile(N, 256, 8)
    TK = _divisor_tile(N, 256, 128)
    # pair-bias tiles kept at 128 so (z tile + L*H-wide output tile) stays
    # well under v7x's 64 MiB VMEM with double buffering.
    TQZ = _divisor_tile(N, 128, 8)
    TKZ = _divisor_tile(N, 128, 128)

    # Hoisted once for the whole stack: LayerNorm (no affine) of s.
    sn0 = layernorm_noaffine(s.reshape(B * N, D)).reshape(B, N, D)

    # One pass over z for the whole stack: stacked folded pair-bias weights.
    wz_all = jnp.concatenate([p["wzT"] for p in layers], axis=1)     # [Cz, L*H]
    zc_all = jnp.concatenate([p["zbc"] for p in layers], axis=1)     # [1, L*H]
    zb_all = _make_zbias_call(B, N, Cz, L * H, TQZ, TKZ)(z, wz_all, zc_all)
    # zb_all: [B, L*H, N, N] head-major, bf16

    proj_call = _make_proj_call(B, N, D, TQ)
    attn_call = _make_attn_call(B, N, D, H, TQ, TK)
    post_call = _make_post_call(B, N, D, hidden, TQ)

    for li, p in enumerate(layers):
        lidx = jnp.array([li], jnp.int32)                            # scalar prefetch
        qg, kv = proj_call(a, sn0, p["w_ada1"], p["b_ada1"],
                           p["w_qgkv"], p["b_qgkv"])
        x = attn_call(lidx, qg, kv, zb_all, p["wo"])
        a = post_call(a, s, sn0, x, p["w_gates"], p["b_gates"],
                      p["w_adaT"], p["b_adaT"], p["w_swab"], p["w_ba"])

    # TorchWrapper._to_torch converts back to float32
    return a.astype(jnp.float32)


if __name__ == "__main__":
    # Small shapes consistent with the module's forward:
    #   n_layers=2, dim=32, n_heads=4, batch=2, seq=8, pair dim=16, ffn hidden=2*dim
    B, N, D, H, CZ, N_LAYERS = 2, 8, 32, 4, 16, 2
    HIDDEN = 2 * D

    key = jax.random.PRNGKey(0)
    k_a, k_s, k_z, k_p = jax.random.split(key, 4)
    a = jax.random.normal(k_a, (B, N, D), jnp.float32)
    s = jax.random.normal(k_s, (B, N, D), jnp.float32)
    z = jax.random.normal(k_z, (B, N, N, CZ), jnp.float32)

    layer_keys = jax.random.split(k_p, N_LAYERS)
    raw_layers = [init_layer_params(lk, D, H, CZ, HIDDEN) for lk in layer_keys]
    layers = [prepare_layer_params(r, D, H, CZ, HIDDEN) for r in raw_layers]

    out = diffusion_transformer_forward(a, s, z, layers, n_heads=H, hidden=HIDDEN)
    jax.block_until_ready(out)
    assert out.shape == (B, N, D) and out.dtype == jnp.float32
    print("KERNEL_OK")
</pallas_src>

<mosaic_0001>
module attributes {stable_mosaic.version = 11 : i64} {
  func.func @_ln0_kernel(%arg0: i32, %arg1: memref<16x32xbf16, #tpu.memory_space<vmem>>, %arg2: memref<16x32xbf16, #tpu.memory_space<vmem>>) attributes {dimension_semantics = [#tpu.dimension_semantics<parallel>], iteration_bounds = array<i64: 1>, scalar_prefetch = 0 : i64, scratch_operands = 0 : i64, tpu.core_type = #tpu.core_type<tc>, window_params = [{transform_indices = @transform_0, window_bounds = array<i64: 16, 32>}, {transform_indices = @transform_1, window_bounds = array<i64: 16, 32>}]} {
    %c0 = arith.constant 0 : index
    %c0_0 = arith.constant 0 : index
    %0 = vector.load %arg1[%c0, %c0_0] : memref<16x32xbf16, #tpu.memory_space<vmem>>, vector<16x32xbf16>
    %1 = arith.extf %0 : vector<16x32xbf16> to vector<16x32xf32>
    %cst = arith.constant dense<0.000000e+00> : vector<16xf32>
    %2 = vector.multi_reduction <add>, %1, %cst [1] : vector<16x32xf32> to vector<16xf32>
    %3 = vector.shape_cast %2 : vector<16xf32> to vector<16x1xf32>
    %cst_1 = arith.constant 3.200000e+01 : f32
    %4 = vector.broadcast %cst_1 : f32 to vector<16x1xf32>
    %5 = arith.divf %3, %4 : vector<16x1xf32>
    %6 = vector.broadcast %5 : vector<16x1xf32> to vector<16x32xf32>
    %7 = arith.subf %1, %6 : vector<16x32xf32>
    %8 = arith.mulf %7, %7 : vector<16x32xf32>
    %cst_2 = arith.constant dense<0.000000e+00> : vector<16xf32>
    %9 = vector.multi_reduction <add>, %8, %cst_2 [1] : vector<16x32xf32> to vector<16xf32>
    %10 = vector.shape_cast %9 : vector<16xf32> to vector<16x1xf32>
    %cst_3 = arith.constant 3.200000e+01 : f32
    %11 = vector.broadcast %cst_3 : f32 to vector<16x1xf32>
    %12 = arith.divf %10, %11 : vector<16x1xf32>
    %cst_4 = arith.constant 9.99999974E-6 : f32
    %13 = vector.broadcast %cst_4 : f32 to vector<16x1xf32>
    %14 = arith.addf %12, %13 : vector<16x1xf32>
    %15 = math.rsqrt %14 : vector<16x1xf32>
    %16 = vector.broadcast %15 : vector<16x1xf32> to vector<16x32xf32>
    %17 = arith.mulf %7, %16 : vector<16x32xf32>
    %18 = arith.truncf %17 : vector<16x32xf32> to vector<16x32xbf16>
    %c0_5 = arith.constant 0 : index
    %c0_6 = arith.constant 0 : index
    %19 = vector.load %arg2[%c0_5, %c0_6] : memref<16x32xbf16, #tpu.memory_space<vmem>>, vector<16x32xbf16>
    tpu.vector_store %arg2[%c0_5, %c0_6], %18 {strides = array<i32>} : memref<16x32xbf16, #tpu.memory_space<vmem>>, vector<16x32xbf16>,
    return
  }
  func.func @transform_0(%arg0: i32) -> (i32, i32) {
    %c0_i32 = arith.constant 0 : i32
    %c0_i32_0 = arith.constant 0 : i32
    return %arg0, %c0_i32 : i32, i32
  }
  func.func @transform_1(%arg0: i32) -> (i32, i32) {
    %c0_i32 = arith.constant 0 : i32
    %c0_i32_0 = arith.constant 0 : i32
    return %arg0, %c0_i32 : i32, i32
  }
}

module attributes {stable_mosaic.version = 11 : i64} {
  func.func @kernel(%arg0: i32, %arg1: i32, %arg2: memref<1x8x32xbf16, #tpu.memory_space<vmem>>, %arg3: memref<1x8x32xbf16, #tpu.memory_space<vmem>>, %arg4: memref<32x64xbf16, #tpu.memory_space<vmem>>, %arg5: memref<1x64xbf16, #tpu.memory_space<vmem>>, %arg6: memref<32x128xbf16, #tpu.memory_space<vmem>>, %arg7: memref<1x128xbf16, #tpu.memory_space<vmem>>, %arg8: memref<1x8x64xbf16, #tpu.memory_space<vmem>>, %arg9: memref<1x8x64xbf16, #tpu.memory_space<vmem>>) attributes {dimension_semantics = [#tpu.dimension_semantics<parallel>, #tpu.dimension_semantics<parallel>], iteration_bounds = array<i64: 2, 1>, scalar_prefetch = 0 : i64, scratch_operands = 0 : i64, tpu.core_type = #tpu.core_type<tc>, window_params = [{transform_indices = @transform_0, window_bounds = array<i64: 1, 8, 32>}, {transform_indices = @transform_1, window_bounds = array<i64: 1, 8, 32>}, {pipeline_mode = #tpu.pipeline_mode<synchronous>, transform_indices = @transform_2, window_bounds = array<i64: 32, 64>}, {pipeline_mode = #tpu.pipeline_mode<synchronous>, transform_indices = @transform_3, window_bounds = array<i64: 1, 64>}, {pipeline_mode = #tpu.pipeline_mode<synchronous>, transform_indices = @transform_4, window_bounds = array<i64: 32, 128>}, {pipeline_mode = #tpu.pipeline_mode<synchronous>, transform_indices = @transform_5, window_bounds = array<i64: 1, 128>}, {transform_indices = @transform_6, window_bounds = array<i64: 1, 8, 64>}, {transform_indices = @transform_7, window_bounds = array<i64: 1, 8, 64>}]} {
    %c0 = arith.constant 0 : index
    %c0_0 = arith.constant 0 : index
    %c0_1 = arith.constant 0 : index
    %0 = vector.load %arg2[%c0, %c0_0, %c0_1] : memref<1x8x32xbf16, #tpu.memory_space<vmem>>, vector<1x8x32xbf16>
    %1 = vector.shape_cast %0 : vector<1x8x32xbf16> to vector<8x32xbf16>
    %2 = arith.extf %1 : vector<8x32xbf16> to vector<8x32xf32>
    %cst = arith.constant dense<0.000000e+00> : vector<8xf32>
    %3 = vector.multi_reduction <add>, %2, %cst [1] : vector<8x32xf32> to vector<8xf32>
    %4 = vector.shape_cast %3 : vector<8xf32> to vector<8x1xf32>
    %cst_2 = arith.constant 3.200000e+01 : f32
    %5 = vector.broadcast %cst_2 : f32 to vector<8x1xf32>
    %6 = arith.divf %4, %5 : vector<8x1xf32>
    %7 = vector.broadcast %6 : vector<8x1xf32> to vector<8x32xf32>
    %8 = arith.subf %2, %7 : vector<8x32xf32>
    %9 = arith.mulf %8, %8 : vector<8x32xf32>
    %cst_3 = arith.constant dense<0.000000e+00> : vector<8xf32>
    %10 = vector.multi_reduction <add>, %9, %cst_3 [1] : vector<8x32xf32> to vector<8xf32>
    %11 = vector.shape_cast %10 : vector<8xf32> to vector<8x1xf32>
    %cst_4 = arith.constant 3.200000e+01 : f32
    %12 = vector.broadcast %cst_4 : f32 to vector<8x1xf32>
    %13 = arith.divf %11, %12 : vector<8x1xf32>
    %cst_5 = arith.constant 9.99999974E-6 : f32
    %14 = vector.broadcast %cst_5 : f32 to vector<8x1xf32>
    %15 = arith.addf %13, %14 : vector<8x1xf32>
    %16 = math.rsqrt %15 : vector<8x1xf32>
    %17 = vector.broadcast %16 : vector<8x1xf32> to vector<8x32xf32>
    %18 = arith.mulf %8, %17 : vector<8x32xf32>
    %c0_6 = arith.constant 0 : index
    %c0_7 = arith.constant 0 : index
    %c0_8 = arith.constant 0 : index
    %19 = vector.load %arg3[%c0_6, %c0_7, %c0_8] : memref<1x8x32xbf16, #tpu.memory_space<vmem>>, vector<1x8x32xbf16>
    %20 = vector.shape_cast %19 : vector<1x8x32xbf16> to vector<8x32xbf16>
    %c0_9 = arith.constant 0 : index
    %c0_10 = arith.constant 0 : index
    %21 = vector.load %arg4[%c0_9, %c0_10] : memref<32x64xbf16, #tpu.memory_space<vmem>>, vector<32x64xbf16>
    %cst_11 = arith.constant dense<0.000000e+00> : vector<8x64xf32>
    %22 = tpu.matmul %20, %21, %cst_11 {dimension_numbers = #tpu.dot_dimension_numbers<[1], [0], [0], [1], [0, 0, 1, 1], [], []>} : vector<8x32xbf16>, vector<32x64xbf16>, vector<8x64xf32> -> vector<8x64xf32>
    %c0_12 = arith.constant 0 : index
    %c0_13 = arith.constant 0 : index
    %23 = vector.load %arg5[%c0_12, %c0_13] : memref<1x64xbf16, #tpu.memory_space<vmem>>, vector<1x64xbf16>
    %24 = arith.extf %23 : vector<1x64xbf16> to vector<1x64xf32>
    %25 = vector.broadcast %24 : vector<1x64xf32> to vector<8x64xf32>
    %26 = arith.addf %22, %25 : vector<8x64xf32>
    %27 = vector.extract_strided_slice %26 {offsets = [0, 0], sizes = [8, 32], strides = [1, 1]} : vector<8x64xf32> to vector<8x32xf32>
    %28 = arith.negf %27 : vector<8x32xf32>
    %29 = math.exp %28 : vector<8x32xf32>
    %cst_14 = arith.constant 1.000000e+00 : f32
    %30 = vector.broadcast %cst_14 : f32 to vector<8x32xf32>
    %31 = arith.addf %30, %29 : vector<8x32xf32>
    %32 = arith.divf %30, %31 : vector<8x32xf32>
    %33 = arith.mulf %18, %32 : vector<8x32xf32>
    %34 = vector.extract_strided_slice %26 {offsets = [0, 32], sizes = [8, 32], strides = [1, 1]} : vector<8x64xf32> to vector<8x32xf32>
    %35 = arith.addf %33, %34 : vector<8x32xf32>
    %36 = arith.truncf %35 : vector<8x32xf32> to vector<8x32xbf16>
    %c0_15 = arith.constant 0 : index
    %c0_16 = arith.constant 0 : index
    %37 = vector.load %arg6[%c0_15, %c0_16] : memref<32x128xbf16, #tpu.memory_space<vmem>>, vector<32x128xbf16>
    %cst_17 = arith.constant dense<0.000000e+00> : vector<8x128xf32>
    %38 = tpu.matmul %36, %37, %cst_17 {dimension_numbers = #tpu.dot_dimension_numbers<[1], [0], [0], [1], [0, 0, 1, 1], [], []>} : vector<8x32xbf16>, vector<32x128xbf16>, vector<8x128xf32> -> vector<8x128xf32>
    %c0_18 = arith.constant 0 : index
    %c0_19 = arith.constant 0 : index
    %39 = vector.load %arg7[%c0_18, %c0_19] : memref<1x128xbf16, #tpu.memory_space<vmem>>, vector<1x128xbf16>
    %40 = arith.extf %39 : vector<1x128xbf16> to vector<1x128xf32>
    %41 = vector.broadcast %40 : vector<1x128xf32> to vector<8x128xf32>
    %42 = arith.addf %38, %41 : vector<8x128xf32>
    %43 = vector.extract_strided_slice %42 {offsets = [0, 0], sizes = [8, 64], strides = [1, 1]} : vector<8x128xf32> to vector<8x64xf32>
    %44 = arith.truncf %43 : vector<8x64xf32> to vector<8x64xbf16>
    %c0_20 = arith.constant 0 : index
    %c0_21 = arith.constant 0 : index
    %c0_22 = arith.constant 0 : index
    %45 = vector.load %arg8[%c0_20, %c0_21, %c0_22] : memref<1x8x64xbf16, #tpu.memory_space<vmem>>, vector<1x8x64xbf16>
    %46 = vector.shape_cast %45 : vector<1x8x64xbf16> to vector<8x64xbf16>
    %47 = vector.shape_cast %44 : vector<8x64xbf16> to vector<1x8x64xbf16>
    tpu.vector_store %arg8[%c0_20, %c0_21, %c0_22], %47 {strides = array<i32>} : memref<1x8x64xbf16, #tpu.memory_space<vmem>>, vector<1x8x64xbf16>,
    %48 = vector.extract_strided_slice %42 {offsets = [0, 64], sizes = [8, 64], strides = [1, 1]} : vector<8x128xf32> to vector<8x64xf32>
    %49 = arith.truncf %48 : vector<8x64xf32> to vector<8x64xbf16>
    %c0_23 = arith.constant 0 : index
    %c0_24 = arith.constant 0 : index
    %c0_25 = arith.constant 0 : index
    %50 = vector.load %arg9[%c0_23, %c0_24, %c0_25] : memref<1x8x64xbf16, #tpu.memory_space<vmem>>, vector<1x8x64xbf16>
    %51 = vector.shape_cast %50 : vector<1x8x64xbf16> to vector<8x64xbf16>
    %52 = vector.shape_cast %49 : vector<8x64xbf16> to vector<1x8x64xbf16>
    tpu.vector_store %arg9[%c0_23, %c0_24, %c0_25], %52 {strides = array<i32>} : memref<1x8x64xbf16, #tpu.memory_space<vmem>>, vector<1x8x64xbf16>,
    return
  }
  func.func @transform_0(%arg0: i32, %arg1: i32) -> (i32, i32, i32) {
    %c0_i32 = arith.constant 0 : i32
    %c0_i32_0 = arith.constant 0 : i32
    return %arg0, %arg1, %c0_i32 : i32, i32, i32
  }
  func.func @transform_1(%arg0: i32, %arg1: i32) -> (i32, i32, i32) {
    %c0_i32 = arith.constant 0 : i32
    %c0_i32_0 = arith.constant 0 : i32
    return %arg0, %arg1, %c0_i32 : i32, i32, i32
  }
  func.func @transform_2(%arg0: i32, %arg1: i32) -> (i32, i32) {
    %c0_i32 = arith.constant 0 : i32
    %c0_i32_0 = arith.constant 0 : i32
    %c0_i32_1 = arith.constant 0 : i32
    return %c0_i32, %c0_i32_0 : i32, i32
  }
  func.func @transform_3(%arg0: i32, %arg1: i32) -> (i32, i32) {
    %c0_i32 = arith.constant 0 : i32
    %c0_i32_0 = arith.constant 0 : i32
    %c0_i32_1 = arith.constant 0 : i32
    return %c0_i32, %c0_i32_0 : i32, i32
  }
  func.func @transform_4(%arg0: i32, %arg1: i32) -> (i32, i32) {
    %c0_i32 = arith.constant 0 : i32
    %c0_i32_0 = arith.constant 0 : i32
    %c0_i32_1 = arith.constant 0 : i32
    return %c0_i32, %c0_i32_0 : i32, i32
  }
  func.func @transform_5(%arg0: i32, %arg1: i32) -> (i32, i32) {
    %c0_i32 = arith.constant 0 : i32
    %c0_i32_0 = arith.constant 0 : i32
    %c0_i32_1 = arith.constant 0 : i32
    return %c0_i32, %c0_i32_0 : i32, i32
  }
  func.func @transform_6(%arg0: i32, %arg1: i32) -> (i32, i32, i32) {
    %c0_i32 = arith.constant 0 : i32
    %c0_i32_0 = arith.constant 0 : i32
    return %arg0, %arg1, %c0_i32 : i32, i32, i32
  }
  func.func @transform_7(%arg0: i32, %arg1: i32) -> (i32, i32, i32) {
    %c0_i32 = arith.constant 0 : i32
    %c0_i32_0 = arith.constant 0 : i32
    return %arg0, %arg1, %c0_i32 : i32, i32, i32
  }
}

module attributes {stable_mosaic.version = 11 : i64} {
  func.func @kernel(%arg0: i32, %arg1: i32, %arg2: i32, %arg3: memref<1xi32, #tpu.memory_space<smem>>, %arg4: memref<1x8x64xbf16, #tpu.memory_space<vmem>>, %arg5: memref<1x8x64xbf16, #tpu.memory_space<vmem>>, %arg6: memref<1x4x8x8xbf16, #tpu.memory_space<vmem>>, %arg7: memref<32x32xbf16, #tpu.memory_space<vmem>>, %arg8: memref<1x8x32xbf16, #tpu.memory_space<vmem>>, %arg9: memref<4x8x8xbf16, #tpu.memory_space<vmem>>, %arg10: memref<4x8x1xf32, #tpu.memory_space<vmem>>, %arg11: memref<4x8x1xf32, #tpu.memory_space<vmem>>, %arg12: memref<4x8x8xf32, #tpu.memory_space<vmem>>) attributes {dimension_semantics = [#tpu.dimension_semantics<parallel>, #tpu.dimension_semantics<parallel>, #tpu.dimension_semantics<arbitrary>], iteration_bounds = array<i64: 2, 1, 1>, scalar_prefetch = 1 : i64, scratch_operands = 4 : i64, tpu.core_type = #tpu.core_type<tc>, window_params = [{transform_indices = @transform_0, window_bounds = array<i64: 1, 8, 64>}, {transform_indices = @transform_1, window_bounds = array<i64: 1, 8, 64>}, {transform_indices = @transform_2, window_bounds = array<i64: 1, 4, 8, 8>}, {pipeline_mode = #tpu.pipeline_mode<synchronous>, transform_indices = @transform_3, window_bounds = array<i64: 32, 32>}, {transform_indices = @transform_4, window_bounds = array<i64: 1, 8, 32>}]} {
    %c0_i32 = arith.constant 0 : i32
    %0 = arith.cmpi eq, %arg2, %c0_i32 : i32
    %1 = arith.extui %0 : i1 to i32
    %c0_i32_0 = arith.constant 0 : i32
    %2 = arith.cmpi ne, %1, %c0_i32_0 : i32
    scf.if %2 {
      %c0_35 = arith.constant 0 : index
      %c0_36 = arith.constant 0 : index
      %c0_37 = arith.constant 0 : index
      %43 = vector.load %arg4[%c0_35, %c0_36, %c0_37] : memref<1x8x64xbf16, #tpu.memory_space<vmem>>, vector<1x8x32xbf16>
      %44 = vector.shape_cast %43 : vector<1x8x32xbf16> to vector<8x32xbf16>
      %45 = arith.extf %44 : vector<8x32xbf16> to vector<8x32xf32>
      %cst_38 = arith.constant 0.353553385 : f32
      %46 = vector.broadcast %cst_38 : f32 to vector<8x32xf32>
      %47 = arith.mulf %45, %46 : vector<8x32xf32>
      %48 = vector.shape_cast %47 : vector<8x32xf32> to vector<8x4x8xf32>
      %49 = tpu.transpose %48, [1, 0, 2] : vector<8x4x8xf32> -> vector<4x8x8xf32>
      %50 = arith.truncf %49 : vector<4x8x8xf32> to vector<4x8x8xbf16>
      %c0_39 = arith.constant 0 : index
      %c0_40 = arith.constant 0 : index
      %c0_41 = arith.constant 0 : index
      %51 = vector.load %arg9[%c0_39, %c0_40, %c0_41] : memref<4x8x8xbf16, #tpu.memory_space<vmem>>, vector<4x8x8xbf16>
      tpu.vector_store %arg9[%c0_39, %c0_40, %c0_41], %50 {strides = array<i32>} : memref<4x8x8xbf16, #tpu.memory_space<vmem>>, vector<4x8x8xbf16>,
      %cst_42 = arith.constant 0xFF800000 : f32
      %52 = vector.broadcast %cst_42 : f32 to vector<4x8x1xf32>
      %c0_43 = arith.constant 0 : index
      %c0_44 = arith.constant 0 : index
      %c0_45 = arith.constant 0 : index
      %53 = vector.load %arg10[%c0_43, %c0_44, %c0_45] : memref<4x8x1xf32, #tpu.memory_space<vmem>>, vector<4x8x1xf32>
      tpu.vector_store %arg10[%c0_43, %c0_44, %c0_45], %52 {strides = array<i32>} : memref<4x8x1xf32, #tpu.memory_space<vmem>>, vector<4x8x1xf32>,
      %cst_46 = arith.constant 0.000000e+00 : f32
      %54 = vector.broadcast %cst_46 : f32 to vector<4x8x1xf32>
      %c0_47 = arith.constant 0 : index
      %c0_48 = arith.constant 0 : index
      %c0_49 = arith.constant 0 : index
      %55 = vector.load %arg11[%c0_47, %c0_48, %c0_49] : memref<4x8x1xf32, #tpu.memory_space<vmem>>, vector<4x8x1xf32>
      tpu.vector_store %arg11[%c0_47, %c0_48, %c0_49], %54 {strides = array<i32>} : memref<4x8x1xf32, #tpu.memory_space<vmem>>, vector<4x8x1xf32>,
      %cst_50 = arith.constant 0.000000e+00 : f32
      %56 = vector.broadcast %cst_50 : f32 to vector<4x8x8xf32>
      %c0_51 = arith.constant 0 : index
      %c0_52 = arith.constant 0 : index
      %c0_53 = arith.constant 0 : index
      %57 = vector.load %arg12[%c0_51, %c0_52, %c0_53] : memref<4x8x8xf32, #tpu.memory_space<vmem>>, vector<4x8x8xf32>
      tpu.vector_store %arg12[%c0_51, %c0_52, %c0_53], %56 {strides = array<i32>} : memref<4x8x8xf32, #tpu.memory_space<vmem>>, vector<4x8x8xf32>,
    } else {
    }
    %c0 = arith.constant 0 : index
    %c0_1 = arith.constant 0 : index
    %c0_2 = arith.constant 0 : index
    %3 = vector.load %arg5[%c0, %c0_1, %c0_2] : memref<1x8x64xbf16, #tpu.memory_space<vmem>>, vector<1x8x32xbf16>
    %4 = vector.shape_cast %3 : vector<1x8x32xbf16> to vector<8x32xbf16>
    %5 = vector.shape_cast %4 : vector<8x32xbf16> to vector<8x4x8xbf16>
    %6 = tpu.transpose %5, [1, 0, 2] : vector<8x4x8xbf16> -> vector<4x8x8xbf16>
    %c0_3 = arith.constant 0 : index
    %c0_4 = arith.constant 0 : index
    %c32 = arith.constant 32 : index
    %7 = vector.load %arg5[%c0_3, %c0_4, %c32] : memref<1x8x64xbf16, #tpu.memory_space<vmem>>, vector<1x8x32xbf16>
    %8 = vector.shape_cast %7 : vector<1x8x32xbf16> to vector<8x32xbf16>
    %9 = vector.shape_cast %8 : vector<8x32xbf16> to vector<8x4x8xbf16>
    %10 = tpu.transpose %9, [1, 0, 2] : vector<8x4x8xbf16> -> vector<4x8x8xbf16>
    %c0_5 = arith.constant 0 : index
    %c0_6 = arith.constant 0 : index
    %c0_7 = arith.constant 0 : index
    %11 = vector.load %arg9[%c0_5, %c0_6, %c0_7] : memref<4x8x8xbf16, #tpu.memory_space<vmem>>, vector<4x8x8xbf16>
    "tpu.trace_start"() <{level = 10 : i32, message = "hqd,hkd->hqk"}> : () -> ()
    %cst = arith.constant dense<0.000000e+00> : vector<4x8x8xf32>
    %12 = tpu.matmul %11, %6, %cst {dimension_numbers = #tpu.dot_dimension_numbers<[2], [2], [1], [1], [0, 0, 0, 1, 1, 1], [0], [0]>} : vector<4x8x8xbf16>, vector<4x8x8xbf16>, vector<4x8x8xf32> -> vector<4x8x8xf32>
    "tpu.trace_stop"() : () -> ()
    %c0_8 = arith.constant 0 : index
    %c0_9 = arith.constant 0 : index
    %c0_10 = arith.constant 0 : index
    %c0_11 = arith.constant 0 : index
    %13 = vector.load %arg6[%c0_8, %c0_9, %c0_10, %c0_11] : memref<1x4x8x8xbf16, #tpu.memory_space<vmem>>, vector<1x4x8x8xbf16>
    %14 = vector.shape_cast %13 : vector<1x4x8x8xbf16> to vector<4x8x8xbf16>
    %15 = arith.extf %14 : vector<4x8x8xbf16> to vector<4x8x8xf32>
    %16 = arith.addf %12, %15 : vector<4x8x8xf32>
    %c0_12 = arith.constant 0 : index
    %c0_13 = arith.constant 0 : index
    %c0_14 = arith.constant 0 : index
    %17 = vector.load %arg10[%c0_12, %c0_13, %c0_14] : memref<4x8x1xf32, #tpu.memory_space<vmem>>, vector<4x8x1xf32>
    %cst_15 = arith.constant dense<0xFF800000> : vector<4x8xf32>
    %18 = vector.multi_reduction <maximumf>, %16, %cst_15 [2] : vector<4x8x8xf32> to vector<4x8xf32>
    %19 = vector.shape_cast %18 : vector<4x8xf32> to vector<4x8x1xf32>
    %20 = arith.maximumf %17, %19 : vector<4x8x1xf32>
    %21 = arith.subf %17, %20 : vector<4x8x1xf32>
    %22 = math.exp %21 : vector<4x8x1xf32>
    %23 = vector.broadcast %20 : vector<4x8x1xf32> to vector<4x8x8xf32>
    %24 = arith.subf %16, %23 : vector<4x8x8xf32>
    %25 = math.exp %24 : vector<4x8x8xf32>
    %c0_16 = arith.constant 0 : index
    %c0_17 = arith.constant 0 : index
    %c0_18 = arith.constant 0 : index
    %26 = vector.load %arg11[%c0_16, %c0_17, %c0_18] : memref<4x8x1xf32, #tpu.memory_space<vmem>>, vector<4x8x1xf32>
    %27 = arith.mulf %22, %26 : vector<4x8x1xf32>
    %cst_19 = arith.constant dense<0.000000e+00> : vector<4x8xf32>
    %28 = vector.multi_reduction <add>, %25, %cst_19 [2] : vector<4x8x8xf32> to vector<4x8xf32>
    %29 = vector.shape_cast %28 : vector<4x8xf32> to vector<4x8x1xf32>
    %30 = arith.addf %27, %29 : vector<4x8x1xf32>
    %c0_20 = arith.constant 0 : index
    %c0_21 = arith.constant 0 : index
    %c0_22 = arith.constant 0 : index
    %31 = vector.load %arg11[%c0_20, %c0_21, %c0_22] : memref<4x8x1xf32, #tpu.memory_space<vmem>>, vector<4x8x1xf32>
    tpu.vector_store %arg11[%c0_20, %c0_21, %c0_22], %30 {strides = array<i32>} : memref<4x8x1xf32, #tpu.memory_space<vmem>>, vector<4x8x1xf32>,
    %c0_23 = arith.constant 0 : index
    %c0_24 = arith.constant 0 : index
    %c0_25 = arith.constant 0 : index
    %32 = vector.load %arg12[%c0_23, %c0_24, %c0_25] : memref<4x8x8xf32, #tpu.memory_space<vmem>>, vector<4x8x8xf32>
    %33 = vector.broadcast %22 : vector<4x8x1xf32> to vector<4x8x8xf32>
    %34 = arith.mulf %33, %32 : vector<4x8x8xf32>
    %35 = arith.truncf %25 : vector<4x8x8xf32> to vector<4x8x8xbf16>
    "tpu.trace_start"() <{level = 10 : i32, message = "hqk,hkd->hqd"}> : () -> ()
    %cst_26 = arith.constant dense<0.000000e+00> : vector<4x8x8xf32>
    %36 = tpu.matmul %35, %10, %cst_26 {dimension_numbers = #tpu.dot_dimension_numbers<[2], [1], [1], [2], [0, 0, 0, 1, 1, 2], [0], [0]>} : vector<4x8x8xbf16>, vector<4x8x8xbf16>, vector<4x8x8xf32> -> vector<4x8x8xf32>
    "tpu.trace_stop"() : () -> ()
    %37 = arith.addf %34, %36 : vector<4x8x8xf32>
    %c0_27 = arith.constant 0 : index
    %c0_28 = arith.constant 0 : index
    %c0_29 = arith.constant 0 : index
    %38 = vector.load %arg12[%c0_27, %c0_28, %c0_29] : memref<4x8x8xf32, #tpu.memory_space<vmem>>, vector<4x8x8xf32>
    tpu.vector_store %arg12[%c0_27, %c0_28, %c0_29], %37 {strides = array<i32>} : memref<4x8x8xf32, #tpu.memory_space<vmem>>, vector<4x8x8xf32>,
    %c0_30 = arith.constant 0 : index
    %c0_31 = arith.constant 0 : index
    %c0_32 = arith.constant 0 : index
    %39 = vector.load %arg10[%c0_30, %c0_31, %c0_32] : memref<4x8x1xf32, #tpu.memory_space<vmem>>, vector<4x8x1xf32>
    tpu.vector_store %arg10[%c0_30, %c0_31, %c0_32], %20 {strides = array<i32>} : memref<4x8x1xf32, #tpu.memory_space<vmem>>, vector<4x8x1xf32>,
    %c0_i32_33 = arith.constant 0 : i32
    %40 = arith.cmpi eq, %arg2, %c0_i32_33 : i32
    %41 = arith.extui %40 : i1 to i32
    %c0_i32_34 = arith.constant 0 : i32
    %42 = arith.cmpi ne, %41, %c0_i32_34 : i32
    scf.if %42 {
      %c0_35 = arith.constant 0 : index
      %c0_36 = arith.constant 0 : index
      %c0_37 = arith.constant 0 : index
      %43 = vector.load %arg11[%c0_35, %c0_36, %c0_37] : memref<4x8x1xf32, #tpu.memory_space<vmem>>, vector<4x8x1xf32>
      %44 = tpu.reciprocal %43 {approx = true} : vector<4x8x1xf32> -> vector<4x8x1xf32>
      %c0_38 = arith.constant 0 : index
      %c0_39 = arith.constant 0 : index
      %c0_40 = arith.constant 0 : index
      %45 = vector.load %arg12[%c0_38, %c0_39, %c0_40] : memref<4x8x8xf32, #tpu.memory_space<vmem>>, vector<4x8x8xf32>
      %46 = vector.broadcast %44 : vector<4x8x1xf32> to vector<4x8x8xf32>
      %47 = arith.mulf %45, %46 : vector<4x8x8xf32>
      %48 = tpu.transpose %47, [1, 0, 2] : vector<4x8x8xf32> -> vector<8x4x8xf32>
      %49 = vector.shape_cast %48 : vector<8x4x8xf32> to vector<8x32xf32>
      %c0_41 = arith.constant 0 : index
      %c0_42 = arith.constant 0 : index
      %c32_43 = arith.constant 32 : index
      %50 = vector.load %arg4[%c0_41, %c0_42, %c32_43] : memref<1x8x64xbf16, #tpu.memory_space<vmem>>, vector<1x8x32xbf16>
      %51 = vector.shape_cast %50 : vector<1x8x32xbf16> to vector<8x32xbf16>
      %52 = arith.extf %51 : vector<8x32xbf16> to vector<8x32xf32>
      %53 = arith.negf %52 : vector<8x32xf32>
      %54 = math.exp %53 : vector<8x32xf32>
      %cst_44 = arith.constant 1.000000e+00 : f32
      %55 = vector.broadcast %cst_44 : f32 to vector<8x32xf32>
      %56 = arith.addf %55, %54 : vector<8x32xf32>
      %57 = arith.divf %55, %56 : vector<8x32xf32>
      %58 = arith.mulf %49, %57 : vector<8x32xf32>
      %59 = arith.truncf %58 : vector<8x32xf32> to vector<8x32xbf16>
      %c0_45 = arith.constant 0 : index
      %c0_46 = arith.constant 0 : index
      %60 = vector.load %arg7[%c0_45, %c0_46] : memref<32x32xbf16, #tpu.memory_space<vmem>>, vector<32x32xbf16>
      %cst_47 = arith.constant dense<0.000000e+00> : vector<8x32xf32>
      %61 = tpu.matmul %59, %60, %cst_47 {dimension_numbers = #tpu.dot_dimension_numbers<[1], [0], [0], [1], [0, 0, 1, 1], [], []>} : vector<8x32xbf16>, vector<32x32xbf16>, vector<8x32xf32> -> vector<8x32xf32>
      %62 = arith.truncf %61 : vector<8x32xf32> to vector<8x32xbf16>
      %c0_48 = arith.constant 0 : index
      %c0_49 = arith.constant 0 : index
      %c0_50 = arith.constant 0 : index
      %63 = vector.load %arg8[%c0_48, %c0_49, %c0_50] : memref<1x8x32xbf16, #tpu.memory_space<vmem>>, vector<1x8x32xbf16>
      %64 = vector.shape_cast %63 : vector<1x8x32xbf16> to vector<8x32xbf16>
      %65 = vector.shape_cast %62 : vector<8x32xbf16> to vector<1x8x32xbf16>
      tpu.vector_store %arg8[%c0_48, %c0_49, %c0_50], %65 {strides = array<i32>} : memref<1x8x32xbf16, #tpu.memory_space<vmem>>, vector<1x8x32xbf16>,
    } else {
    }
    return
  }
  func.func @transform_0(%arg0: i32, %arg1: i32, %arg2: i32, %arg3: memref<1xi32, #tpu.memory_space<smem>>) -> (i32, i32, i32) {
    %c0_i32 = arith.constant 0 : i32
    %c0_i32_0 = arith.constant 0 : i32
    return %arg0, %arg1, %c0_i32 : i32, i32, i32
  }
  func.func @transform_1(%arg0: i32, %arg1: i32, %arg2: i32, %arg3: memref<1xi32, #tpu.memory_space<smem>>) -> (i32, i32, i32) {
    %c0_i32 = arith.constant 0 : i32
    %c0_i32_0 = arith.constant 0 : i32
    return %arg0, %arg2, %c0_i32 : i32, i32, i32
  }
  func.func @transform_2(%arg0: i32, %arg1: i32, %arg2: i32, %arg3: memref<1xi32, #tpu.memory_space<smem>>) -> (i32, i32, i32, i32) {
    %c0 = arith.constant 0 : index
    %0 = memref.load %arg3[%c0] : memref<1xi32, #tpu.memory_space<smem>>
    %c0_i32 = arith.constant 0 : i32
    return %arg0, %0, %arg1, %arg2 : i32, i32, i32, i32
  }
  func.func @transform_3(%arg0: i32, %arg1: i32, %arg2: i32, %arg3: memref<1xi32, #tpu.memory_space<smem>>) -> (i32, i32) {
    %c0_i32 = arith.constant 0 : i32
    %c0_i32_0 = arith.constant 0 : i32
    %c0_i32_1 = arith.constant 0 : i32
    return %c0_i32, %c0_i32_0 : i32, i32
  }
  func.func @transform_4(%arg0: i32, %arg1: i32, %arg2: i32, %arg3: memref<1xi32, #tpu.memory_space<smem>>) -> (i32, i32, i32) {
    %c0_i32 = arith.constant 0 : i32
    %c0_i32_0 = arith.constant 0 : i32
    return %arg0, %arg1, %c0_i32 : i32, i32, i32
  }
}

module attributes {stable_mosaic.version = 11 : i64} {
  func.func @kernel(%arg0: i32, %arg1: i32, %arg2: i32, %arg3: memref<1x8x8x16xbf16, #tpu.memory_space<vmem>>, %arg4: memref<16x8xbf16, #tpu.memory_space<vmem>>, %arg5: memref<1x8xf32, #tpu.memory_space<vmem>>, %arg6: memref<1x8x8x8xbf16, #tpu.memory_space<vmem>>) attributes {dimension_semantics = [#tpu.dimension_semantics<parallel>, #tpu.dimension_semantics<parallel>, #tpu.dimension_semantics<parallel>], iteration_bounds = array<i64: 2, 1, 1>, scalar_prefetch = 0 : i64, scratch_operands = 0 : i64, tpu.core_type = #tpu.core_type<tc>, window_params = [{transform_indices = @transform_0, window_bounds = array<i64: 1, 8, 8, 16>}, {pipeline_mode = #tpu.pipeline_mode<synchronous>, transform_indices = @transform_1, window_bounds = array<i64: 16, 8>}, {pipeline_mode = #tpu.pipeline_mode<synchronous>, transform_indices = @transform_2, window_bounds = array<i64: 1, 8>}, {transform_indices = @transform_3, window_bounds = array<i64: 1, 8, 8, 8>}]} {
    %c0 = arith.constant 0 : index
    %c0_0 = arith.constant 0 : index
    %c0_1 = arith.constant 0 : index
    %c0_2 = arith.constant 0 : index
    %0 = vector.load %arg3[%c0, %c0_0, %c0_1, %c0_2] : memref<1x8x8x16xbf16, #tpu.memory_space<vmem>>, vector<1x8x8x16xbf16>
    %1 = vector.shape_cast %0 : vector<1x8x8x16xbf16> to vector<8x8x16xbf16>
    %2 = arith.extf %1 : vector<8x8x16xbf16> to vector<8x8x16xf32>
    %3 = vector.shape_cast %2 : vector<8x8x16xf32> to vector<64x16xf32>
    %cst = arith.constant dense<0.000000e+00> : vector<64xf32>
    %4 = vector.multi_reduction <add>, %3, %cst [1] : vector<64x16xf32> to vector<64xf32>
    %5 = vector.shape_cast %4 : vector<64xf32> to vector<64x1xf32>
    %cst_3 = arith.constant 1.600000e+01 : f32
    %6 = vector.broadcast %cst_3 : f32 to vector<64x1xf32>
    %7 = arith.divf %5, %6 : vector<64x1xf32>
    %8 = vector.broadcast %7 : vector<64x1xf32> to vector<64x16xf32>
    %9 = arith.subf %3, %8 : vector<64x16xf32>
    %10 = arith.mulf %9, %9 : vector<64x16xf32>
    %cst_4 = arith.constant dense<0.000000e+00> : vector<64xf32>
    %11 = vector.multi_reduction <add>, %10, %cst_4 [1] : vector<64x16xf32> to vector<64xf32>
    %12 = vector.shape_cast %11 : vector<64xf32> to vector<64x1xf32>
    %cst_5 = arith.constant 1.600000e+01 : f32
    %13 = vector.broadcast %cst_5 : f32 to vector<64x1xf32>
    %14 = arith.divf %12, %13 : vector<64x1xf32>
    %cst_6 = arith.constant 9.99999974E-6 : f32
    %15 = vector.broadcast %cst_6 : f32 to vector<64x1xf32>
    %16 = arith.addf %14, %15 : vector<64x1xf32>
    %17 = math.rsqrt %16 : vector<64x1xf32>
    %18 = vector.broadcast %17 : vector<64x1xf32> to vector<64x16xf32>
    %19 = arith.mulf %9, %18 : vector<64x16xf32>
    %20 = arith.truncf %19 : vector<64x16xf32> to vector<64x16xbf16>
    %c0_7 = arith.constant 0 : index
    %c0_8 = arith.constant 0 : index
    %21 = vector.load %arg4[%c0_7, %c0_8] : memref<16x8xbf16, #tpu.memory_space<vmem>>, vector<16x8xbf16>
    %cst_9 = arith.constant dense<0.000000e+00> : vector<64x8xf32>
    %22 = tpu.matmul %20, %21, %cst_9 {dimension_numbers = #tpu.dot_dimension_numbers<[1], [0], [0], [1], [0, 0, 1, 1], [], []>} : vector<64x16xbf16>, vector<16x8xbf16>, vector<64x8xf32> -> vector<64x8xf32>
    %c0_10 = arith.constant 0 : index
    %c0_11 = arith.constant 0 : index
    %23 = vector.load %arg5[%c0_10, %c0_11] : memref<1x8xf32, #tpu.memory_space<vmem>>, vector<1x8xf32>
    %24 = vector.broadcast %23 : vector<1x8xf32> to vector<64x8xf32>
    %25 = arith.addf %22, %24 : vector<64x8xf32>
    %26 = vector.shape_cast %25 : vector<64x8xf32> to vector<8x8x8xf32>
    %27 = tpu.transpose %26, [2, 0, 1] : vector<8x8x8xf32> -> vector<8x8x8xf32>
    %28 = arith.truncf %27 : vector<8x8x8xf32> to vector<8x8x8xbf16>
    %c0_12 = arith.constant 0 : index
    %c0_13 = arith.constant 0 : index
    %c0_14 = arith.constant 0 : index
    %c0_15 = arith.constant 0 : index
    %29 = vector.load %arg6[%c0_12, %c0_13, %c0_14, %c0_15] : memref<1x8x8x8xbf16, #tpu.memory_space<vmem>>, vector<1x8x8x8xbf16>
    %30 = vector.shape_cast %29 : vector<1x8x8x8xbf16> to vector<8x8x8xbf16>
    %31 = vector.shape_cast %28 : vector<8x8x8xbf16> to vector<1x8x8x8xbf16>
    tpu.vector_store %arg6[%c0_12, %c0_13, %c0_14, %c0_15], %31 {strides = array<i32>} : memref<1x8x8x8xbf16, #tpu.memory_space<vmem>>, vector<1x8x8x8xbf16>,
    return
  }
  func.func @transform_0(%arg0: i32, %arg1: i32, %arg2: i32) -> (i32, i32, i32, i32) {
    %c0_i32 = arith.constant 0 : i32
    %c0_i32_0 = arith.constant 0 : i32
    return %arg0, %arg1, %arg2, %c0_i32 : i32, i32, i32, i32
  }
  func.func @transform_1(%arg0: i32, %arg1: i32, %arg2: i32) -> (i32, i32) {
    %c0_i32 = arith.constant 0 : i32
    %c0_i32_0 = arith.constant 0 : i32
    %c0_i32_1 = arith.constant 0 : i32
    return %c0_i32, %c0_i32_0 : i32, i32
  }
  func.func @transform_2(%arg0: i32, %arg1: i32, %arg2: i32) -> (i32, i32) {
    %c0_i32 = arith.constant 0 : i32
    %c0_i32_0 = arith.constant 0 : i32
    %c0_i32_1 = arith.constant 0 : i32
    return %c0_i32, %c0_i32_0 : i32, i32
  }
  func.func @transform_3(%arg0: i32, %arg1: i32, %arg2: i32) -> (i32, i32, i32, i32) {
    %c0_i32 = arith.constant 0 : i32
    %c0_i32_0 = arith.constant 0 : i32
    return %arg0, %c0_i32, %arg1, %arg2 : i32, i32, i32, i32
  }
}

module attributes {stable_mosaic.version = 11 : i64} {
  func.func @kernel(%arg0: i32, %arg1: i32, %arg2: memref<1x8x32xbf16, #tpu.memory_space<vmem>>, %arg3: memref<1x8x32xbf16, #tpu.memory_space<vmem>>, %arg4: memref<1x8x32xbf16, #tpu.memory_space<vmem>>, %arg5: memref<1x8x32xbf16, #tpu.memory_space<vmem>>, %arg6: memref<32x64xbf16, #tpu.memory_space<vmem>>, %arg7: memref<1x64xbf16, #tpu.memory_space<vmem>>, %arg8: memref<32x64xbf16, #tpu.memory_space<vmem>>, %arg9: memref<1x64xbf16, #tpu.memory_space<vmem>>, %arg10: memref<32x192xbf16, #tpu.memory_space<vmem>>, %arg11: memref<64x32xbf16, #tpu.memory_space<vmem>>, %arg12: memref<1x8x32xbf16, #tpu.memory_space<vmem>>) attributes {dimension_semantics = [#tpu.dimension_semantics<parallel>, #tpu.dimension_semantics<parallel>], iteration_bounds = array<i64: 2, 1>, scalar_prefetch = 0 : i64, scratch_operands = 0 : i64, tpu.core_type = #tpu.core_type<tc>, window_params = [{transform_indices = @transform_0, window_bounds = array<i64: 1, 8, 32>}, {transform_indices = @transform_1, window_bounds = array<i64: 1, 8, 32>}, {transform_indices = @transform_2, window_bounds = array<i64: 1, 8, 32>}, {transform_indices = @transform_3, window_bounds = array<i64: 1, 8, 32>}, {pipeline_mode = #tpu.pipeline_mode<synchronous>, transform_indices = @transform_4, window_bounds = array<i64: 32, 64>}, {pipeline_mode = #tpu.pipeline_mode<synchronous>, transform_indices = @transform_5, window_bounds = array<i64: 1, 64>}, {pipeline_mode = #tpu.pipeline_mode<synchronous>, transform_indices = @transform_6, window_bounds = array<i64: 32, 64>}, {pipeline_mode = #tpu.pipeline_mode<synchronous>, transform_indices = @transform_7, window_bounds = array<i64: 1, 64>}, {pipeline_mode = #tpu.pipeline_mode<synchronous>, transform_indices = @transform_8, window_bounds = array<i64: 32, 192>}, {pipeline_mode = #tpu.pipeline_mode<synchronous>, transform_indices = @transform_9, window_bounds = array<i64: 64, 32>}, {transform_indices = @transform_10, window_bounds = array<i64: 1, 8, 32>}]} {
    %c0 = arith.constant 0 : index
    %c0_0 = arith.constant 0 : index
    %c0_1 = arith.constant 0 : index
    %0 = vector.load %arg2[%c0, %c0_0, %c0_1] : memref<1x8x32xbf16, #tpu.memory_space<vmem>>, vector<1x8x32xbf16>
    %1 = vector.shape_cast %0 : vector<1x8x32xbf16> to vector<8x32xbf16>
    %2 = arith.extf %1 : vector<8x32xbf16> to vector<8x32xf32>
    %c0_2 = arith.constant 0 : index
    %c0_3 = arith.constant 0 : index
    %c0_4 = arith.constant 0 : index
    %3 = vector.load %arg3[%c0_2, %c0_3, %c0_4] : memref<1x8x32xbf16, #tpu.memory_space<vmem>>, vector<1x8x32xbf16>
    %4 = vector.shape_cast %3 : vector<1x8x32xbf16> to vector<8x32xbf16>
    %c0_5 = arith.constant 0 : index
    %c0_6 = arith.constant 0 : index
    %5 = vector.load %arg6[%c0_5, %c0_6] : memref<32x64xbf16, #tpu.memory_space<vmem>>, vector<32x64xbf16>
    %cst = arith.constant dense<0.000000e+00> : vector<8x64xf32>
    %6 = tpu.matmul %4, %5, %cst {dimension_numbers = #tpu.dot_dimension_numbers<[1], [0], [0], [1], [0, 0, 1, 1], [], []>} : vector<8x32xbf16>, vector<32x64xbf16>, vector<8x64xf32> -> vector<8x64xf32>
    %c0_7 = arith.constant 0 : index
    %c0_8 = arith.constant 0 : index
    %7 = vector.load %arg7[%c0_7, %c0_8] : memref<1x64xbf16, #tpu.memory_space<vmem>>, vector<1x64xbf16>
    %8 = arith.extf %7 : vector<1x64xbf16> to vector<1x64xf32>
    %9 = vector.broadcast %8 : vector<1x64xf32> to vector<8x64xf32>
    %10 = arith.addf %6, %9 : vector<8x64xf32>
    %11 = arith.negf %10 : vector<8x64xf32>
    %12 = math.exp %11 : vector<8x64xf32>
    %cst_9 = arith.constant 1.000000e+00 : f32
    %13 = vector.broadcast %cst_9 : f32 to vector<8x64xf32>
    %14 = arith.addf %13, %12 : vector<8x64xf32>
    %15 = arith.divf %13, %14 : vector<8x64xf32>
    %16 = vector.extract_strided_slice %15 {offsets = [0, 0], sizes = [8, 32], strides = [1, 1]} : vector<8x64xf32> to vector<8x32xf32>
    %17 = vector.extract_strided_slice %15 {offsets = [0, 32], sizes = [8, 32], strides = [1, 1]} : vector<8x64xf32> to vector<8x32xf32>
    %c0_10 = arith.constant 0 : index
    %c0_11 = arith.constant 0 : index
    %c0_12 = arith.constant 0 : index
    %18 = vector.load %arg5[%c0_10, %c0_11, %c0_12] : memref<1x8x32xbf16, #tpu.memory_space<vmem>>, vector<1x8x32xbf16>
    %19 = vector.shape_cast %18 : vector<1x8x32xbf16> to vector<8x32xbf16>
    %20 = arith.extf %19 : vector<8x32xbf16> to vector<8x32xf32>
    %21 = arith.mulf %16, %20 : vector<8x32xf32>
    %22 = arith.addf %2, %21 : vector<8x32xf32>
    %c0_13 = arith.constant 0 : index
    %c0_14 = arith.constant 0 : index
    %c0_15 = arith.constant 0 : index
    %23 = vector.load %arg4[%c0_13, %c0_14, %c0_15] : memref<1x8x32xbf16, #tpu.memory_space<vmem>>, vector<1x8x32xbf16>
    %24 = vector.shape_cast %23 : vector<1x8x32xbf16> to vector<8x32xbf16>
    %c0_16 = arith.constant 0 : index
    %c0_17 = arith.constant 0 : index
    %25 = vector.load %arg8[%c0_16, %c0_17] : memref<32x64xbf16, #tpu.memory_space<vmem>>, vector<32x64xbf16>
    %cst_18 = arith.constant dense<0.000000e+00> : vector<8x64xf32>
    %26 = tpu.matmul %24, %25, %cst_18 {dimension_numbers = #tpu.dot_dimension_numbers<[1], [0], [0], [1], [0, 0, 1, 1], [], []>} : vector<8x32xbf16>, vector<32x64xbf16>, vector<8x64xf32> -> vector<8x64xf32>
    %c0_19 = arith.constant 0 : index
    %c0_20 = arith.constant 0 : index
    %27 = vector.load %arg9[%c0_19, %c0_20] : memref<1x64xbf16, #tpu.memory_space<vmem>>, vector<1x64xbf16>
    %28 = arith.extf %27 : vector<1x64xbf16> to vector<1x64xf32>
    %29 = vector.broadcast %28 : vector<1x64xf32> to vector<8x64xf32>
    %30 = arith.addf %26, %29 : vector<8x64xf32>
    %cst_21 = arith.constant dense<0.000000e+00> : vector<8xf32>
    %31 = vector.multi_reduction <add>, %22, %cst_21 [1] : vector<8x32xf32> to vector<8xf32>
    %32 = vector.shape_cast %31 : vector<8xf32> to vector<8x1xf32>
    %cst_22 = arith.constant 3.200000e+01 : f32
    %33 = vector.broadcast %cst_22 : f32 to vector<8x1xf32>
    %34 = arith.divf %32, %33 : vector<8x1xf32>
    %35 = vector.broadcast %34 : vector<8x1xf32> to vector<8x32xf32>
    %36 = arith.subf %22, %35 : vector<8x32xf32>
    %37 = arith.mulf %36, %36 : vector<8x32xf32>
    %cst_23 = arith.constant dense<0.000000e+00> : vector<8xf32>
    %38 = vector.multi_reduction <add>, %37, %cst_23 [1] : vector<8x32xf32> to vector<8xf32>
    %39 = vector.shape_cast %38 : vector<8xf32> to vector<8x1xf32>
    %cst_24 = arith.constant 3.200000e+01 : f32
    %40 = vector.broadcast %cst_24 : f32 to vector<8x1xf32>
    %41 = arith.divf %39, %40 : vector<8x1xf32>
    %cst_25 = arith.constant 9.99999974E-6 : f32
    %42 = vector.broadcast %cst_25 : f32 to vector<8x1xf32>
    %43 = arith.addf %41, %42 : vector<8x1xf32>
    %44 = math.rsqrt %43 : vector<8x1xf32>
    %45 = vector.broadcast %44 : vector<8x1xf32> to vector<8x32xf32>
    %46 = arith.mulf %36, %45 : vector<8x32xf32>
    %47 = vector.extract_strided_slice %30 {offsets = [0, 0], sizes = [8, 32], strides = [1, 1]} : vector<8x64xf32> to vector<8x32xf32>
    %48 = arith.negf %47 : vector<8x32xf32>
    %49 = math.exp %48 : vector<8x32xf32>
    %cst_26 = arith.constant 1.000000e+00 : f32
    %50 = vector.broadcast %cst_26 : f32 to vector<8x32xf32>
    %51 = arith.addf %50, %49 : vector<8x32xf32>
    %52 = arith.divf %50, %51 : vector<8x32xf32>
    %53 = arith.mulf %46, %52 : vector<8x32xf32>
    %54 = vector.extract_strided_slice %30 {offsets = [0, 32], sizes = [8, 32], strides = [1, 1]} : vector<8x64xf32> to vector<8x32xf32>
    %55 = arith.addf %53, %54 : vector<8x32xf32>
    %56 = arith.truncf %55 : vector<8x32xf32> to vector<8x32xbf16>
    %c0_27 = arith.constant 0 : index
    %c0_28 = arith.constant 0 : index
    %57 = vector.load %arg10[%c0_27, %c0_28] : memref<32x192xbf16, #tpu.memory_space<vmem>>, vector<32x192xbf16>
    %cst_29 = arith.constant dense<0.000000e+00> : vector<8x192xf32>
    %58 = tpu.matmul %56, %57, %cst_29 {dimension_numbers = #tpu.dot_dimension_numbers<[1], [0], [0], [1], [0, 0, 1, 1], [], []>} : vector<8x32xbf16>, vector<32x192xbf16>, vector<8x192xf32> -> vector<8x192xf32>
    %59 = vector.extract_strided_slice %58 {offsets = [0, 0], sizes = [8, 64], strides = [1, 1]} : vector<8x192xf32> to vector<8x64xf32>
    %60 = vector.extract_strided_slice %58 {offsets = [0, 64], sizes = [8, 64], strides = [1, 1]} : vector<8x192xf32> to vector<8x64xf32>
    %61 = vector.extract_strided_slice %58 {offsets = [0, 128], sizes = [8, 64], strides = [1, 1]} : vector<8x192xf32> to vector<8x64xf32>
    %62 = arith.negf %60 : vector<8x64xf32>
    %63 = math.exp %62 : vector<8x64xf32>
    %cst_30 = arith.constant 1.000000e+00 : f32
    %64 = vector.broadcast %cst_30 : f32 to vector<8x64xf32>
    %65 = arith.addf %64, %63 : vector<8x64xf32>
    %66 = arith.divf %64, %65 : vector<8x64xf32>
    %67 = arith.mulf %60, %66 : vector<8x64xf32>
    %68 = arith.mulf %67, %59 : vector<8x64xf32>
    %69 = arith.mulf %68, %61 : vector<8x64xf32>
    %70 = arith.truncf %69 : vector<8x64xf32> to vector<8x64xbf16>
    %c0_31 = arith.constant 0 : index
    %c0_32 = arith.constant 0 : index
    %71 = vector.load %arg11[%c0_31, %c0_32] : memref<64x32xbf16, #tpu.memory_space<vmem>>, vector<64x32xbf16>
    %cst_33 = arith.constant dense<0.000000e+00> : vector<8x32xf32>
    %72 = tpu.matmul %70, %71, %cst_33 {dimension_numbers = #tpu.dot_dimension_numbers<[1], [0], [0], [1], [0, 0, 1, 1], [], []>} : vector<8x64xbf16>, vector<64x32xbf16>, vector<8x32xf32> -> vector<8x32xf32>
    %73 = arith.mulf %17, %72 : vector<8x32xf32>
    %74 = arith.addf %22, %73 : vector<8x32xf32>
    %75 = arith.truncf %74 : vector<8x32xf32> to vector<8x32xbf16>
    %c0_34 = arith.constant 0 : index
    %c0_35 = arith.constant 0 : index
    %c0_36 = arith.constant 0 : index
    %76 = vector.load %arg12[%c0_34, %c0_35, %c0_36] : memref<1x8x32xbf16, #tpu.memory_space<vmem>>, vector<1x8x32xbf16>
    %77 = vector.shape_cast %76 : vector<1x8x32xbf16> to vector<8x32xbf16>
    %78 = vector.shape_cast %75 : vector<8x32xbf16> to vector<1x8x32xbf16>
    tpu.vector_store %arg12[%c0_34, %c0_35, %c0_36], %78 {strides = array<i32>} : memref<1x8x32xbf16, #tpu.memory_space<vmem>>, vector<1x8x32xbf16>,
    return
  }
  func.func @transform_0(%arg0: i32, %arg1: i32) -> (i32, i32, i32) {
    %c0_i32 = arith.constant 0 : i32
    %c0_i32_0 = arith.constant 0 : i32
    return %arg0, %arg1, %c0_i32 : i32, i32, i32
  }
  func.func @transform_1(%arg0: i32, %arg1: i32) -> (i32, i32, i32) {
    %c0_i32 = arith.constant 0 : i32
    %c0_i32_0 = arith.constant 0 : i32
    return %arg0, %arg1, %c0_i32 : i32, i32, i32
  }
  func.func @transform_2(%arg0: i32, %arg1: i32) -> (i32, i32, i32) {
    %c0_i32 = arith.constant 0 : i32
    %c0_i32_0 = arith.constant 0 : i32
    return %arg0, %arg1, %c0_i32 : i32, i32, i32
  }
  func.func @transform_3(%arg0: i32, %arg1: i32) -> (i32, i32, i32) {
    %c0_i32 = arith.constant 0 : i32
    %c0_i32_0 = arith.constant 0 : i32
    return %arg0, %arg1, %c0_i32 : i32, i32, i32
  }
  func.func @transform_4(%arg0: i32, %arg1: i32) -> (i32, i32) {
    %c0_i32 = arith.constant 0 : i32
    %c0_i32_0 = arith.constant 0 : i32
    %c0_i32_1 = arith.constant 0 : i32
    return %c0_i32, %c0_i32_0 : i32, i32
  }
  func.func @transform_5(%arg0: i32, %arg1: i32) -> (i32, i32) {
    %c0_i32 = arith.constant 0 : i32
    %c0_i32_0 = arith.constant 0 : i32
    %c0_i32_1 = arith.constant 0 : i32
    return %c0_i32, %c0_i32_0 : i32, i32
  }
  func.func @transform_6(%arg0: i32, %arg1: i32) -> (i32, i32) {
    %c0_i32 = arith.constant 0 : i32
    %c0_i32_0 = arith.constant 0 : i32
    %c0_i32_1 = arith.constant 0 : i32
    return %c0_i32, %c0_i32_0 : i32, i32
  }
  func.func @transform_7(%arg0: i32, %arg1: i32) -> (i32, i32) {
    %c0_i32 = arith.constant 0 : i32
    %c0_i32_0 = arith.constant 0 : i32
    %c0_i32_1 = arith.constant 0 : i32
    return %c0_i32, %c0_i32_0 : i32, i32
  }
  func.func @transform_8(%arg0: i32, %arg1: i32) -> (i32, i32) {
    %c0_i32 = arith.constant 0 : i32
    %c0_i32_0 = arith.constant 0 : i32
    %c0_i32_1 = arith.constant 0 : i32
    return %c0_i32, %c0_i32_0 : i32, i32
  }
  func.func @transform_9(%arg0: i32, %arg1: i32) -> (i32, i32) {
    %c0_i32 = arith.constant 0 : i32
    %c0_i32_0 = arith.constant 0 : i32
    %c0_i32_1 = arith.constant 0 : i32
    return %c0_i32, %c0_i32_0 : i32, i32
  }
  func.func @transform_10(%arg0: i32, %arg1: i32) -> (i32, i32, i32) {
    %c0_i32 = arith.constant 0 : i32
    %c0_i32_0 = arith.constant 0 : i32
    return %arg0, %arg1, %c0_i32 : i32, i32, i32
  }
}

</mosaic_0001>

<bundles_post_ra>
// kernel: diffusion_transformer_forward.8
= control target key start
LH: loop header
LB: loop body
LE: loop exit
PB: predicated region body
PF: predicated region fallthrough
CT: control target
= control target key end

     0   :  { %vm13_vm0 = vcmask 261120   ;;  %s139_s0 = inlined_call_operand.vmem [shape: bf16[16,32], index: 0, kind: input, shape index: {}]   ;;  %s140_s1 = inlined_call_operand.hbm [shape: bf16[16,32], index: 1, kind: output, shape index: {}]  }
   0x1   :  { %v73_v0 = vld [vmem:[%s139_s0] sm:$0xff]  }
   0x2   :  { %6 = vsyncpa [#allocation3], 0  ;;  %v74_v1 = vunpack.c.l.bf16 %v73_v0  ;;  %v75_v2 = vunpack.c.h.bf16 %v73_v0  ;;  %vm49_vm1 = vcmask 257024   ;;  %s107_s0 = smov [#allocation2]  }
   0x3   :  { %s57_s8 = sshll.u32 %s107_s0, 4  ;;  %s58_s8 = int_to_ptr.vmem [resolvable:$true] %s57_s8 }
   0x4   :  { %v14_v3 = vsel %vm13_vm0, %v74_v1, 0.0  ;;  %v17_v4 = vsel %vm13_vm0, %v75_v2, 0.0  ;;  %s83_s9 = scalar_lea.vmem %s58_s8, 128  ;;  %p88_p1 = scmp.lt.s32.totalorder %s58_s8, %s58_s8 }
   0x5   :  { %15 = vadd.xlane.f32.xlu0 %v14_v3  ;;  %p84_p0 = scmp.ne.s32.totalorder %s58_s8, %s83_s9  ;;  %p89_p2 = scmp.lt.s32.totalorder %s83_s9, %s83_s9 }
   0x7   :  { %p90_p3 = por %p89_p2, %p88_p1 }
   0x9   :  { %18 = vadd.xlane.f32.xlu0 %v17_v4  ;;  %p91_p4 = pnand %p90_p3, %p84_p0 }
  0x92   :  { %v16_v5 = vpop.xlane.xlu0 %15 }
  0x93   :  { %v21_v6 = vmul.f32 0.03125, %v16_v5 }
  0x95   :  { %v23_v7 = vsub.f32 %v74_v1, %v21_v6 }
  0x96   :  { %v19_v8 = vpop.xlane.xlu0 %18 }
  0x97   :  { %v22_v9 = vmul.f32 0.03125, %v19_v8  ;;  %v25_v10 = vmul.f32 %v23_v7, %v23_v7 }
  0x99   :  { %v24_v11 = vsub.f32 %v75_v2, %v22_v9  ;;  %v27_v12 = vsel %vm13_vm0, %v25_v10, 0.0 }
  0x9a   :  { %28 = vadd.xlane.f32.xlu1 %v27_v12 }
  0x9b   :  { %v26_v13 = vmul.f32 %v24_v11, %v24_v11 }
  0x9d   :  { %v30_v14 = vsel %vm13_vm0, %v26_v13, 0.0 }
  0x9e   :  { %31 = vadd.xlane.f32.xlu1 %v30_v14 }
 0x127   :  { %v29_v15 = vpop.xlane.xlu1 %28 }
 0x128   :  { %v33_v16 = vmul.f32 0.03125, %v29_v15 }
 0x12a   :  { %v35_v17 = vadd.f32 1e-05, %v33_v16 }
 0x12b   :  { %v32_v18 = vpop.xlane.xlu1 %31 }
 0x12c   :  { %79 = vrsqrt.f32 %v35_v17  ;;  %v34_v19 = vmul.f32 0.03125, %v32_v18 }
 0x12e   :  { %v36_v20 = vadd.f32 1e-05, %v34_v19 }
 0x130   :  { %81 = vrsqrt.f32 %v36_v20 }
 0x136   :  { %v80_v21 = vpop.eup %79 }
 0x137   :  { %v39_v22 = vmul.f32 %v80_v21, %v23_v7 }
 0x139   :  { %v70_v23 = vpack.c.bf16 %v39_v22, %v39_v22 }
 0x13a   :  { %v82_v24 = vpop.eup %81 }
 0x13b   :  { %v40_v25 = vmul.f32 %v82_v24, %v24_v11  ;;  %50 = vst.msk [vmem:[#allocation2] sm:$0xf] %vm49_vm1, %v70_v23 }
 0x13d   :  { %v71_v26 = vpack.c.bf16 %v40_v25, %v40_v25 }
 0x13f   :  { %51 = vst.msk [vmem:[#allocation2 + $0x4] sm:$0xf] %vm49_vm1, %v71_v26 }
 0x140   :  { %94 = shalt.err (!%p91_p4)
}
 0x141   :  { %s95_s12 = scalar_lea.hbm %s140_s1, 128 }
 0x142   :  { %p96_p5 = scmp.ne.s32.totalorder %s140_s1, %s95_s12  ;;  %p99_p6 = scmp.lt.u32.totalorder %s95_s12, %s140_s1 }
 0x144   :  { %p101_p7 = pnand %p99_p6, %p96_p5 }
 0x146   :  { %104 = shalt.err (!%p101_p7)
}
 0x147   :  { %s108_s17 = smov 64   ;;  %s109_s18 = smov 4  }
 0x148   :  { %63 = dma.vmem_to_hbm [thread:$0]  %s58_s8, 128, %s140_s1, [#allocation3], %s108_s17, %s108_s17, %s109_s18  }
 0x149   :  { %105 = dma.done.wait [#allocation3], 128  }
 0x14a   :  { %106 = vsyncadd [#allocation3], 4294967168 }
 0x14b   :  { %67 = vsyncpa [#allocation3], 1 }

// kernel: diffusion_transformer_forward.10
= control target key start
LH: loop header
LB: loop body
LE: loop exit
PB: predicated region body
PF: predicated region fallthrough
CT: control target
= control target key end

     0   :  { %s1725_s0 = inlined_call_operand.hbm [shape: bf16[2,8,32], index: 0, kind: input, shape index: {}]   ;;  %s1726_s1 = inlined_call_operand.hbm [shape: bf16[2,8,32], index: 1, kind: input, shape index: {}]   ;;  %s1727_s2 = inlined_call_operand.hbm [shape: bf16[32,64], index: 2, kind: input, shape index: {}]   ;;  %s1728_s3 = inlined_call_operand.hbm [shape: bf16[1,64], index: 3, kind: input, shape index: {}]   ;;  %s1729_s4 = inlined_call_operand.hbm [shape: bf16[32,128], index: 4, kind: input, shape index: {}]   ;;  %s1730_s5 = inlined_call_operand.hbm [shape: bf16[1,128], index: 5, kind: input, shape index: {}]   ;;  %s1731_s6 = inlined_call_operand.hbm [shape: bf16[2,8,64], index: 6, kind: output, shape index: {0}]   ;;  %s1732_s7 = inlined_call_operand.hbm [shape: bf16[2,8,64], index: 7, kind: output, shape index: {1}]  }
   0x1   :  { %1739 = sst [smem:[#allocation24_spill]] %s1727_s2 }
   0x2   :  { %1740 = sst [smem:[#allocation25_spill]] %s1728_s3 }
   0x3   :  { %1741 = sst [smem:[#allocation26_spill]] %s1729_s4 }
   0x4   :  { %1742 = sst [smem:[#allocation27_spill]] %s1730_s5 }
   0x5   :  { %1743 = sst [smem:[#allocation28_spill]] %s1732_s7 }
   0x6   :  { %13 = vsyncpa [#allocation3], 0 }
   0x7   :  { %15 = vsyncpa [#allocation3 + $0x1], 0 }
   0x8   :  { %16 = vsyncpa [#allocation6], 0 }
   0x9   :  { %18 = vsyncpa [#allocation6 + $0x1], 0 }
   0xa   :  { %19 = vsyncpa [#allocation9], 0 }
   0xb   :  { %20 = vsyncpa [#allocation12], 0 }
   0xc   :  { %21 = vsyncpa [#allocation4], 0 }
   0xd   :  { %23 = vsyncpa [#allocation4 + $0x1], 0 }
   0xe   :  { %24 = vsyncpa [#allocation15], 0 }
   0xf   :  { %26 = vsyncpa [#allocation15 + $0x1], 0  ;;  %s1344_s24 = smov 0   ;;  %s1346_s25 = smov 0  }
  0x10   :  { %s1348_s26 = smov 0   ;;  %s1350_s27 = smov 0  }
  0x11   :  { %s1352_s28 = smov 0   ;;  %s1354_s29 = smov 0  }
  0x12 LB: > { %s1375_s30 = sadd.s32 4294967295, %s1288_s29   ;;  %p801_p0 = scmp.ge.s32.totalorder %s1288_s29, 1  ;;  %s1288_s29 = sphi %s1354_s29, %s32_s29   ;;  %s1284_s28 = sphi %s1352_s28, %s1775_s28   ;;  %s1280_s27 = sphi %s1350_s27, %s1774_s27   ;;  %s1276_s26 = sphi %s1348_s26, %s1773_s26   ;;  %s1272_s25 = sphi %s1346_s25, %s1772_s25   ;;  %s1268_s24 = sphi %s1344_s24, %s1771_s24  }
  0x13   : > { %p1734_p1 = scmp.eq.s32.totalorder %s1375_s30, 0  ;;  %p245_p2 = scmp.lt.s32.totalorder %s1288_s29, 3 }
  0x14   : > { %s1290_s9 = smov [#allocation7]   ;;  %s1291_s12 = smov [#allocation8]  }
  0x15   : > { %p1380_p3 = pnand %p801_p0, %p245_p2  ;;  %s257_s10 = sshll.u32 %s1290_s9, 4  ;;  %s1384_s10 = int_to_ptr.vmem [resolvable:$true] %s257_s10 }
  0x16   : > { %s271_s13 = sshll.u32 %s1291_s12, 4  ;;  %s1292_s14 = smov [#allocation10]   ;;  %s1395_s13 = int_to_ptr.vmem [resolvable:$true] %s271_s13 }
  0x17   : > { %s1744_s8 = scalar_select %p1380_p3, 1, 0 }
  0x18   : > { %p881_p4 = pneg %p1380_p3  ;;  %s1397_s15 = sshll.u32 %s1292_s14, 4  ;;  %s282_s15 = int_to_ptr.vmem [resolvable:$true] %s1397_s15 }
  0x19   : > { %s1746_s2 = sld [smem:[#allocation24_spill]] }
  0x1a   : > { %p1391_p6 = pnand %p881_p4, %p1734_p1 }
  0x1c   : > { %p1407_p8 = pneg %p1391_p6 }
  0x1f   : > { %s986_s18 = scalar_lea.hbm %s1746_s2, 256 }
  0x20   : > { %p987_p7 = scmp.ne.s32.totalorder %s1746_s2, %s986_s18  ;;  %p993_p11 = scmp.lt.u32.totalorder %s986_s18, %s1746_s2 }
  0x22   : > { %p989_p9 = pnand %p1407_p8, %p987_p7 }
  0x24   : > { %p990_p10 = pneg %p989_p9 }
  0x26   : > { %p995_p12 = pnand %p993_p11, %p990_p10 }
  0x28   : > { %998 = shalt.err (!%p995_p12)
}
  0x29   : > { %s999_s9 = scalar_lea.vmem %s1384_s10, 256  ;;  %p1007_p4 = scmp.lt.s32.totalorder %s1384_s10, %s1384_s10 }
  0x2a   : > { %p1000_p13 = scmp.ne.s32.totalorder %s1384_s10, %s999_s9  ;;  %p1008_p5 = scmp.lt.s32.totalorder %s999_s9, %s999_s9 }
  0x2c   : > { %p1002_p0 = pnand %p1000_p13, %p1407_p8  ;;  %p1009_p7 = por %p1008_p5, %p1007_p4 }
  0x2e   : > { %p1003_p2 = pneg %p1002_p0 }
  0x30   : > { %p1010_p9 = pnand %p1009_p7, %p1003_p2 }
  0x32   : > { %1013 = shalt.err (!%p1010_p9)
}
  0x33   : > { %s1293_s12 = smov 64   ;;  %s1294_s14 = smov 4  }
  0x34   : > { %884 = dma.hbm_to_vmem [thread:$0]  (!%p1391_p6), %s1746_s2, 256, %s1384_s10, [#allocation6], %s1293_s12, %s1293_s12, %s1294_s14  }
  0x35   : > { %s1748_s3 = sld [smem:[#allocation25_spill]] }
  0x3b   : > { %s1014_s20 = scalar_lea.hbm %s1748_s3, 16 }
  0x3c   : > { %p1015_p5 = scmp.ne.s32.totalorder %s1748_s3, %s1014_s20  ;;  %p1021_p12 = scmp.lt.u32.totalorder %s1014_s20, %s1748_s3 }
  0x3e   : > { %p1017_p10 = pnand %p1015_p5, %p1407_p8 }
  0x40   : > { %p1018_p11 = pneg %p1017_p10 }
  0x42   : > { %p1023_p13 = pnand %p1021_p12, %p1018_p11 }
  0x44   : > { %1026 = shalt.err (!%p1023_p13)
}
  0x45   : > { %s1027_s10 = scalar_lea.vmem %s1395_s13, 16  ;;  %s1034_s16 = scalar_lea.vmem %s1395_s13, 32 }
  0x46   : > { %p1028_p0 = scmp.ne.s32.totalorder %s1395_s13, %s1027_s10  ;;  %p1035_p7 = scmp.lt.s32.totalorder %s1395_s13, %s1395_s13 }
  0x47   : > { %p1036_p9 = scmp.lt.s32.totalorder %s1034_s16, %s1027_s10 }
  0x48   : > { %p1030_p2 = pnand %p1028_p0, %p1407_p8 }
  0x49   : > { %p1037_p5 = por %p1036_p9, %p1035_p7 }
  0x4a   : > { %p1031_p4 = pneg %p1030_p2 }
  0x4c   : > { %p1038_p10 = pnand %p1037_p5, %p1031_p4 }
  0x4e   : > { %1041 = shalt.err (!%p1038_p10)
}
  0x4f   : > { %887 = dma.hbm_to_vmem [thread:$0]  (!%p1391_p6), %s1748_s3, 16, %s1395_s13, [#allocation9]  }
  0x50   : > { %s1749_s4 = sld [smem:[#allocation26_spill]] }
  0x56   : > { %s1042_s20 = scalar_lea.hbm %s1749_s4, 256 }
  0x57   : > { %p1043_p11 = scmp.ne.s32.totalorder %s1749_s4, %s1042_s20  ;;  %p1049_p0 = scmp.lt.u32.totalorder %s1042_s20, %s1749_s4 }
  0x59   : > { %p1045_p12 = pnand %p1043_p11, %p1407_p8 }
  0x5b   : > { %p1046_p13 = pneg %p1045_p12 }
  0x5d   : > { %p1051_p2 = pnand %p1049_p0, %p1046_p13 }
  0x5f   : > { %1054 = shalt.err (!%p1051_p2)
}
  0x60   : > { %s1055_s16 = scalar_lea.vmem %s282_s15, 256  ;;  %p1063_p5 = scmp.lt.s32.totalorder %s282_s15, %s282_s15 }
  0x61   : > { %p1056_p4 = scmp.ne.s32.totalorder %s282_s15, %s1055_s16  ;;  %p1064_p10 = scmp.lt.s32.totalorder %s1055_s16, %s1055_s16 }
  0x63   : > { %p1058_p7 = pnand %p1056_p4, %p1407_p8  ;;  %p1065_p1 = por %p1064_p10, %p1063_p5 }
  0x65   : > { %p1059_p9 = pneg %p1058_p7 }
  0x67   : > { %p1066_p3 = pnand %p1065_p1, %p1059_p9 }
  0x69   : > { %1069 = shalt.err (!%p1066_p3)
}
  0x6a   : > { %890 = dma.hbm_to_vmem [thread:$0]  (!%p1391_p6), %s1749_s4, 256, %s282_s15, [#allocation9], %s1293_s12, %s1293_s12, %s1294_s14  }
  0x6b   : > { %s1295_s17 = smov [#allocation11]   ;;  %s1750_s5 = sld [smem:[#allocation27_spill]] }
  0x6c   : > { %s295_s18 = sshll.u32 %s1295_s17, 4  ;;  %s296_s18 = int_to_ptr.vmem [resolvable:$true] %s295_s18 }
  0x71   : > { %s1070_s22 = scalar_lea.hbm %s1750_s5, 16 }
  0x72   : > { %p1071_p1 = scmp.ne.s32.totalorder %s1750_s5, %s1070_s22  ;;  %p1077_p12 = scmp.lt.u32.totalorder %s1070_s22, %s1750_s5 }
  0x74   : > { %p1073_p3 = pnand %p1071_p1, %p1407_p8 }
  0x76   : > { %p1074_p11 = pneg %p1073_p3 }
  0x78   : > { %p1079_p13 = pnand %p1077_p12, %p1074_p11 }
  0x7a   : > { %1082 = shalt.err (!%p1079_p13)
}
  0x7b   : > { %s1083_s15 = scalar_lea.vmem %s296_s18, 16  ;;  %s1090_s12 = scalar_lea.vmem %s296_s18, 32 }
  0x7c   : > { %p1084_p0 = scmp.ne.s32.totalorder %s296_s18, %s1083_s15  ;;  %p1091_p7 = scmp.lt.s32.totalorder %s296_s18, %s296_s18 }
  0x7d   : > { %p1092_p9 = scmp.lt.s32.totalorder %s1090_s12, %s1083_s15 }
  0x7e   : > { %p1086_p2 = pnand %p1084_p0, %p1407_p8 }
  0x7f   : > { %p1093_p5 = por %p1092_p9, %p1091_p7 }
  0x80   : > { %p1087_p4 = pneg %p1086_p2 }
  0x82   : > { %p1094_p10 = pnand %p1093_p5, %p1087_p4 }
  0x84   : > { %1097 = shalt.err (!%p1094_p10)
}
  0x85   : > { %893 = dma.hbm_to_vmem [thread:$0]  (!%p1391_p6), %s1750_s5, 16, %s296_s18, [#allocation12]  }
  0x86   : > { %s800_s21 = sadd.s32 4294967294, %s1288_s29   ;;  %s44_s7 = sadd.s32 1, %s1284_s28 }
  0x87   : > { %p46_p8 = scmp.ge.s32.totalorder %s44_s7, 2  ;;  %s53_s11 = sadd.s32 1, %s1276_s26 }
  0x88   : > { %p60_p1 = scmp.ne.s32.totalorder %s1276_s26, %s1272_s25  ;;  %p61_p3 = scmp.eq.s32.totalorder %s1288_s29, 0 }
  0x89   : > { %s1777_s7 = smov (%p46_p8, %s44_s7), 0  ;;  %p66_p12 = scmp.ne.s32.totalorder %s1272_s25, %s1268_s24 }
  0x8a   : > { %1751 = sst [smem:[#allocation23_spill]] %s1777_s7  ;;  %p1503_p11 = por %p61_p3, %p60_p1 }
  0x8b   : > { %s48_s18 = ssub.s32 %s1284_s28, %s1777_s7  ;;  %p204_p6 = scmp.eq.s32.totalorder %s1375_s30, 1 }
  0x8c   : > { %p51_p13 = scmp.eq.s32.totalorder %s48_s18, 0  ;;  %p1753_p0 = scmp.eq.s32.totalorder %s1375_s30, 0 }
  0x8d   : > { %p1518_p4 = por %p204_p6, %p60_p1  ;;  %p210_p7 = scmp.eq.s32.totalorder %s800_s21, 1 }
  0x8e   : > { %p1514_p2 = por %p1753_p0, %p66_p12  ;;  %p912_p5 = scmp.lt.s32.totalorder %s1288_s29, 2 }
  0x8f   : > { %s1755_s20 = scalar_select %p1518_p4, 1, 0 }
  0x90   : > { %s1754_s19 = scalar_select %p1514_p2, 1, 0 }
  0x91   : > { %s1523_s22 = scalar_select %p51_p13, %s1276_s26, %s53_s11  }
  0x92   : > { %p1525_p9 = por %p210_p7, %p66_p12  ;;  %s306_s9 = sand.u32 1, %s1276_s26  }
  0x93   : > { %s808_s10 = sshll.u32 %s1284_s28, 6  ;;  %s1532_s16 = sshll.u32 %s306_s9, 2 }
  0x94   : > { %s1756_s23 = scalar_select %p1525_p9, 1, 0 }
  0x95   : > { %s1537_s14 = scalar_lea.hbm %s1725_s0, %s808_s10  ;;  %s310_s13 = scalar_lea.vmem [#allocation2], %s1532_s16 }
  0x96   : > { %s318_s21 = sshll.u32 %s310_s13, 4  ;;  %p1542_p10 = pnand %p912_p5, %p1503_p11  ;;  %s1546_s21 = int_to_ptr.vmem [resolvable:$true] %s318_s21 }
  0x97   : > { %s1551_s12 = scalar_lea.hbm %s1726_s1, %s808_s10  ;;  %s307_s2 = scalar_lea.sflag [#allocation3], %s306_s9 }
  0x98   : > { %s1098_s3 = scalar_lea.hbm %s1537_s14, 64  ;;  %p1100_p1 = pneg %p1542_p10 }
  0x99   : > { %p1099_p8 = scmp.ne.s32.totalorder %s1537_s14, %s1098_s3  ;;  %s1103_s4 = scalar_lea.hbm %s1725_s0, 128 }
  0x9a   : > { %p1104_p12 = scmp.lt.u32.totalorder %s1537_s14, %s1725_s0  ;;  %p1105_p6 = scmp.lt.u32.totalorder %s1103_s4, %s1098_s3 }
  0x9b   : > { %p1101_p3 = pnand %p1100_p1, %p1099_p8  ;;  %p1107_p0 = scmp.lt.u32.totalorder %s1098_s3, %s1537_s14 }
  0x9c   : > { %p1106_p13 = por %p1105_p6, %p1104_p12 }
  0x9d   : > { %p1102_p11 = pneg %p1101_p3 }
  0x9e   : > { %p1108_p7 = por %p1107_p0, %p1106_p13 }
  0xa0   : > { %p1109_p5 = pnand %p1108_p7, %p1102_p11 }
  0xa2   : > { %1112 = shalt.err (!%p1109_p5)
}
  0xa3   : > { %s1113_s9 = scalar_lea.vmem %s1546_s21, 64  ;;  %s1296_s10 = smov [#allocation2]  }
  0xa4   : > { %p1114_p8 = scmp.ne.s32.totalorder %s1546_s21, %s1113_s9  ;;  %s1118_s18 = sshll.u32 %s1296_s10, 4  ;;  %s1119_s18 = int_to_ptr.vmem [resolvable:$false] %s1118_s18 }
  0xa5   : > { %s1120_s5 = scalar_lea.vmem %s1119_s18, 128  ;;  %p1121_p4 = scmp.lt.s32.totalorder %s1546_s21, %s1119_s18 }
  0xa6   : > { %p1116_p3 = pnand %p1114_p8, %p1100_p1  ;;  %p1122_p12 = scmp.lt.s32.totalorder %s1120_s5, %s1113_s9 }
  0xa8   : > { %p1117_p9 = pneg %p1116_p3  ;;  %p1123_p6 = por %p1122_p12, %p1121_p4 }
  0xaa   : > { %p1124_p13 = pnand %p1123_p6, %p1117_p9 }
  0xac   : > { %1127 = shalt.err (!%p1124_p13)
}
  0xad   : > { %897 = dma.hbm_to_vmem [thread:$0]  (!%p1542_p10), %s1537_s14, 64, %s1546_s21, %s307_s2  }
  0xae   : > { %s325_s3 = sand.u32 1, %s1288_s29   ;;  %s329_s4 = scalar_lea.vmem [#allocation5], %s1532_s16 }
  0xaf   : > { %s337_s7 = sshll.u32 %s329_s4, 4  ;;  %s326_s15 = scalar_lea.sflag [#allocation6], %s325_s3  ;;  %s338_s7 = int_to_ptr.vmem [resolvable:$true] %s337_s7 }
  0xb0   : > { %s1128_s17 = scalar_lea.hbm %s1551_s12, 64  ;;  %s1133_s10 = scalar_lea.hbm %s1726_s1, 128 }
  0xb1   : > { %p1129_p4 = scmp.ne.s32.totalorder %s1551_s12, %s1128_s17  ;;  %p1134_p0 = scmp.lt.u32.totalorder %s1551_s12, %s1726_s1 }
  0xb2   : > { %p1135_p7 = scmp.lt.u32.totalorder %s1133_s10, %s1128_s17  ;;  %p1137_p8 = scmp.lt.u32.totalorder %s1128_s17, %s1551_s12 }
  0xb3   : > { %p1131_p9 = pnand %p1129_p4, %p1100_p1 }
  0xb4   : > { %p1136_p5 = por %p1135_p7, %p1134_p0 }
  0xb5   : > { %p1132_p11 = pneg %p1131_p9 }
  0xb6   : > { %p1138_p3 = por %p1137_p8, %p1136_p5 }
  0xb8   : > { %p1139_p12 = pnand %p1138_p3, %p1132_p11 }
  0xba   : > { %1142 = shalt.err (!%p1139_p12)
}
  0xbb   : > { %s1143_s2 = scalar_lea.vmem %s338_s7, 64  ;;  %s1297_s16 = smov [#allocation5]  }
  0xbc   : > { %p1144_p6 = scmp.ne.s32.totalorder %s338_s7, %s1143_s2  ;;  %s1148_s14 = sshll.u32 %s1297_s16, 4  ;;  %s1149_s14 = int_to_ptr.vmem [resolvable:$false] %s1148_s14 }
  0xbd   : > { %s1150_s21 = scalar_lea.vmem %s1149_s14, 128  ;;  %p1151_p9 = scmp.lt.s32.totalorder %s338_s7, %s1149_s14 }
  0xbe   : > { %p1146_p13 = pnand %p1144_p6, %p1100_p1  ;;  %p1152_p2 = scmp.lt.s32.totalorder %s1150_s21, %s1143_s2 }
  0xc0   : > { %p1147_p4 = pneg %p1146_p13  ;;  %p1153_p0 = por %p1152_p2, %p1151_p9 }
  0xc2   : > { %p1154_p7 = pnand %p1153_p0, %p1147_p4 }
  0xc4   : > { %1157 = shalt.err (!%p1154_p7)
}
  0xc5   : > { %900 = dma.hbm_to_vmem [thread:$0]  (!%p1542_p10), %s1551_s12, 64, %s338_s7, %s326_s15  }
  0xc6   : > { %p1758_p11 = scmp.ne.s32.totalorder %s1744_s8, 0 }
  0xc7   : > { %s1602_s3 = sand.u32 (!%p1758_p11), 1, %s1272_s25   ;;  %p1759_p2 = scmp.ne.s32.totalorder (!%p1758_p11), %s1754_s19, 0 }
  0xc8   : > { %346 = sbr.rel (%p1758_p11) target bundleno = 909 (0x38d), region = 44  ;;  %s1605_s4 = sshll.u32 (!%p1758_p11), %s1602_s3, 2 }
  0xc9   : > { %s349_s17 = scalar_lea.sflag (!%p1758_p11), [#allocation3], %s1602_s3  ;;  %s352_s13 = scalar_lea.vmem (!%p1758_p11), [#allocation2], %s1605_s4 }
  0xcf   : > { %1239 = dma.done.wait (%p1759_p2), %s349_s17, 64  }
  0xd0   : > { %1241 = vsyncadd (%p1759_p2), %s349_s17, 4294967232  ;;  %s357_s8 = sand.u32 1, %s1375_s30   ;;  %s361_s12 = scalar_lea.vmem [#allocation5], %s1605_s4 }
  0xd1   : > { %s358_s11 = scalar_lea.sflag [#allocation6], %s357_s8 }
  0xd2   : > { %1243 = dma.done.wait (%p1759_p2), %s358_s11, 64  }
  0xd3   : > { %1245 = vsyncadd (%p1759_p2), %s358_s11, 4294967232  ;;  %p1760_p10 = scmp.eq.s32.totalorder %s1375_s30, 0 }
  0xd5   : > { %1247 = dma.done.wait (%p1760_p10), [#allocation6], 256   ;;  %p1761_p1 = pmov %p1760_p10 }
  0xd7   : > { %1249 = vsyncadd (%p1761_p1), [#allocation6], 4294967040  ;;  %p1762_p5 = pmov %p1761_p1 }
  0xd8   : > { %p1763_p8 = pmov %p1761_p1 }
  0xd9   : > { %1251 = dma.done.wait (%p1762_p5), [#allocation9], 272  }
  0xda   : > { %1253 = vsyncadd (%p1763_p8), [#allocation9], 4294967024  ;;  %p1764_p3 = pmov %p1761_p1 }
  0xdb   : > { %p1765_p12 = pmov %p1761_p1 }
  0xdc   : > { %1255 = dma.done.wait (%p1764_p3), [#allocation12], 16  }
  0xdd   : > { %1257 = vsyncadd (%p1765_p12), [#allocation12], 4294967280  ;;  %v1298_v0 = vmov 0.0   ;;  %vm1299_vm0 = vmmov 0   ;;  %v976_v1 = vld [vmem:[#allocation7] sm:$0xff]   ;;  %vm421_vm1 = vcmask 261120   ;;  %v443_v13 = vlaneseq }
  0xde   : > { %841 = vmatprep.subr.bf16.mxu0 %v1298_v0  ;;  %845 = vmatprep.mubr.msk.bf16.mxu0 %vm1299_vm0, %v1298_v0  ;;  %v419_v2 = vld [vmem:[%s352_s13] sm:$0xf]  ;;  %v977_v4 = vld [vmem:[#allocation7 + $0x8] sm:$0xff]   ;;  %v436_v6 = vld [vmem:[%s361_s12] sm:$0xf]  ;;  %s1300_s30 = smov 96  }
  0xdf   : > { %849 = vmatprep.subr.bf16.mxu1 %v1298_v0  ;;  %853 = vmatprep.mubr.msk.bf16.mxu1 %vm1299_vm0, %v1298_v0  ;;  %v420_v3 = vunpack.c.l.bf16 %v419_v2  ;;  %v978_v12 = vld [vmem:[#allocation10] sm:$0xff]   ;;  %v444_v14 = vshrl.u32 %v443_v13, 7  ;;  %v441_v15 = vld [vmem:[#allocation8] sm:$0x1]  ;;  %v979_v16 = vld [vmem:[#allocation10 + $0x8] sm:$0xff]   ;;  %s830_s19 = sshll.u32 %s1280_s27, 6 }
  0xe0   : > { %842 = vmatpush3.bf16.msra.mxu0 %v976_v1  ;;  %850 = vmatpush3.bf16.msra.mxu1 %v978_v12  ;;  %v442_v17 = vunpack.c.l.bf16 %v441_v15  ;;  %v519_v38 = vld [vmem:[#allocation11] sm:$0x1]  ;;  %s410_s7 = scalar_lea.vmem [#allocation13], %s1605_s4  ;;  %vm581_vm2 = vcmask 519168   ;;  %s1642_s18 = scalar_lea.hbm %s1731_s6, %s830_s19 }
  0xe1   : > { %843 = vmatprep.subr.bf16.mxu0 %v1298_v0  ;;  %v422_v5 = vsel %vm421_vm1, %v420_v3, 0.0  ;;  %851 = vmatprep.subr.bf16.mxu1 %v1298_v0  ;;  %v445_v18 = vsub.s32 0, %v444_v14  ;;  %v520_v39 = vunpack.c.l.bf16 %v519_v38  ;;  %s610_s15 = sshll.u32 %s410_s7, 4  ;;  %s1301_s5 = smov 64   ;;  %s1644_s15 = int_to_ptr.vmem [resolvable:$true] %s610_s15 }
  0xe2   : > { %423 = vadd.xlane.f32.xlu0 %v422_v5  ;;  %s591_s2 = scalar_lea.sflag [#allocation4], %s1602_s3  ;;  %s1158_s16 = scalar_lea.vmem %s1644_s15, 64 }
  0xe3   : > { %v446_v19 = vrot.slane %v442_v17, %v445_v18  ;;  %v524_v40 = vrot.slane %v520_v39, %v445_v18  ;;  %p1159_p6 = scmp.ne.s32.totalorder %s1644_s15, %s1158_s16  ;;  %p1766_p13 = scmp.ne.s32.totalorder %s1755_s20, 0 }
  0xe4   : > { %844 = vmatpush3.bf16.msra.mxu0 %v977_v4  ;;  %852 = vmatpush3.bf16.msra.mxu1 %v979_v16  ;;  %s1302_s14 = smov [#allocation13]  }
  0xe5   : > { %p1160_p4 = pnand %p1159_p6, %p1766_p13  ;;  %s1162_s21 = sshll.u32 %s1302_s14, 4  ;;  %s1163_s21 = int_to_ptr.vmem [resolvable:$false] %s1162_s21 }
  0xe6   : > { %s1164_s17 = scalar_lea.vmem %s1163_s21, 128  ;;  %p1165_p0 = scmp.lt.s32.totalorder %s1644_s15, %s1163_s21 }
  0xe7   : > { %846 = vmatmul.mubr.msk.bf16.vlgmr.msra.gmra.mrb[0].mxu0 %vm421_vm1, %v436_v6  ;;  %p1161_p9 = pneg %p1160_p4  ;;  %p1166_p7 = scmp.lt.s32.totalorder %s1164_s17, %s1158_s16 }
  0xe9   : > { %p1167_p11 = por %p1166_p7, %p1165_p0 }
  0xeb   : > { %p1168_p2 = pnand %p1167_p11, %p1161_p9 }
 0x16f   : > { %v424_v7 = vpop.xlane.xlu0 %423 }
 0x170   : > { %v426_v8 = vmul.f32 0.03125, %v424_v7 }
 0x172   : > { %v427_v9 = vsub.f32 %v420_v3, %v426_v8 }
 0x174   : > { %v428_v10 = vmul.f32 %v427_v9, %v427_v9 }
 0x176   : > { %v429_v11 = vsel %vm421_vm1, %v428_v10, 0.0 }
 0x177   : > { %430 = vadd.xlane.f32.xlu0 %v429_v11 }
 0x1ba   : > { %v496_v20 = vpop.f32.mrb[0].mxu0 }
 0x1bb   : > { %v497_v21 = vadd.f32 %v496_v20, %v446_v19  ;;  %v847_v22 = vpop.f32.mrb[1].mxu0 }
 0x1bc   : > { %v499_v23 = vpop.f32.mrb[2].mxu0 }
 0x1bd   : > { %510 = vrot.lane.b32.xlu1 %v497_v21, %s1300_s30  ;;  %v848_v24 = vpop.f32.mrb[3].mxu0  ;;  %v823_v25 = vmul.f32 -1.442695, %v497_v21 }
 0x1bf   : > { %980 = vpow2.f32 %v823_v25 }
 0x1c9   : > { %v981_v29 = vpop.eup %980 }
 0x1ca   : > { %v505_v30 = vadd.f32 1.0, %v981_v29 }
 0x204   : > { %v431_v26 = vpop.xlane.xlu0 %430 }
 0x205   : > { %v432_v27 = vmul.f32 0.03125, %v431_v26 }
 0x207   : > { %v433_v28 = vadd.f32 1e-05, %v432_v27 }
 0x209   : > { %982 = vrsqrt.f32 %v433_v28 }
 0x20a   : > { %984 = vrcp.f32 %v505_v30 }
 0x213   : > { %v983_v31 = vpop.eup %982 }
 0x214   : > { %v435_v32 = vmul.f32 %v983_v31, %v427_v9  ;;  %v985_v33 = vpop.eup %984 }
 0x216   : > { %v508_v34 = vmul.f32 %v985_v33, %v435_v32 }
 0x22f   : > { %v511_v35 = vpop.permute.xlu1 %510 }
 0x230   : > { %v513_v36 = vadd.f32 %v511_v35, %v508_v34 }
 0x232   : > { %v514_v37 = vpack.c.bf16 %v513_v36, %v513_v36 }
 0x234   : > { %854 = vmatmul.mubr.msk.bf16.vlgmr.msra.gmra.mrb[0].mxu1 %vm421_vm1, %v514_v37 }
 0x307   : > { %v574_v41 = vpop.f32.mrb[0].mxu1 }
 0x308   : > { %v575_v42 = vadd.f32 %v574_v41, %v524_v40  ;;  %v855_v43 = vpop.f32.mrb[1].mxu1 }
 0x309   : > { %v577_v44 = vpop.f32.mrb[2].mxu1 }
 0x30a   : > { %v580_v45 = vpack.c.bf16 %v575_v42, %v575_v42  ;;  %v856_v46 = vpop.f32.mrb[3].mxu1 }
 0x30c   : > { %586 = vrot.lane.b32.xlu1 %v580_v45, %s1301_s5  ;;  %582 = vst.msk [vmem:[%s410_s7] sm:$0xf] %vm581_vm2, %v580_v45 }
 0x30d   : > { %1171 = shalt.err (!%p1168_p2)
}
 0x30e   : > { %s1172_s13 = scalar_lea.hbm %s1642_s18, 64  ;;  %s1176_s12 = scalar_lea.hbm %s1731_s6, 128 }
 0x30f   : > { %p1173_p10 = scmp.ne.s32.totalorder %s1642_s18, %s1172_s13  ;;  %p1177_p8 = scmp.lt.u32.totalorder %s1642_s18, %s1731_s6 }
 0x310   : > { %p1178_p3 = scmp.lt.u32.totalorder %s1176_s12, %s1172_s13  ;;  %p1180_p6 = scmp.lt.u32.totalorder %s1172_s13, %s1642_s18 }
 0x311   : > { %p1174_p1 = pnand %p1173_p10, %p1766_p13 }
 0x312   : > { %p1179_p12 = por %p1178_p3, %p1177_p8 }
 0x313   : > { %p1175_p5 = pneg %p1174_p1 }
 0x314   : > { %p1181_p4 = por %p1180_p6, %p1179_p12 }
 0x316   : > { %p1182_p9 = pnand %p1181_p4, %p1175_p5 }
 0x318   : > { %1185 = shalt.err (!%p1182_p9)
}
 0x319   : > { %877 = dma.vmem_to_hbm [thread:$0]  (%p1766_p13), %s1644_s15, 64, %s1642_s18, %s591_s2  }
 0x31a   : > { %s417_s9 = scalar_lea.vmem [#allocation14], %s1605_s4  ;;  %s1767_s14 = sld [smem:[#allocation28_spill]] }
 0x31b   : > { %s624_s10 = sshll.u32 %s417_s9, 4  ;;  %s596_s17 = scalar_lea.sflag [#allocation15], %s1602_s3  ;;  %s1677_s10 = int_to_ptr.vmem [resolvable:$true] %s624_s10 }
 0x31c   : > { %s1186_s13 = scalar_lea.vmem %s1677_s10, 64  ;;  %s1303_s27 = smov [#allocation14]  }
 0x31d   : > { %p1187_p0 = scmp.ne.s32.totalorder %s1677_s10, %s1186_s13  ;;  %s1190_s4 = sshll.u32 %s1303_s27, 4  ;;  %s1191_s4 = int_to_ptr.vmem [resolvable:$false] %s1190_s4 }
 0x31e   : > { %s1192_s15 = scalar_lea.vmem %s1191_s4, 128  ;;  %p1193_p2 = scmp.lt.s32.totalorder %s1677_s10, %s1191_s4 }
 0x31f   : > { %p1188_p7 = pnand %p1187_p0, %p1766_p13  ;;  %p1194_p10 = scmp.lt.s32.totalorder %s1192_s15, %s1186_s13 }
 0x320   : > { %s1675_s21 = scalar_lea.hbm %s1767_s14, %s830_s19 }
 0x321   : > { %p1189_p11 = pneg %p1188_p7  ;;  %p1195_p1 = por %p1194_p10, %p1193_p2 }
 0x323   : > { %p1196_p5 = pnand %p1195_p1, %p1189_p11 }
 0x37e   : > { %v587_v47 = vpop.permute.xlu1 %586 }
 0x37f   : > { %589 = vst.msk [vmem:[%s417_s9] sm:$0xf] %vm581_vm2, %v587_v47 }
 0x380   : > { %1199 = shalt.err (!%p1196_p5)
}
 0x381   : > { %s1200_s3 = scalar_lea.hbm %s1675_s21, 64  ;;  %s1204_s2 = scalar_lea.hbm %s1767_s14, 128 }
 0x382   : > { %p1201_p8 = scmp.ne.s32.totalorder %s1675_s21, %s1200_s3  ;;  %p1205_p6 = scmp.lt.u32.totalorder %s1675_s21, %s1767_s14 }
 0x383   : > { %p1206_p4 = scmp.lt.u32.totalorder %s1204_s2, %s1200_s3  ;;  %p1208_p0 = scmp.lt.u32.totalorder %s1200_s3, %s1675_s21 }
 0x384   : > { %p1202_p3 = pnand %p1201_p8, %p1766_p13 }
 0x385   : > { %p1207_p9 = por %p1206_p4, %p1205_p6 }
 0x386   : > { %p1203_p12 = pneg %p1202_p3 }
 0x387   : > { %p1209_p7 = por %p1208_p0, %p1207_p9 }
 0x389   : > { %p1210_p11 = pnand %p1209_p7, %p1203_p12 }
 0x38b   : > { %1213 = shalt.err (!%p1210_p11)
}
 0x38c   : > { %878 = dma.vmem_to_hbm [thread:$0]  (%p1766_p13), %s1677_s10, 64, %s1675_s21, %s596_s17  }
 0x38d PF: > { %s636_s12 = sand.u32 1, %s1268_s24   ;;  %p1768_p2 = scmp.ne.s32.totalorder %s1756_s23, 0 }
 0x38e   : > { %p1769_p10 = scmp.ge.s32.totalorder %s1288_s29, 2  ;;  %s637_s30 = scalar_lea.sflag [#allocation4], %s636_s12 }
 0x390   : > { %p902_p1 = pnand %p1769_p10, %p1768_p2 }
 0x392   : > { %1259 = dma.done.wait (!%p902_p1), %s637_s30, 64  }
 0x393   : > { %1261 = vsyncadd (!%p902_p1), %s637_s30, 4294967232  ;;  %s646_s7 = scalar_lea.sflag [#allocation15], %s636_s12 }
 0x394   : > { %1263 = dma.done.wait (!%p902_p1), %s646_s7, 64  }
 0x395   : > { %1265 = vsyncadd (!%p902_p1), %s646_s7, 4294967232  ;;  %s32_s29 = sadd.s32 1, %s1288_s29   ;;  %s1770_s20 = sld [smem:[#allocation23_spill]] }
 0x396   : > { %p29_p5 = scmp.ge.s32.totalorder %s32_s29, 4   ;;  %s1771_s24 = smov %s1272_s25 }
 0x397   : > { %s1772_s25 = smov %s1276_s26  ;;  %s1773_s26 = smov %s1523_s22 }
 0x398   : > { %s1774_s27 = smov %s1284_s28  ;;  %31 = sbr.rel (!%p29_p5) target bundleno = 18 (0x12), region = 135 }
 0x39b   : > { %s1775_s28 = smov %s1770_s20 }
 0x39f   :  { %651 = vsyncpa [#allocation3], 1 }
 0x3a0   :  { %653 = vsyncpa [#allocation3 + $0x1], 1 }
 0x3a1   :  { %654 = vsyncpa [#allocation6], 1 }
 0x3a2   :  { %656 = vsyncpa [#allocation6 + $0x1], 1 }
 0x3a3   :  { %657 = vsyncpa [#allocation9], 1 }
 0x3a4   :  { %658 = vsyncpa [#allocation12], 1 }
 0x3a5   :  { %659 = vsyncpa [#allocation4], 1 }
 0x3a6   :  { %661 = vsyncpa [#allocation4 + $0x1], 1 }
 0x3a7   :  { %662 = vsyncpa [#allocation15], 1 }
 0x3a8   :  { %664 = vsyncpa [#allocation15 + $0x1], 1 }

// kernel: diffusion_transformer_forward.9
= control target key start
LH: loop header
LB: loop body
LE: loop exit
PB: predicated region body
PF: predicated region fallthrough
CT: control target
= control target key end

     0   :  { %8 = vsyncpa [#allocation3], 0  ;;  %s1709_s0 = inlined_call_operand.hbm [shape: bf16[2,8,8,16], index: 0, kind: input, shape index: {}]   ;;  %s1710_s1 = inlined_call_operand.hbm [shape: bf16[16,8], index: 1, kind: input, shape index: {}]   ;;  %s1711_s2 = inlined_call_operand.hbm [shape: f32[1,8], index: 2, kind: input, shape index: {}]   ;;  %s1712_s3 = inlined_call_operand.hbm [shape: bf16[2,8,8,8], index: 3, kind: output, shape index: {}]  }
   0x1   :  { %10 = vsyncpa [#allocation3 + $0x1], 0 }
   0x2   :  { %11 = vsyncpa [#allocation6], 0 }
   0x3   :  { %12 = vsyncpa [#allocation4], 0 }
   0x4   :  { %14 = vsyncpa [#allocation4 + $0x1], 0  ;;  %s1375_s12 = smov 0   ;;  %s1377_s13 = smov 0  }
   0x5   :  { %s1379_s14 = smov 0   ;;  %s1381_s15 = smov 0  }
   0x6   :  { %s1383_s16 = smov 0   ;;  %s1385_s17 = smov 0  }
   0x7 LB: > { %s1001_s18 = sadd.s32 4294967295, %s1343_s17   ;;  %s1002_s19 = sadd.s32 4294967294, %s1343_s17   ;;  %s1343_s17 = sphi %s1385_s17, %s20_s17   ;;  %s1339_s16 = sphi %s1383_s16, %s1734_s16   ;;  %s1335_s15 = sphi %s1381_s15, %s1733_s15   ;;  %s1331_s14 = sphi %s1379_s14, %s1732_s14   ;;  %s1327_s13 = sphi %s1377_s13, %s1731_s13   ;;  %s1323_s12 = sphi %s1375_s12, %s1730_s12  }
   0x8   : > { %p63_p0 = scmp.ne.s32.totalorder %s1327_s13, %s1323_s12  ;;  %p1409_p1 = scmp.eq.s32.totalorder %s1001_s18, 0 }
   0x9   : > { %p1413_p2 = scmp.eq.s32.totalorder %s1001_s18, 1  ;;  %p139_p3 = scmp.eq.s32.totalorder %s1002_s19, 1 }
   0xa   : > { %s1717_s20 = scalar_select %p1409_p1, 1, 0 }
   0xb   : > { %p1419_p4 = por %p1409_p1, %p63_p0  ;;  %p1003_p5 = scmp.ge.s32.totalorder %s1343_s17, 1 }
   0xc   : > { %p1424_p6 = por %p139_p3, %p63_p0  ;;  %p146_p7 = scmp.lt.s32.totalorder %s1343_s17, 3 }
   0xd   : > { %s1719_s22 = scalar_select %p1419_p4, 1, 0 }
   0xe   : > { %s1720_s23 = scalar_select %p1424_p6, 1, 0 }
   0xf   : > { %p1429_p8 = pnand %p1003_p5, %p146_p7  ;;  %s1345_s25 = smov [#allocation5]  }
  0x10   : > { %s158_s26 = sshll.u32 %s1345_s25, 4  ;;  %s1346_s28 = smov [#allocation7]   ;;  %s1433_s26 = int_to_ptr.vmem [resolvable:$true] %s158_s26 }
  0x11   : > { %p1076_p9 = pneg %p1429_p8  ;;  %s172_s29 = sshll.u32 %s1346_s28, 4  ;;  %s1444_s29 = int_to_ptr.vmem [resolvable:$true] %s172_s29 }
  0x12   : > { %s1171_s5 = scalar_lea.hbm %s1710_s1, 128 }
  0x13   : > { %p1440_p11 = pnand %p1076_p9, %p1409_p1  ;;  %p1172_p12 = scmp.ne.s32.totalorder %s1710_s1, %s1171_s5 }
  0x14   : > { %p1178_p5 = scmp.lt.u32.totalorder %s1171_s5, %s1710_s1 }
  0x15   : > { %p1173_p13 = pneg %p1440_p11 }
  0x17   : > { %p1174_p0 = pnand %p1173_p13, %p1172_p12 }
  0x19   : > { %p1175_p3 = pneg %p1174_p0 }
  0x1b   : > { %p1180_p7 = pnand %p1178_p5, %p1175_p3 }
  0x1d   : > { %1183 = shalt.err (!%p1180_p7)
}
  0x1e   : > { %s1184_s10 = scalar_lea.vmem %s1433_s26, 128  ;;  %p1192_p1 = scmp.lt.s32.totalorder %s1433_s26, %s1433_s26 }
  0x1f   : > { %p1185_p9 = scmp.ne.s32.totalorder %s1433_s26, %s1184_s10  ;;  %p1193_p12 = scmp.lt.s32.totalorder %s1184_s10, %s1184_s10 }
  0x21   : > { %p1187_p10 = pnand %p1185_p9, %p1173_p13  ;;  %p1194_p0 = por %p1193_p12, %p1192_p1 }
  0x23   : > { %p1188_p6 = pneg %p1187_p10 }
  0x25   : > { %p1195_p4 = pnand %p1194_p0, %p1188_p6 }
  0x27   : > { %1198 = shalt.err (!%p1195_p4)
}
  0x28   : > { %s1347_s11 = smov 64   ;;  %s1348_s18 = smov 4  }
  0x29   : > { %1079 = dma.hbm_to_vmem [thread:$0]  (!%p1440_p11), %s1710_s1, 128, %s1433_s26, [#allocation6], %s1347_s11, %s1347_s11, %s1348_s18  }
  0x2a   : > { %s1199_s4 = scalar_lea.hbm %s1711_s2, 16 }
  0x2b   : > { %p1200_p1 = scmp.ne.s32.totalorder %s1711_s2, %s1199_s4  ;;  %p1206_p10 = scmp.lt.u32.totalorder %s1199_s4, %s1711_s2 }
  0x2d   : > { %p1202_p4 = pnand %p1200_p1, %p1173_p13 }
  0x2f   : > { %p1203_p6 = pneg %p1202_p4 }
  0x31   : > { %p1208_p3 = pnand %p1206_p10, %p1203_p6 }
  0x33   : > { %1211 = shalt.err (!%p1208_p3)
}
  0x34   : > { %s1212_s26 = scalar_lea.vmem %s1444_s29, 16  ;;  %s1219_s9 = scalar_lea.vmem %s1444_s29, 32 }
  0x35   : > { %p1213_p5 = scmp.ne.s32.totalorder %s1444_s29, %s1212_s26  ;;  %p1220_p12 = scmp.lt.s32.totalorder %s1444_s29, %s1444_s29 }
  0x36   : > { %p1221_p0 = scmp.lt.s32.totalorder %s1219_s9, %s1212_s26 }
  0x37   : > { %p1215_p7 = pnand %p1213_p5, %p1173_p13 }
  0x38   : > { %p1222_p1 = por %p1221_p0, %p1220_p12 }
  0x39   : > { %p1216_p9 = pneg %p1215_p7 }
  0x3b   : > { %p1223_p4 = pnand %p1222_p1, %p1216_p9 }
  0x3d   : > { %1226 = shalt.err (!%p1223_p4)
}
  0x3e   : > { %1082 = dma.hbm_to_vmem [thread:$0]  (!%p1440_p11), %s1711_s2, 16, %s1444_s29, [#allocation6]  }
  0x3f   : > { %s39_s25 = sadd.s32 1, %s1339_s16  ;;  %s50_s28 = sadd.s32 1, %s1331_s14 }
  0x40   : > { %p41_p13 = scmp.ge.s32.totalorder %s39_s25, 2  ;;  %p57_p6 = scmp.ne.s32.totalorder %s1331_s14, %s1327_s13 }
  0x41   : > { %p58_p10 = scmp.eq.s32.totalorder %s1343_s17, 0  ;;  %p1093_p3 = scmp.lt.s32.totalorder %s1343_s17, 2 }
  0x42   : > { %s1736_s25 = smov (%p41_p13, %s39_s25), 0  ;;  %p1512_p7 = por %p1413_p2, %p57_p6 }
  0x43   : > { %p59_p5 = por %p58_p10, %p57_p6  ;;  %s43_s30 = ssub.s32 %s1339_s16, %s1736_s25 }
  0x44   : > { %s1723_s27 = scalar_select %p1512_p7, 1, 0 }
  0x45   : > { %s183_s4 = sand.u32 1, %s1331_s14   ;;  %p48_p9 = scmp.eq.s32.totalorder %s43_s30, 0 }
  0x46   : > { %s1007_s29 = sshll.u32 %s183_s4, 5  ;;  %s1026_s5 = sshll.u32 %s1339_s16, 9 }
  0x47   : > { %s1521_s6 = scalar_select %p48_p9, %s1331_s14, %s50_s28  }
  0x48   : > { %s1526_s26 = scalar_lea.hbm %s1709_s0, %s1026_s5  ;;  %s187_s21 = scalar_lea.vmem [#allocation2], %s1007_s29 }
  0x49   : > { %s197_s9 = sshll.u32 %s187_s21, 4  ;;  %p1530_p2 = pnand %p1093_p3, %p59_p5  ;;  %s1534_s9 = int_to_ptr.vmem [resolvable:$true] %s197_s9 }
  0x4a   : > { %s1536_s19 = scalar_lea.sflag [#allocation3], %s183_s4  ;;  %s1227_s28 = scalar_lea.hbm %s1526_s26, 512 }
  0x4b   : > { %p1228_p11 = scmp.ne.s32.totalorder %s1526_s26, %s1227_s28  ;;  %p1229_p12 = pneg %p1530_p2 }
  0x4c   : > { %s1232_s5 = scalar_lea.hbm %s1709_s0, 1024  ;;  %p1233_p4 = scmp.lt.u32.totalorder %s1526_s26, %s1709_s0 }
  0x4d   : > { %p1230_p0 = pnand %p1229_p12, %p1228_p11  ;;  %p1234_p13 = scmp.lt.u32.totalorder %s1232_s5, %s1227_s28 }
  0x4e   : > { %p1236_p10 = scmp.lt.u32.totalorder %s1227_s28, %s1526_s26 }
  0x4f   : > { %p1231_p1 = pneg %p1230_p0  ;;  %p1235_p6 = por %p1234_p13, %p1233_p4 }
  0x51   : > { %p1237_p3 = por %p1236_p10, %p1235_p6 }
  0x53   : > { %p1238_p5 = pnand %p1237_p3, %p1231_p1 }
  0x55   : > { %1241 = shalt.err (!%p1238_p5)
}
  0x56   : > { %s1242_s4 = scalar_lea.vmem %s1534_s9, 512  ;;  %s1349_s21 = smov [#allocation2]  }
  0x57   : > { %p1243_p9 = scmp.ne.s32.totalorder %s1534_s9, %s1242_s4  ;;  %s1247_s30 = sshll.u32 %s1349_s21, 4  ;;  %s1248_s30 = int_to_ptr.vmem [resolvable:$false] %s1247_s30 }
  0x58   : > { %s1249_s29 = scalar_lea.vmem %s1248_s30, 1024  ;;  %p1250_p7 = scmp.lt.s32.totalorder %s1534_s9, %s1248_s30 }
  0x59   : > { %p1245_p11 = pnand %p1243_p9, %p1229_p12  ;;  %p1251_p4 = scmp.lt.s32.totalorder %s1249_s29, %s1242_s4 }
  0x5b   : > { %p1246_p0 = pneg %p1245_p11  ;;  %p1252_p13 = por %p1251_p4, %p1250_p7 }
  0x5d   : > { %p1253_p6 = pnand %p1252_p13, %p1246_p0 }
  0x5f   : > { %1256 = shalt.err (!%p1253_p6)
}
  0x60   : > { %1086 = dma.hbm_to_vmem [thread:$0]  (!%p1530_p2), %s1526_s26, 512, %s1534_s9, %s1536_s19, %s1347_s11, %s1347_s11, %s1348_s18  }
  0x61   : > { %209 = sbr.rel (%p1429_p8) target bundleno = 823 (0x337), region = 32  ;;  %s1570_s28 = sand.u32 (!%p1429_p8), 1, %s1327_s13  }
  0x62   : > { %s1011_s5 = sshll.u32 (!%p1429_p8), %s1570_s28, 5  ;;  %s212_s7 = scalar_lea.sflag (!%p1429_p8), [#allocation3], %s1570_s28 }
  0x63   : > { %s215_s10 = scalar_lea.vmem (!%p1429_p8), [#allocation2], %s1011_s5  ;;  %p1725_p7 = scmp.ne.s32.totalorder (!%p1429_p8), %s1719_s22, 0 }
  0x68   : > { %1310 = dma.done.wait (%p1725_p7), %s212_s7, 512  }
  0x69   : > { %1312 = vsyncadd (%p1725_p7), %s212_s7, 4294966784  ;;  %p1726_p2 = scmp.ne.s32.totalorder %s1717_s20, 0 }
  0x6b   : > { %1314 = dma.done.wait (%p1726_p2), [#allocation6], 144  }
  0x6c   : > { %1316 = vsyncadd (%p1726_p2), [#allocation6], 4294967152  ;;  %v1029_v0 = vld [vmem:[%s215_s10] sm:$0xff]   ;;  %vm264_vm0 = vcmask 130048   ;;  %v1045_v1 = vld [vmem:[%s215_s10 + $0x10] sm:$0xff]   ;;  %vm866_vm1 = vcmask 60416  }
  0x6d   : > { %v1030_v2 = vunpack.c.l.bf16 %v1029_v0  ;;  %v1038_v3 = vunpack.c.l.bf16 %v1045_v1  ;;  %v1031_v4 = vunpack.c.h.bf16 %v1029_v0  ;;  %v1039_v5 = vunpack.c.h.bf16 %v1045_v1  ;;  %v1044_v6 = vld [vmem:[%s215_s10 + $0x8] sm:$0xff]   ;;  %v1046_v13 = vld [vmem:[%s215_s10 + $0x18] sm:$0xff]   ;;  %v1154_v60 = vld [vmem:[#allocation5] sm:$0xff]   ;;  %s1027_s20 = sshll.u32 %s1335_s15, 9  ;;  %s245_s22 = scalar_lea.vmem [#allocation8], %s1011_s5 }
  0x6e   : > { %v1034_v11 = vunpack.c.l.bf16 %v1044_v6  ;;  %v1035_v12 = vunpack.c.h.bf16 %v1044_v6  ;;  %v1042_v16 = vunpack.c.l.bf16 %v1046_v13  ;;  %v1043_v17 = vunpack.c.h.bf16 %v1046_v13  ;;  %1052 = vmatprep.subr.bf16.mxu0 %v1154_v60  ;;  %1062 = vmatprep.subr.bf16.mxu1 %v1154_v60  ;;  %s891_s24 = sshll.u32 %s245_s22, 4  ;;  %s1650_s15 = scalar_lea.hbm %s1712_s3, %s1027_s20  ;;  %s1652_s24 = int_to_ptr.vmem [resolvable:$true] %s891_s24 }
  0x6f   : > { %v265_v7 = vsel %vm264_vm0, %v1030_v2, 0.0  ;;  %v277_v8 = vsel %vm264_vm0, %v1038_v3, 0.0  ;;  %v268_v9 = vsel %vm264_vm0, %v1031_v4, 0.0  ;;  %v280_v10 = vsel %vm264_vm0, %v1039_v5, 0.0  ;;  %1053 = vmatpush3.bf16.msra.mxu0 %v1154_v60  ;;  %1063 = vmatpush3.bf16.msra.mxu1 %v1154_v60  ;;  %s876_s26 = scalar_lea.sflag [#allocation4], %s1570_s28  ;;  %s1257_s9 = scalar_lea.vmem %s1652_s24, 512 }
  0x70   : > { %266 = vadd.xlane.f32.xlu0 %v265_v7  ;;  %278 = vadd.xlane.f32.xlu1 %v277_v8  ;;  %v271_v14 = vsel %vm264_vm0, %v1034_v11, 0.0  ;;  %v274_v15 = vsel %vm264_vm0, %v1035_v12, 0.0  ;;  %v283_v18 = vsel %vm264_vm0, %v1042_v16, 0.0  ;;  %v286_v19 = vsel %vm264_vm0, %v1043_v17, 0.0  ;;  %p1258_p8 = scmp.ne.s32.totalorder %s1652_s24, %s1257_s9  ;;  %p1727_p12 = scmp.ne.s32.totalorder %s1723_s27, 0 }
  0x71   : > { %s1352_s19 = smov [#allocation8]  }
  0x72   : > { %p1259_p1 = pnand %p1258_p8, %p1727_p12  ;;  %s1261_s8 = sshll.u32 %s1352_s19, 4  ;;  %s1262_s8 = int_to_ptr.vmem [resolvable:$false] %s1261_s8 }
  0x73   : > { %s1263_s4 = scalar_lea.vmem %s1262_s8, 1024  ;;  %p1264_p3 = scmp.lt.s32.totalorder %s1652_s24, %s1262_s8 }
  0x74   : > { %269 = vadd.xlane.f32.xlu0 %v268_v9  ;;  %281 = vadd.xlane.f32.xlu1 %v280_v10  ;;  %p1260_p10 = pneg %p1259_p1  ;;  %p1265_p5 = scmp.lt.s32.totalorder %s1263_s4, %s1257_s9 }
  0x76   : > { %p1266_p9 = por %p1265_p5, %p1264_p3 }
  0x78   : > { %272 = vadd.xlane.f32.xlu0 %v271_v14  ;;  %275 = vadd.xlane.f32.xlu1 %v274_v15  ;;  %p1267_p11 = pnand %p1266_p9, %p1260_p10 }
  0x7c   : > { %284 = vadd.xlane.f32.xlu0 %v283_v18  ;;  %287 = vadd.xlane.f32.xlu1 %v286_v19 }
  0xfd   : > { %v267_v20 = vpop.xlane.xlu0 %266  ;;  %v279_v21 = vpop.xlane.xlu1 %278 }
  0xfe   : > { %v290_v22 = vmul.f32 0.0625, %v267_v20  ;;  %v294_v23 = vmul.f32 0.0625, %v279_v21 }
 0x100   : > { %v1592_v24 = vsub.f32 %v1030_v2, %v290_v22  ;;  %v1594_v25 = vsub.f32 %v1038_v3, %v294_v23 }
 0x101   : > { %v270_v26 = vpop.xlane.xlu0 %269  ;;  %v282_v27 = vpop.xlane.xlu1 %281 }
 0x102   : > { %v291_v28 = vmul.f32 0.0625, %v270_v26  ;;  %v295_v29 = vmul.f32 0.0625, %v282_v27  ;;  %v306_v30 = vmul.f32 %v1592_v24, %v1592_v24  ;;  %v310_v31 = vmul.f32 %v1594_v25, %v1594_v25 }
 0x104   : > { %v1600_v32 = vsub.f32 %v1031_v4, %v291_v28  ;;  %v1602_v33 = vsub.f32 %v1039_v5, %v295_v29  ;;  %v314_v34 = vsel %vm264_vm0, %v306_v30, 0.0  ;;  %v326_v37 = vsel %vm264_vm0, %v310_v31, 0.0 }
 0x105   : > { %315 = vadd.xlane.f32.xlu0 %v314_v34  ;;  %v273_v35 = vpop.xlane.xlu0 %272  ;;  %v276_v36 = vpop.xlane.xlu1 %275 }
 0x106   : > { %v292_v38 = vmul.f32 0.0625, %v273_v35  ;;  %v293_v39 = vmul.f32 0.0625, %v276_v36  ;;  %v307_v40 = vmul.f32 %v1600_v32, %v1600_v32  ;;  %v311_v41 = vmul.f32 %v1602_v33, %v1602_v33 }
 0x108   : > { %v1610_v42 = vsub.f32 %v1034_v11, %v292_v38  ;;  %v1612_v43 = vsub.f32 %v1035_v12, %v293_v39  ;;  %v317_v44 = vsel %vm264_vm0, %v307_v40, 0.0  ;;  %v329_v47 = vsel %vm264_vm0, %v311_v41, 0.0 }
 0x109   : > { %327 = vadd.xlane.f32.xlu0 %v326_v37  ;;  %318 = vadd.xlane.f32.xlu1 %v317_v44  ;;  %v285_v45 = vpop.xlane.xlu0 %284  ;;  %v288_v46 = vpop.xlane.xlu1 %287 }
 0x10a   : > { %v296_v48 = vmul.f32 0.0625, %v285_v45  ;;  %v297_v49 = vmul.f32 0.0625, %v288_v46  ;;  %v308_v50 = vmul.f32 %v1610_v42, %v1610_v42  ;;  %v309_v51 = vmul.f32 %v1612_v43, %v1612_v43 }
 0x10c   : > { %v1620_v52 = vsub.f32 %v1042_v16, %v296_v48  ;;  %v1622_v53 = vsub.f32 %v1043_v17, %v297_v49  ;;  %v320_v54 = vsel %vm264_vm0, %v308_v50, 0.0  ;;  %v323_v55 = vsel %vm264_vm0, %v309_v51, 0.0 }
 0x10d   : > { %330 = vadd.xlane.f32.xlu1 %v329_v47  ;;  %321 = vadd.xlane.f32.xlu0 %v320_v54 }
 0x10e   : > { %v312_v56 = vmul.f32 %v1620_v52, %v1620_v52  ;;  %v313_v57 = vmul.f32 %v1622_v53, %v1622_v53 }
 0x110   : > { %v332_v58 = vsel %vm264_vm0, %v312_v56, 0.0  ;;  %v335_v59 = vsel %vm264_vm0, %v313_v57, 0.0 }
 0x111   : > { %324 = vadd.xlane.f32.xlu1 %v323_v55  ;;  %333 = vadd.xlane.f32.xlu0 %v332_v58 }
 0x115   : > { %336 = vadd.xlane.f32.xlu1 %v335_v59  ;;  %v1350_v59 = vmov 1983009808  }
 0x116   : > { %v725_v60 = vunpack.c.l.s4 %v1350_v59 }
 0x192   : > { %v316_v61 = vpop.xlane.xlu0 %315 }
 0x193   : > { %v338_v62 = vmul.f32 0.0625, %v316_v61  ;;  %v727_v61 = vlaneseq }
 0x195   : > { %v346_v63 = vadd.f32 1e-05, %v338_v62 }
 0x196   : > { %v319_v0 = vpop.xlane.xlu1 %318  ;;  %v328_v1 = vpop.xlane.xlu0 %327 }
 0x197   : > { %v339_v2 = vmul.f32 0.0625, %v319_v0  ;;  %v342_v3 = vmul.f32 0.0625, %v328_v1  ;;  %1155 = vrsqrt.f32 %v346_v63  ;;  %v726_v0 = vunpack.c.0.s8 %v725_v60 }
 0x198   : > { %v728_v1 = vshrl.u32 %v727_v61, 7 }
 0x199   : > { %v347_v4 = vadd.f32 1e-05, %v339_v2  ;;  %v350_v5 = vadd.f32 1e-05, %v342_v3 }
 0x19a   : > { %v331_v6 = vpop.xlane.xlu1 %330  ;;  %v322_v7 = vpop.xlane.xlu0 %321 }
 0x19b   : > { %1157 = vrsqrt.f32 %v347_v4  ;;  %v343_v8 = vmul.f32 0.0625, %v331_v6  ;;  %v340_v9 = vmul.f32 0.0625, %v322_v7  ;;  %v1351_v4 = vmov 1934713408  }
 0x19c   : > { %1159 = vrsqrt.f32 %v350_v5  ;;  %v789_v5 = vunpack.c.l.s4 %v1351_v4  ;;  %v729_v7 = vsub.s32 %v726_v0, %v728_v1 }
 0x19d   : > { %v351_v10 = vadd.f32 1e-05, %v343_v8  ;;  %v348_v11 = vadd.f32 1e-05, %v340_v9 }
 0x19e   : > { %v325_v12 = vpop.xlane.xlu1 %324  ;;  %v334_v13 = vpop.xlane.xlu0 %333 }
 0x19f   : > { %1161 = vrsqrt.f32 %v351_v10  ;;  %v341_v14 = vmul.f32 0.0625, %v325_v12  ;;  %v344_v15 = vmul.f32 0.0625, %v334_v13  ;;  %v790_v13 = vunpack.c.0.s8 %v789_v5 }
 0x1a0   : > { %1163 = vrsqrt.f32 %v348_v11 }
 0x1a1   : > { %v349_v16 = vadd.f32 1e-05, %v341_v14  ;;  %v352_v17 = vadd.f32 1e-05, %v344_v15  ;;  %v1156_v19 = vpop.eup %1155 }
 0x1a2   : > { %v337_v18 = vpop.xlane.xlu1 %336  ;;  %v362_v23 = vmul.f32 %v1156_v19, %v1592_v24 }
 0x1a3   : > { %1165 = vrsqrt.f32 %v349_v16  ;;  %v345_v20 = vmul.f32 0.0625, %v337_v18 }
 0x1a4   : > { %1167 = vrsqrt.f32 %v352_v17 }
 0x1a5   : > { %v1158_v21 = vpop.eup %1157  ;;  %v353_v22 = vadd.f32 1e-05, %v345_v20 }
 0x1a6   : > { %v363_v26 = vmul.f32 %v1158_v21, %v1600_v32  ;;  %v1160_v27 = vpop.eup %1159 }
 0x1a7   : > { %1169 = vrsqrt.f32 %v353_v22  ;;  %v366_v30 = vmul.f32 %v1160_v27, %v1594_v25 }
 0x1a8   : > { %v370_v28 = vpack.c.bf16 %v363_v26, %v362_v23  ;;  %v793_v23 = vsub.s32 %v790_v13, %v728_v1 }
 0x1a9   : > { %v1162_v29 = vpop.eup %1161 }
 0x1aa   : > { %1054 = vmatprep.mubr.msk.bf16.mxu0 %vm264_vm0, %v370_v28  ;;  %v367_v31 = vmul.f32 %v1162_v29, %v1602_v33  ;;  %v1164_v34 = vpop.eup %1163  ;;  %v1015_v33 = vld [vmem:[#allocation7] ss:$0 sm:$0xff] }
 0x1ab   : > { %v364_v37 = vmul.f32 %v1164_v34, %v1610_v42 }
 0x1ac   : > { %v372_v35 = vpack.c.bf16 %v367_v31, %v366_v30 }
 0x1ad   : > { %v1166_v36 = vpop.eup %1165 }
 0x1ae   : > { %1058 = vmatprep.mubr.msk.bf16.mxu1 %vm264_vm0, %v372_v35  ;;  %v365_v24 = vmul.f32 %v1166_v36, %v1612_v43  ;;  %v1168_v32 = vpop.eup %1167 }
 0x1af   : > { %v368_v40 = vmul.f32 %v1168_v32, %v1620_v52 }
 0x1b0   : > { %v371_v38 = vpack.c.bf16 %v365_v24, %v364_v37 }
 0x1b1   : > { %v1170_v39 = vpop.eup %1169 }
 0x1b2   : > { %1055 = vmatmul.mubr.msk.bf16.vlgmr.msra.gmra.mrb[0].mxu0 %vm264_vm0, %v371_v38  ;;  %v369_v25 = vmul.f32 %v1170_v39, %v1622_v53 }
 0x1b4   : > { %v373_v41 = vpack.c.bf16 %v369_v25, %v368_v40 }
 0x1b6   : > { %1059 = vmatmul.mubr.msk.bf16.vlgmr.msra.gmra.mrb[0].mxu1 %vm264_vm0, %v373_v41 }
 0x285   : > { %v1056_v44 = vpop.f32.mrb[0].mxu0 }
 0x286   : > { %v444_v45 = vadd.f32 %v1056_v44, %v1015_v33  ;;  %v435_v46 = vpop.f32.mrb[1].mxu0 }
 0x287   : > { %v1057_v47 = vpop.f32.mrb[2].mxu0  ;;  %v436_v48 = vadd.f32 %v1015_v33, %v435_v46 }
 0x288   : > { %530 = vxpose.xlu0.b32.start.end [1/1] (short) (narrow) %v444_v45, 8  ;;  %v438_v42 = vpop.f32.mrb[3].mxu0  ;;  %v447_v52 = vadd.f32 %v1057_v47, %v1015_v33 }
 0x289   : > { %v1060_v43 = vpop.f32.mrb[0].mxu1  ;;  %v439_v53 = vadd.f32 %v1015_v33, %v438_v42 }
 0x28a   : > { %v451_v49 = vpop.f32.mrb[1].mxu1  ;;  %v460_v56 = vadd.f32 %v1060_v43, %v1015_v33 }
 0x28b   : > { %v452_v50 = vadd.f32 %v1015_v33, %v451_v49  ;;  %v1061_v51 = vpop.f32.mrb[2].mxu1 }
 0x28c   : > { %466 = vxpose.xlu0.b32.start.end [1/1] (short) (narrow) %v436_v48, 8  ;;  %v454_v54 = vpop.f32.mrb[3].mxu1  ;;  %v463_v57 = vadd.f32 %v1061_v51, %v1015_v33 }
 0x28d   : > { %594 = vxpose.xlu1.b32.start.end [1/1] (short) (narrow) %v452_v50, 8  ;;  %v455_v55 = vadd.f32 %v1015_v33, %v454_v54 }
 0x290   : > { %562 = vxpose.xlu0.b32.start.end [1/1] (short) (narrow) %v447_v52, 8 }
 0x291   : > { %498 = vxpose.xlu1.b32.start.end [1/1] (short) (narrow) %v439_v53, 8 }
 0x294   : > { %626 = vxpose.xlu0.b32.start.end [1/1] (short) (narrow) %v455_v55, 8 }
 0x295   : > { %658 = vxpose.xlu1.b32.start.end [1/1] (short) (narrow) %v460_v56, 8 }
 0x298   : > { %690 = vxpose.xlu0.b32.start.end [1/1] (short) (narrow) %v463_v57, 8 }
 0x308   : > { %v546_v58 = vpop.trf.xlu0 }
 0x30c   : > { %v482_v62 = vpop.trf.xlu0 }
 0x30d   : > { %v610_v63 = vpop.trf.xlu1  ;;  %v722_v8 = vcombine.low %v482_v62, %v546_v58  ;;  %v723_v12 = vcombine.high %v482_v62, %v546_v58 }
 0x30f   : > { %v730_v17 = vrot.slane %v722_v8, %v729_v7  ;;  %v737_v22 = vrot.slane %v723_v12, %v729_v7 }
 0x310   : > { %v578_v2 = vpop.trf.xlu0 }
 0x311   : > { %v514_v3 = vpop.trf.xlu1 }
 0x312   : > { %v738_v6 = vcombine.low %v514_v3, %v578_v2  ;;  %v739_v9 = vcombine.high %v514_v3, %v578_v2 }
 0x314   : > { %v642_v10 = vpop.trf.xlu0  ;;  %v746_v14 = vrot.slane %v738_v6, %v729_v7  ;;  %v753_v18 = vrot.slane %v739_v9, %v729_v7 }
 0x315   : > { %v674_v11 = vpop.trf.xlu1 }
 0x316   : > { %v754_v15 = vcombine.low %v610_v63, %v674_v11  ;;  %v755_v16 = vcombine.high %v610_v63, %v674_v11  ;;  %v786_v26 = vcombine.low %v730_v17, %v746_v14  ;;  %v787_v27 = vcombine.high %v730_v17, %v746_v14 }
 0x317   : > { %v802_v34 = vcombine.low %v737_v22, %v753_v18  ;;  %v803_v35 = vcombine.high %v737_v22, %v753_v18 }
 0x318   : > { %v706_v19 = vpop.trf.xlu0  ;;  %v762_v28 = vrot.slane %v754_v15, %v729_v7  ;;  %v769_v29 = vrot.slane %v755_v16, %v729_v7  ;;  %v794_v38 = vrot.slane %v786_v26, %v793_v23  ;;  %v801_v39 = vrot.slane %v787_v27, %v793_v23 }
 0x319   : > { %v770_v20 = vcombine.low %v642_v10, %v706_v19  ;;  %v771_v21 = vcombine.high %v642_v10, %v706_v19  ;;  %v810_v44 = vrot.slane %v802_v34, %v793_v23  ;;  %v817_v45 = vrot.slane %v803_v35, %v793_v23 }
 0x31b   : > { %v778_v30 = vrot.slane %v770_v20, %v729_v7  ;;  %v785_v31 = vrot.slane %v771_v21, %v729_v7 }
 0x31d   : > { %v818_v36 = vcombine.low %v762_v28, %v778_v30  ;;  %v819_v37 = vcombine.high %v762_v28, %v778_v30  ;;  %v834_v24 = vcombine.low %v769_v29, %v785_v31  ;;  %v835_v32 = vcombine.high %v769_v29, %v785_v31 }
 0x31f   : > { %v826_v40 = vrot.slane %v818_v36, %v793_v23  ;;  %v833_v25 = vrot.slane %v819_v37, %v793_v23  ;;  %v842_v41 = vrot.slane %v834_v24, %v793_v23  ;;  %v849_v33 = vrot.slane %v835_v32, %v793_v23 }
 0x321   : > { %v850_v46 = vcombine.low %v794_v38, %v826_v40  ;;  %v851_v47 = vcombine.high %v794_v38, %v826_v40  ;;  %v852_v42 = vcombine.low %v801_v39, %v833_v25  ;;  %v853_v43 = vcombine.high %v801_v39, %v833_v25 }
 0x322   : > { %v854_v48 = vcombine.low %v810_v44, %v842_v41  ;;  %v855_v49 = vcombine.high %v810_v44, %v842_v41  ;;  %v856_v50 = vcombine.low %v817_v45, %v849_v33  ;;  %v857_v51 = vcombine.high %v817_v45, %v849_v33 }
 0x323   : > { %v858_v54 = vpack.c.bf16 %v850_v46, %v850_v46  ;;  %v859_v52 = vpack.c.bf16 %v851_v47, %v851_v47  ;;  %v860_v53 = vpack.c.bf16 %v852_v42, %v852_v42  ;;  %v861_v55 = vpack.c.bf16 %v853_v43, %v853_v43 }
 0x324   : > { %v862_v56 = vpack.c.bf16 %v854_v48, %v854_v48  ;;  %v863_v57 = vpack.c.bf16 %v855_v49, %v855_v49  ;;  %v864_v58 = vpack.c.bf16 %v856_v50, %v856_v50  ;;  %v865_v59 = vpack.c.bf16 %v857_v51, %v857_v51 }
 0x325   : > { %867 = vst.msk [vmem:[%s245_s22] sm:$0xf] %vm866_vm1, %v858_v54  ;;  %868 = vst.msk [vmem:[%s245_s22 + $0x4] sm:$0xf] %vm866_vm1, %v859_v52 }
 0x326   : > { %869 = vst.msk [vmem:[%s245_s22 + $0x8] sm:$0xf] %vm866_vm1, %v860_v53  ;;  %870 = vst.msk [vmem:[%s245_s22 + $0xc] sm:$0xf] %vm866_vm1, %v861_v55 }
 0x327   : > { %871 = vst.msk [vmem:[%s245_s22 + $0x10] sm:$0xf] %vm866_vm1, %v862_v56  ;;  %872 = vst.msk [vmem:[%s245_s22 + $0x14] sm:$0xf] %vm866_vm1, %v863_v57 }
 0x328   : > { %873 = vst.msk [vmem:[%s245_s22 + $0x18] sm:$0xf] %vm866_vm1, %v864_v58  ;;  %874 = vst.msk [vmem:[%s245_s22 + $0x1c] sm:$0xf] %vm866_vm1, %v865_v59 }
 0x329   : > { %1270 = shalt.err (!%p1267_p11)
}
 0x32a   : > { %s1271_s21 = scalar_lea.hbm %s1650_s15, 512  ;;  %s1275_s5 = scalar_lea.hbm %s1712_s3, 1024 }
 0x32b   : > { %p1272_p0 = scmp.ne.s32.totalorder %s1650_s15, %s1271_s21  ;;  %p1276_p6 = scmp.lt.u32.totalorder %s1650_s15, %s1712_s3 }
 0x32c   : > { %p1277_p7 = scmp.lt.u32.totalorder %s1275_s5, %s1271_s21  ;;  %p1279_p8 = scmp.lt.u32.totalorder %s1271_s21, %s1650_s15 }
 0x32d   : > { %p1273_p4 = pnand %p1272_p0, %p1727_p12 }
 0x32e   : > { %p1278_p2 = por %p1277_p7, %p1276_p6 }
 0x32f   : > { %p1274_p13 = pneg %p1273_p4 }
 0x330   : > { %p1280_p1 = por %p1279_p8, %p1278_p2 }
 0x332   : > { %p1281_p10 = pnand %p1280_p1, %p1274_p13 }
 0x334   : > { %1284 = shalt.err (!%p1281_p10)
}
 0x335   : > { %s1353_s20 = smov 64   ;;  %s1354_s22 = smov 4  }
 0x336   : > { %1074 = dma.vmem_to_hbm [thread:$0]  (%p1727_p12), %s1652_s24, 512, %s1650_s15, %s876_s26, %s1353_s20, %s1353_s20, %s1354_s22  }
 0x337 PF: > { %s906_s11 = sand.u32 1, %s1323_s12   ;;  %p1728_p3 = scmp.ne.s32.totalorder %s1720_s23, 0 }
 0x338   : > { %p1729_p5 = scmp.ge.s32.totalorder %s1343_s17, 2  ;;  %s907_s18 = scalar_lea.sflag [#allocation4], %s906_s11 }
 0x33a   : > { %p1088_p9 = pnand %p1729_p5, %p1728_p3 }
 0x33c   : > { %1318 = dma.done.wait (!%p1088_p9), %s907_s18, 512  }
 0x33d   : > { %1320 = vsyncadd (!%p1088_p9), %s907_s18, 4294966784  ;;  %s20_s17 = sadd.s32 1, %s1343_s17   ;;  %s1730_s12 = smov %s1327_s13 }
 0x33e   : > { %p17_p11 = scmp.ge.s32.totalorder %s20_s17, 4   ;;  %s1731_s13 = smov %s1331_s14 }
 0x33f   : > { %s1732_s14 = smov %s1521_s6  ;;  %s1733_s15 = smov %s1339_s16 }
 0x340   : > { %s1734_s16 = smov %s1736_s25  ;;  %19 = sbr.rel (!%p17_p11) target bundleno = 7 (0x7), region = 85 }
 0x347   :  { %912 = vsyncpa [#allocation3], 1 }
 0x348   :  { %914 = vsyncpa [#allocation3 + $0x1], 1 }
 0x349   :  { %915 = vsyncpa [#allocation6], 1 }
 0x34a   :  { %916 = vsyncpa [#allocation4], 1 }
 0x34b   :  { %918 = vsyncpa [#allocation4 + $0x1], 1 }

// kernel: diffusion_transformer_forward.11
= control target key start
LH: loop header
LB: loop body
LE: loop exit
PB: predicated region body
PF: predicated region fallthrough
CT: control target
= control target key end

     0   :  { %s2981_s0 = inlined_call_operand.<no memory space> [shape: s32[1], index: 0, kind: input, shape index: {}]   ;;  %s2982_s1 = inlined_call_operand.hbm [shape: bf16[2,8,64], index: 1, kind: input, shape index: {}]   ;;  %s2983_s2 = inlined_call_operand.hbm [shape: bf16[2,8,64], index: 2, kind: input, shape index: {}]   ;;  %s2984_s3 = inlined_call_operand.hbm [shape: bf16[2,8,8,8], index: 3, kind: input, shape index: {}]   ;;  %s2985_s4 = inlined_call_operand.hbm [shape: bf16[32,32], index: 4, kind: input, shape index: {}]   ;;  %s2986_s5 = inlined_call_operand.hbm [shape: bf16[2,8,32], index: 5, kind: output, shape index: {}]  }
   0x1   :  { %3006 = sst [smem:[#allocation30_spill]] %s2982_s1 }
   0x2   :  { %3007 = sst [smem:[#allocation31_spill]] %s2983_s2 }
   0x3   :  { %3008 = sst [smem:[#allocation32_spill]] %s2986_s5 }
   0x4   :  { %10 = sst [smem:[#allocation7]] %s2981_s0 }
   0x5   :  { %11 = vsyncpa [#allocation9], 0 }
   0x6   :  { %13 = vsyncpa [#allocation9 + $0x1], 0 }
   0x7   :  { %14 = vsyncpa [#allocation12], 0 }
   0x8   :  { %16 = vsyncpa [#allocation12 + $0x1], 0 }
   0x9   :  { %17 = vsyncpa [#allocation15], 0 }
   0xa   :  { %18 = vsyncpa [#allocation10], 0 }
   0xb   :  { %20 = vsyncpa [#allocation10 + $0x1], 0  ;;  %s2340_s20 = smov 0   ;;  %s2342_s21 = smov 0  }
   0xc   :  { %s2344_s22 = smov 0   ;;  %s2346_s23 = smov 0  }
   0xd   :  { %s2348_s24 = smov 0   ;;  %s2350_s25 = smov 0  }
   0xe   :  { %s2352_s0 = smov 0   ;;  %s2354_s26 = smov 0  }
   0xf   :  { %s2356_s27 = smov 0  }
  0x10 LB: > { %3009 = sst [smem:[#allocation22_spill]] %s2261_s22  ;;  %s2386_s28 = sadd.s32 4294967295, %s2285_s27   ;;  %s2285_s27 = sphi %s2356_s27, %s26_s27   ;;  %s2281_s26 = sphi %s2354_s26, %s3060_s26   ;;  %s2277_s0 = sphi %s2352_s0, %s3059_s0   ;;  %s2273_s25 = sphi %s2350_s25, %s3053_s25   ;;  %s2269_s24 = sphi %s2348_s24, %s3058_s24   ;;  %s2265_s23 = sphi %s2346_s23, %s3057_s23   ;;  %s2261_s22 = sphi %s2344_s22, %s3051_s22   ;;  %s2257_s21 = sphi %s2342_s21, %s3056_s21   ;;  %s2253_s20 = sphi %s2340_s20, %s3055_s20  }
  0x11   : > { %3010 = sst [smem:[#allocation23_spill]] %s2265_s23  ;;  %s1769_s29 = sadd.s32 4294967294, %s2285_s27  }
  0x12   : > { %3011 = sst [smem:[#allocation24_spill]] %s2273_s25  ;;  %s45_s30 = sadd.s32 1, %s2281_s26 }
  0x13   : > { %3012 = sst [smem:[#allocation25_spill]] %s2285_s27  ;;  %s54_s6 = sadd.s32 1, %s2273_s25 }
  0x14   : > { %p47_p0 = scmp.ge.s32.totalorder %s45_s30, 2  ;;  %p61_p1 = scmp.ne.s32.totalorder %s2273_s25, %s2269_s24 }
  0x15   : > { %p62_p2 = scmp.eq.s32.totalorder %s2285_s27, 0  ;;  %p2992_p3 = scmp.ne.s32.totalorder %s2269_s24, %s2265_s23 }
  0x16   : > { %s3062_s30 = smov (%p47_p0, %s45_s30), 0  ;;  %s2405_s8 = sld [smem:[#allocation7]] }
  0x17   : > { %3013 = sst [smem:[#allocation26_spill]] %s3062_s30  ;;  %p2401_p4 = por %p62_p2, %p61_p1 }
  0x18   : > { %s49_s9 = ssub.s32 %s2281_s26, %s3062_s30  ;;  %s116_s10 = sadd.s32 1, %s2261_s22 }
  0x19   : > { %p52_p5 = scmp.eq.s32.totalorder %s49_s9, 0  ;;  %p123_p6 = scmp.ne.s32.totalorder %s2261_s22, %s2257_s21 }
  0x1a   : > { %p176_p8 = scmp.eq.s32.totalorder %s2386_s28, 1  ;;  %p182_p11 = scmp.eq.s32.totalorder %s1769_s29, 1 }
  0x1b   : > { %s2416_s11 = scalar_select %p52_p5, %s2273_s25, %s54_s6  }
  0x1c   : > { %p2418_p9 = por %p123_p6, %p62_p2  ;;  %p2425_p10 = por %p176_p8, %p61_p1 }
  0x1d   : > { %3015 = sst [smem:[#allocation27_spill]] %s2416_s11  ;;  %p2432_p12 = por %p182_p11, %p2992_p3 }
  0x1e   : > { %s3017_s13 = scalar_select %p2425_p10, 1, 0 }
  0x1f   : > { %s3018_s14 = scalar_select %p2432_p12, 1, 0 }
  0x20   : > { %p2993_p0 = scmp.lt.s32.totalorder %s2285_s27, 2  ;;  %s2987_s16 = sand.u32 1, %s2273_s25  }
  0x21   : > { %3019 = sst [smem:[#allocation28_spill]] %s3018_s14  ;;  %s2989_s17 = sshll.u32 %s2281_s26, 6 }
  0x22   : > { %s2439_s15 = scalar_select %p52_p5, %s2261_s22, %s116_s10  }
  0x23   : > { %s2445_s18 = sshll.u32 %s2987_s16, 2  ;;  %p2451_p1 = pnand %p2993_p0, %p2401_p4 }
  0x24   : > { %3020 = sst [smem:[#allocation29_spill]] %s2439_s15  ;;  %s234_s29 = sand.u32 1, %s2285_s27  }
  0x25   : > { %s3022_s2 = sld [smem:[#allocation31_spill]]  ;;  %s238_s7 = scalar_lea.vmem [#allocation11], %s2445_s18 }
  0x26   : > { %s246_s16 = sshll.u32 %s238_s7, 4  ;;  %s2467_s11 = scalar_lea.sflag [#allocation12], %s234_s29  ;;  %s2464_s16 = int_to_ptr.vmem [resolvable:$true] %s246_s16 }
  0x27   : > { %p2051_p4 = pneg %p2451_p1 }
  0x2b   : > { %s2461_s10 = scalar_lea.hbm %s3022_s2, %s2989_s17  ;;  %s2054_s17 = scalar_lea.hbm %s3022_s2, 128 }
  0x2c   : > { %s2049_s15 = scalar_lea.hbm %s2461_s10, 64  ;;  %p2055_p8 = scmp.lt.u32.totalorder %s2461_s10, %s3022_s2 }
  0x2d   : > { %p2050_p2 = scmp.ne.s32.totalorder %s2461_s10, %s2049_s15  ;;  %p2056_p11 = scmp.lt.u32.totalorder %s2054_s17, %s2049_s15 }
  0x2e   : > { %p2058_p7 = scmp.lt.u32.totalorder %s2049_s15, %s2461_s10 }
  0x2f   : > { %p2052_p5 = pnand %p2051_p4, %p2050_p2  ;;  %p2057_p13 = por %p2056_p11, %p2055_p8 }
  0x31   : > { %p2053_p6 = pneg %p2052_p5  ;;  %p2059_p3 = por %p2058_p7, %p2057_p13 }
  0x33   : > { %p2060_p0 = pnand %p2059_p3, %p2053_p6 }
  0x35   : > { %2063 = shalt.err (!%p2060_p0)
}
  0x36   : > { %s2064_s29 = scalar_lea.vmem %s2464_s16, 64  ;;  %s2287_s7 = smov [#allocation11]  }
  0x37   : > { %p2065_p2 = scmp.ne.s32.totalorder %s2464_s16, %s2064_s29  ;;  %s2069_s6 = sshll.u32 %s2287_s7, 4  ;;  %s2070_s6 = int_to_ptr.vmem [resolvable:$false] %s2069_s6 }
  0x38   : > { %s2071_s5 = scalar_lea.vmem %s2070_s6, 128  ;;  %p2072_p10 = scmp.lt.s32.totalorder %s2464_s16, %s2070_s6 }
  0x39   : > { %p2067_p5 = pnand %p2065_p2, %p2051_p4  ;;  %p2073_p8 = scmp.lt.s32.totalorder %s2071_s5, %s2064_s29 }
  0x3b   : > { %p2068_p12 = pneg %p2067_p5  ;;  %p2074_p11 = por %p2073_p8, %p2072_p10 }
  0x3d   : > { %p2075_p7 = pnand %p2074_p11, %p2068_p12 }
  0x3f   : > { %2078 = shalt.err (!%p2075_p7)
}
  0x40   : > { %1917 = dma.hbm_to_vmem [thread:$0]  (!%p2451_p1), %s2461_s10, 64, %s2464_s16, %s2467_s11  }
  0x41   : > { %p3023_p3 = scmp.lt.s32.totalorder %s2285_s27, 2  ;;  %p2997_p12 = scmp.eq.s32.totalorder %s2386_s28, 0 }
  0x42   : > { %p1770_p13 = scmp.ge.s32.totalorder %s2285_s27, 1  ;;  %p3025_p0 = scmp.ne.s32.totalorder %s2269_s24, %s2265_s23 }
  0x43   : > { %p2499_p10 = pnand %p3023_p3, %p2418_p9  ;;  %p3027_p2 = scmp.ne.s32.totalorder %s2257_s21, %s2253_s20 }
  0x44   : > { %p2510_p6 = por %p2997_p12, %p3025_p0  ;;  %p189_p9 = scmp.lt.s32.totalorder %s2285_s27, 3 }
  0x45   : > { %s3024_s14 = scalar_select %p2499_p10, 1, 0 }
  0x46   : > { %s3026_s15 = scalar_select %p2510_p6, 1, 0 }
  0x47   : > { %p2519_p5 = por %p3027_p2, %p2997_p12  ;;  %s2288_s12 = smov [#allocation14]  }
  0x48   : > { %s201_s17 = sshll.u32 %s2288_s12, 4  ;;  %p2524_p8 = pnand %p1770_p13, %p189_p9  ;;  %s2528_s17 = int_to_ptr.vmem [resolvable:$true] %s201_s17 }
  0x49   : > { %s3028_s16 = scalar_select %p2519_p5, 1, 0 }
  0x4a   : > { %s3029_s10 = scalar_select %p2524_p8, 1, 0 }
  0x4b   : > { %p1907_p11 = pneg %p2524_p8  ;;  %s3030_s9 = sshll.u32 %s2281_s26, 6 }
  0x4c   : > { %s3031_s1 = sld [smem:[#allocation30_spill]]  ;;  %s219_s6 = scalar_lea.vmem [#allocation8], %s2445_s18 }
  0x4d   : > { %s227_s5 = sshll.u32 %s219_s6, 4  ;;  %p2542_p7 = pnand %p1907_p11, %p2997_p12  ;;  %s228_s5 = int_to_ptr.vmem [resolvable:$true] %s227_s5 }
  0x4e   : > { %s3033_s30 = sand.u32 1, %s2273_s25  }
  0x4f   : > { %s3032_s12 = scalar_select %p2542_p7, 1, 0 }
  0x50   : > { %s216_s2 = scalar_lea.sflag [#allocation9], %s3033_s30 }
  0x52   : > { %s2537_s7 = scalar_lea.hbm %s3031_s1, %s3030_s9  ;;  %s2084_s20 = scalar_lea.hbm %s3031_s1, 128 }
  0x53   : > { %s2079_s27 = scalar_lea.hbm %s2537_s7, 64  ;;  %p2085_p2 = scmp.lt.u32.totalorder %s2537_s7, %s3031_s1 }
  0x54   : > { %p2080_p3 = scmp.ne.s32.totalorder %s2537_s7, %s2079_s27  ;;  %p2086_p9 = scmp.lt.u32.totalorder %s2084_s20, %s2079_s27 }
  0x55   : > { %p2088_p12 = scmp.lt.u32.totalorder %s2079_s27, %s2537_s7 }
  0x56   : > { %p2082_p13 = pnand %p2080_p3, %p2051_p4  ;;  %p2087_p11 = por %p2086_p9, %p2085_p2 }
  0x58   : > { %p2083_p0 = pneg %p2082_p13  ;;  %p2089_p5 = por %p2088_p12, %p2087_p11 }
  0x5a   : > { %p2090_p6 = pnand %p2089_p5, %p2083_p0 }
  0x5c   : > { %2093 = shalt.err (!%p2090_p6)
}
  0x5d   : > { %s2094_s30 = scalar_lea.vmem %s228_s5, 64  ;;  %s2289_s25 = smov [#allocation8]  }
  0x5e   : > { %p2095_p8 = scmp.ne.s32.totalorder %s228_s5, %s2094_s30  ;;  %s2099_s9 = sshll.u32 %s2289_s25, 4  ;;  %s2100_s9 = int_to_ptr.vmem [resolvable:$false] %s2099_s9 }
  0x5f   : > { %s2101_s29 = scalar_lea.vmem %s2100_s9, 128  ;;  %p2102_p10 = scmp.lt.s32.totalorder %s228_s5, %s2100_s9 }
  0x60   : > { %p2097_p3 = pnand %p2095_p8, %p2051_p4  ;;  %p2103_p7 = scmp.lt.s32.totalorder %s2101_s29, %s2094_s30 }
  0x62   : > { %p2098_p13 = pneg %p2097_p3  ;;  %p2104_p2 = por %p2103_p7, %p2102_p10 }
  0x64   : > { %p2105_p9 = pnand %p2104_p2, %p2098_p13 }
  0x66   : > { %2108 = shalt.err (!%p2105_p9)
}
  0x67   : > { %1914 = dma.hbm_to_vmem [thread:$0]  (!%p2451_p1), %s2537_s7, 64, %s228_s5, %s216_s2  }
  0x68   : > { %s255_s27 = sand.u32 1, %s2261_s22   ;;  %s2109_s6 = scalar_lea.hbm %s2985_s4, 256 }
  0x69   : > { %p2110_p4 = scmp.ne.s32.totalorder %s2985_s4, %s2109_s6  ;;  %p3034_p12 = scmp.ne.s32.totalorder %s3032_s12, 0 }
  0x6a   : > { %p2116_p8 = scmp.lt.u32.totalorder %s2109_s6, %s2985_s4 }
  0x6b   : > { %p2111_p6 = pneg %p3034_p12 }
  0x6d   : > { %p2112_p10 = pnand %p2111_p6, %p2110_p4 }
  0x6f   : > { %p2113_p5 = pneg %p2112_p10 }
  0x71   : > { %p2118_p7 = pnand %p2116_p8, %p2113_p5 }
  0x73   : > { %2121 = shalt.err (!%p2118_p7)
}
  0x74   : > { %s2122_s2 = scalar_lea.vmem %s2528_s17, 256  ;;  %p2130_p3 = scmp.lt.s32.totalorder %s2528_s17, %s2528_s17 }
  0x75   : > { %p2123_p1 = scmp.ne.s32.totalorder %s2528_s17, %s2122_s2  ;;  %p2131_p13 = scmp.lt.s32.totalorder %s2122_s2, %s2122_s2 }
  0x77   : > { %p2125_p0 = pnand %p2123_p1, %p2111_p6  ;;  %p2132_p2 = por %p2131_p13, %p2130_p3 }
  0x79   : > { %p2126_p11 = pneg %p2125_p0 }
  0x7b   : > { %p2133_p9 = pnand %p2132_p2, %p2126_p11 }
  0x7d   : > { %2136 = shalt.err (!%p2133_p9)
}
  0x7e   : > { %s2290_s1 = smov 64   ;;  %s2291_s19 = smov 4  }
  0x7f   : > { %1910 = dma.hbm_to_vmem [thread:$0]  (!%p3034_p12), %s2985_s4, 256, %s2528_s17, [#allocation15], %s2290_s1, %s2290_s1, %s2291_s19  }
  0x80   : > { %s1777_s29 = sshll.u32 %s255_s27, 4  ;;  %s1778_s20 = sshll.u32 %s2405_s8, 2 }
  0x81   : > { %s3035_s18 = sshll.u32 %s2281_s26, 3  ;;  %s257_s30 = scalar_lea.vmem [#allocation13], %s1777_s29 }
  0x82   : > { %s266_s6 = sadd.s32 %s3035_s18, %s1778_s20  ;;  %s269_s9 = sshll.u32 %s257_s30, 4  ;;  %s2600_s9 = int_to_ptr.vmem [resolvable:$true] %s269_s9 }
  0x83   : > { %s1780_s25 = sshll.u32 %s266_s6, 6  ;;  %p3036_p12 = scmp.ne.s32.totalorder %s3024_s14, 0 }
  0x84   : > { %s2598_s23 = scalar_lea.hbm %s2984_s3, %s1780_s25  ;;  %s2142_s22 = scalar_lea.hbm %s2984_s3, 1024 }
  0x85   : > { %s2137_s12 = scalar_lea.hbm %s2598_s23, 256  ;;  %p2139_p6 = pneg %p3036_p12 }
  0x86   : > { %p2138_p4 = scmp.ne.s32.totalorder %s2598_s23, %s2137_s12  ;;  %p2143_p8 = scmp.lt.u32.totalorder %s2598_s23, %s2984_s3 }
  0x87   : > { %p2144_p7 = scmp.lt.u32.totalorder %s2142_s22, %s2137_s12  ;;  %p2146_p0 = scmp.lt.u32.totalorder %s2137_s12, %s2598_s23 }
  0x88   : > { %p2140_p10 = pnand %p2139_p6, %p2138_p4 }
  0x89   : > { %p2145_p1 = por %p2144_p7, %p2143_p8 }
  0x8a   : > { %p2141_p5 = pneg %p2140_p10 }
  0x8b   : > { %p2147_p11 = por %p2146_p0, %p2145_p1 }
  0x8d   : > { %p2148_p3 = pnand %p2147_p11, %p2141_p5 }
  0x8f   : > { %2151 = shalt.err (!%p2148_p3)
}
  0x90   : > { %s2152_s5 = scalar_lea.vmem %s2600_s9, 256  ;;  %s2292_s29 = smov [#allocation13]  }
  0x91   : > { %p2153_p13 = scmp.ne.s32.totalorder %s2600_s9, %s2152_s5  ;;  %s2157_s20 = sshll.u32 %s2292_s29, 4  ;;  %s2158_s20 = int_to_ptr.vmem [resolvable:$false] %s2157_s20 }
  0x92   : > { %s2159_s18 = scalar_lea.vmem %s2158_s20, 512  ;;  %p2160_p4 = scmp.lt.s32.totalorder %s2600_s9, %s2158_s20 }
  0x93   : > { %p2155_p2 = pnand %p2153_p13, %p2139_p6  ;;  %p2161_p10 = scmp.lt.s32.totalorder %s2159_s18, %s2152_s5 }
  0x95   : > { %p2156_p9 = pneg %p2155_p2  ;;  %p2162_p8 = por %p2161_p10, %p2160_p4 }
  0x97   : > { %p2163_p7 = pnand %p2162_p8, %p2156_p9 }
  0x99   : > { %2166 = shalt.err (!%p2163_p7)
}
  0x9a   : > { %1920 = dma.hbm_to_vmem [thread:$0]  (!%p3036_p12), %s2598_s23, 256, %s2600_s9, %s2467_s11, %s2290_s1, %s2290_s1, %s2291_s19  }
  0x9b   : > { %p3037_p6 = scmp.ne.s32.totalorder %s3029_s10, 0 }
  0x9c   : > { %s2634_s6 = sand.u32 (!%p3037_p6), 1, %s2269_s24   ;;  %p3038_p5 = scmp.ne.s32.totalorder (!%p3037_p6), %s3026_s15, 0 }
  0x9d   : > { %281 = sbr.rel (%p3037_p6) target bundleno = 1506 (0x5e2), region = 36  ;;  %s2637_s25 = sshll.u32 (!%p3037_p6), %s2634_s6, 2 }
  0x9e   : > { %s284_s14 = scalar_lea.sflag (!%p3037_p6), [#allocation9], %s2634_s6  ;;  %s287_s30 = scalar_lea.vmem (!%p3037_p6), [#allocation8], %s2637_s25 }
  0xa4   : > { %2232 = dma.done.wait (%p3038_p5), %s284_s14, 64  }
  0xa5   : > { %2234 = vsyncadd (%p3038_p5), %s284_s14, 4294967232  ;;  %s292_s23 = sand.u32 1, %s2386_s28   ;;  %s296_s10 = scalar_lea.vmem [#allocation11], %s2637_s25 }
  0xa6   : > { %s293_s11 = scalar_lea.sflag [#allocation12], %s292_s23 }
  0xa7   : > { %2236 = dma.done.wait (%p3038_p5), %s293_s11, 64  }
  0xa8   : > { %2238 = vsyncadd (%p3038_p5), %s293_s11, 4294967232  ;;  %s303_s1 = sand.u32 1, %s2257_s21   ;;  %p3039_p12 = scmp.ne.s32.totalorder %s3028_s16, 0 }
  0xa9   : > { %s2652_s19 = sshll.u32 %s303_s1, 4 }
  0xaa   : > { %s305_s9 = scalar_lea.vmem [#allocation13], %s2652_s19 }
  0xab   : > { %2240 = dma.done.wait (%p3039_p12), %s293_s11, 256  }
  0xac   : > { %2242 = vsyncadd (%p3039_p12), %s293_s11, 4294967040  ;;  %p3040_p1 = scmp.eq.s32.totalorder %s2386_s28, 0 }
  0xae   : > { %2244 = dma.done.wait (%p3040_p1), [#allocation15], 256   ;;  %p3041_p0 = pmov %p3040_p1 }
  0xaf   : > { %v2663_v0 = vld [vmem:[%s296_s10] sm:$0xf]  ;;  %v351_v1 = vld [vmem:[%s287_s30] sm:$0xf]  ;;  %s2293_s15 = smov 104   ;;  %s2294_s2 = smov 120   ;;  %v369_v8 = vlaneseq }
  0xb0   : > { %2246 = vsyncadd (%p3041_p0), [#allocation15], 4294967040  ;;  %529 = vrot.lane.b32.xlu1 %v2663_v0, %s2293_s15  ;;  %525 = vrot.lane.b32.xlu0 %v2663_v0, %s2294_s2  ;;  %v352_v2 = vunpack.c.l.bf16 %v351_v1  ;;  %s2295_s16 = smov 112   ;;  %v2296_v4 = vmov 0   ;;  %vm518_vm0 = vcmask 64512   ;;  %v2297_v5 = vmov 0.0  }
  0xb1   : > { %2018 = vset.pattern.permute.xlu1 %v2296_v4  ;;  %2017 = vset.pattern.permute.xlu0 %v2296_v4  ;;  %519 = vst.msk [vmem:[#allocation5] sm:$0xff] %vm518_vm0, %v2297_v5  ;;  %520 = vst.msk [vmem:[#allocation5 + $0x8] sm:$0xff] %vm518_vm0, %v2297_v5  ;;  %vm2298_vm1 = vmmov 0   ;;  %v2299_v6 = vmov 1983009808   ;;  %v370_v10 = vshrl.u32 %v369_v8, 7 }
  0xb2   : > { %v353_v3 = vmul.f32 0.35355338, %v352_v2  ;;  %1839 = vmatprep.subr.bf16.mxu0 %v2297_v5  ;;  %521 = vst.msk [vmem:[#allocation5 + $0x10] sm:$0xff] %vm518_vm0, %v2297_v5  ;;  %522 = vst.msk [vmem:[#allocation5 + $0x18] sm:$0xff] %vm518_vm0, %v2297_v5  ;;  %1845 = vmatprep.subr.bf16.mxu1 %v2297_v5  ;;  %v367_v7 = vunpack.c.l.s4 %v2299_v6  ;;  %v2300_v11 = vmov 1934713408  }
  0xb3   : > { %1841 = vmatprep.mubr.msk.bf16.mxu0 %vm2298_vm1, %v2297_v5  ;;  %1847 = vmatprep.mubr.msk.bf16.mxu1 %vm2298_vm1, %v2297_v5  ;;  %v399_v12 = vunpack.c.l.s4 %v2300_v11  ;;  %v534_v15 = vshrl.u32 %v2663_v0, 16  ;;  %vm504_vm2 = vcmask 60416   ;;  %vm509_vm3 = vcmask 7168   ;;  %s2302_s28 = smov 96   ;;  %s2303_s12 = smov 16  }
  0xb4   : > { %527 = vrot.lane.b32.xlu0 %v2663_v0, %s2295_s16  ;;  %355 = vrot.lane.b32.xlu1 %v353_v3, %s2294_s2  ;;  %v368_v9 = vunpack.c.0.s8 %v367_v7  ;;  %514 = vst.msk [vmem:[#allocation4] sm:$0xff] %vm509_vm3, %v2297_v5  ;;  %515 = vst.msk [vmem:[#allocation4 + $0x8] sm:$0xff] %vm509_vm3, %v2297_v5  ;;  %vm1148_vm4 = vcmask 1043456   ;;  %s2304_s8 = smov 8   ;;  %s2305_s17 = smov 24   ;;  %vm1530_vm5 = vcmask 130048  }
  0xb5   : > { %v400_v19 = vunpack.c.0.s8 %v399_v12  ;;  %516 = vst.msk [vmem:[#allocation4 + $0x10] sm:$0xff] %vm509_vm3, %v2297_v5  ;;  %517 = vst.msk [vmem:[#allocation4 + $0x18] sm:$0xff] %vm509_vm3, %v2297_v5  ;;  %vm1532_vm6 = vcmask 195584   ;;  %vm1564_vm7 = vcmask 261120   ;;  %s1808_s22 = sshll.u32 %s2277_s0, 6  ;;  %s343_s27 = scalar_lea.vmem [#allocation16], %s2637_s25 }
  0xb6   : > { %v2692_v17 = vsub.s32 %v368_v9, %v370_v10  ;;  %s1626_s7 = sshll.u32 %s343_s27, 4  ;;  %vm1609_vm8 = vcmask 257024   ;;  %s3042_s20 = sld [smem:[#allocation32_spill]]  ;;  %s2925_s7 = int_to_ptr.vmem [resolvable:$true] %s1626_s7 }
  0xb7   : > { %v2703_v27 = vsub.s32 %v400_v19, %v370_v10  ;;  %s1612_s0 = scalar_lea.sflag [#allocation10], %s2634_s6  ;;  %s2167_s25 = scalar_lea.vmem %s2925_s7, 64 }
  0xb8   : > { %358 = vrot.lane.b32.xlu0 %v353_v3, %s2295_s16  ;;  %361 = vrot.lane.b32.xlu1 %v353_v3, %s2293_s15  ;;  %p2168_p11 = scmp.ne.s32.totalorder %s2925_s7, %s2167_s25  ;;  %p3044_p3 = scmp.ne.s32.totalorder %s3017_s13, 0 }
  0xba   : > { %p2169_p13 = pnand %p2168_p11, %p3044_p3 }
  0xbc   : > { %s3043_s18 = smov %s3042_s20  ;;  %s2923_s14 = scalar_lea.hbm %s3042_s20, %s1808_s22 }
  0xbd   : > { %p2170_p2 = pneg %p2169_p13 }
 0x122   : > { %v2686_v13 = vpop.permute.xlu1 %529  ;;  %v2688_v14 = vpop.permute.xlu0 %525 }
 0x123   : > { %v535_v16 = vshrl.u32 %v2688_v14, 16  ;;  %v533_v18 = vpack.i.b16 %v2688_v14, %v2663_v0  ;;  %v541_v23 = vshrl.u32 %v2686_v13, 16 }
 0x125   : > { %v536_v20 = vpack.i.b16 %v535_v16, %v534_v15  ;;  %v550_v26 = vrot.slane %v533_v18, %v2692_v17 }
 0x126   : > { %v2696_v21 = vpop.permute.xlu0 %527  ;;  %v356_v22 = vpop.permute.xlu1 %355 }
 0x127   : > { %v539_v24 = vpack.i.b16 %v2686_v13, %v2696_v21  ;;  %v540_v25 = vshrl.u32 %v2696_v21, 16  ;;  %v584_v30 = vrot.slane %v536_v20, %v2692_v17 }
 0x129   : > { %v542_v28 = vpack.i.b16 %v541_v23, %v540_v25  ;;  %v558_v29 = vrot.slane %v539_v24, %v2692_v17 }
 0x12a   : > { %v359_v31 = vpop.permute.xlu0 %358  ;;  %v362_v32 = vpop.permute.xlu1 %361 }
 0x12b   : > { %v559_v33 = vcombine.low %v550_v26, %v558_v29  ;;  %v560_v34 = vcombine.high %v550_v26, %v558_v29  ;;  %v592_v35 = vrot.slane %v542_v28, %v2692_v17  ;;  %v364_v36 = vcombine.low %v353_v3, %v359_v31 }
 0x12c   : > { %v365_v37 = vcombine.high %v353_v3, %v359_v31  ;;  %v380_v38 = vcombine.low %v356_v22, %v362_v32  ;;  %v381_v39 = vcombine.high %v356_v22, %v362_v32 }
 0x12d   : > { %v567_v40 = vrot.slane %v559_v33, %v2703_v27  ;;  %v574_v41 = vrot.slane %v560_v34, %v2703_v27  ;;  %v593_v42 = vcombine.low %v584_v30, %v592_v35  ;;  %v594_v43 = vcombine.high %v584_v30, %v592_v35 }
 0x12e   : > { %v372_v44 = vrot.slane %v364_v36, %v2692_v17  ;;  %v379_v45 = vrot.slane %v365_v37, %v2692_v17  ;;  %v388_v46 = vrot.slane %v380_v38, %v2692_v17  ;;  %v395_v47 = vrot.slane %v381_v39, %v2692_v17 }
 0x12f   : > { %v601_v48 = vrot.slane %v593_v42, %v2703_v27  ;;  %v608_v49 = vrot.slane %v594_v43, %v2703_v27  ;;  %v611_v50 = vcombine.low %v567_v40, %v574_v41  ;;  %v1789_v51 = vcombine.high %v567_v40, %v574_v41 }
 0x130   : > { %v396_v52 = vcombine.low %v372_v44, %v388_v46  ;;  %v397_v53 = vcombine.high %v372_v44, %v388_v46  ;;  %v412_v54 = vcombine.low %v379_v45, %v395_v47  ;;  %v413_v55 = vcombine.high %v379_v45, %v395_v47 }
 0x131   : > { %v618_v56 = vrot.slane %v611_v50, %v2692_v17  ;;  %v626_v57 = vrot.slane %v1789_v51, %v2692_v17  ;;  %v636_v58 = vcombine.low %v601_v48, %v608_v49  ;;  %v1790_v59 = vcombine.high %v601_v48, %v608_v49 }
 0x132   : > { %v404_v60 = vrot.slane %v396_v52, %v2703_v27  ;;  %v411_v61 = vrot.slane %v397_v53, %v2703_v27  ;;  %v420_v62 = vrot.slane %v412_v54, %v2703_v27  ;;  %v427_v63 = vrot.slane %v413_v55, %v2703_v27 }
 0x133   : > { %v627_v1 = vcombine.low %v618_v56, %v626_v57  ;;  %v643_v2 = vrot.slane %v636_v58, %v2692_v17  ;;  %v651_v3 = vrot.slane %v1790_v59, %v2692_v17  ;;  %v2301_v56 = vmov -inf   ;;  %v1812_v57 = vld [vmem:[%s305_s9] sm:$0xff]  }
 0x134   : > { %v432_v6 = vcombine.low %v404_v60, %v411_v61  ;;  %v1787_v7 = vcombine.high %v404_v60, %v411_v61  ;;  %v448_v8 = vcombine.low %v420_v62, %v427_v63  ;;  %v1788_v9 = vcombine.high %v420_v62, %v427_v63  ;;  %511 = vst.msk [vmem:[#allocation3 + $0x8] sm:$0xff] %vm509_vm3, %v2301_v56 }
 0x135   : > { %v634_v10 = vrot.slane %v627_v1, %v2703_v27  ;;  %v652_v11 = vcombine.low %v643_v2, %v651_v3  ;;  %510 = vst.msk [vmem:[#allocation3] sm:$0xff] %vm509_vm3, %v2301_v56  ;;  %512 = vst.msk [vmem:[#allocation3 + $0x10] sm:$0xff] %vm509_vm3, %v2301_v56  ;;  %v1813_v58 = vunpack.c.l.bf16 %v1812_v57  ;;  %v1814_v59 = vunpack.c.h.bf16 %v1812_v57 }
 0x136   : > { %v439_v12 = vrot.slane %v432_v6, %v2692_v17  ;;  %v447_v15 = vrot.slane %v1787_v7, %v2692_v17  ;;  %v455_v16 = vrot.slane %v448_v8, %v2692_v17  ;;  %v463_v18 = vrot.slane %v1788_v9, %v2692_v17  ;;  %513 = vst.msk [vmem:[#allocation3 + $0x18] sm:$0xff] %vm509_vm3, %v2301_v56  ;;  %v1819_v7 = vld [vmem:[%s305_s9 + $0x8] sm:$0xff]  }
 0x137   : > { %v659_v19 = vrot.slane %v652_v11, %v2703_v27  ;;  %v664_v26 = vshrl.u32 %v634_v10, 16  ;;  %v635_v41 = vcombine.high %v634_v10, %v2296_v4 }
 0x138   : > { %v464_v20 = vcombine.low %v439_v12, %v447_v15  ;;  %v465_v22 = vcombine.high %v439_v12, %v447_v15  ;;  %v480_v23 = vcombine.low %v455_v16, %v463_v18  ;;  %v481_v24 = vcombine.high %v455_v16, %v463_v18 }
 0x139   : > { %v663_v25 = vpack.i.b16 %v659_v19, %v634_v10  ;;  %v665_v28 = vshrl.u32 %v659_v19, 16  ;;  %v660_v35 = vcombine.high %v659_v19, %v2296_v4  ;;  %v670_v47 = vshrl.u32 %v635_v41, 16 }
 0x13a   : > { %v472_v29 = vrot.slane %v464_v20, %v2703_v27  ;;  %v479_v30 = vrot.slane %v465_v22, %v2703_v27  ;;  %v488_v31 = vrot.slane %v480_v23, %v2703_v27  ;;  %v495_v32 = vrot.slane %v481_v24, %v2703_v27 }
 0x13b   : > { %v840_v33 = vsel %vm518_vm0, %v663_v25, 0  ;;  %v666_v34 = vpack.i.b16 %v665_v28, %v664_v26  ;;  %v671_v46 = vshrl.u32 %v660_v35, 16  ;;  %v669_v48 = vpack.i.b16 %v660_v35, %v635_v41 }
 0x13c   : > { %v496_v36 = vcombine.low %v472_v29, %v488_v31  ;;  %v497_v37 = vcombine.high %v472_v29, %v488_v31  ;;  %v498_v38 = vcombine.low %v479_v30, %v495_v32  ;;  %v499_v39 = vcombine.high %v479_v30, %v495_v32  ;;  %1840 = vmatpush3.bf16.xpose.msra.mxu0 %v840_v33  ;;  %v2796_v31 = vld [vmem:[#allocation3 + $0x8] sm:$0xff]  ;;  %v2798_v32 = vld [vmem:[#allocation3] sm:$0xff] }
 0x13d   : > { %v886_v40 = vsel %vm518_vm0, %v666_v34, 0  ;;  %1851 = vmatprep.subr.bf16.mxu0 %v2297_v5  ;;  %v672_v49 = vpack.i.b16 %v671_v46, %v670_v47  ;;  %v932_v52 = vsel %vm518_vm0, %v669_v48, 0  ;;  %v1817_v12 = vunpack.c.l.bf16 %v1819_v7 }
 0x13e   : > { %v500_v42 = vpack.c.bf16 %v496_v36, %v496_v36  ;;  %v501_v43 = vpack.c.bf16 %v497_v37, %v497_v37  ;;  %v502_v44 = vpack.c.bf16 %v498_v38, %v498_v38  ;;  %v503_v45 = vpack.c.bf16 %v499_v39, %v499_v39  ;;  %1846 = vmatpush3.bf16.xpose.msra.mxu1 %v886_v40  ;;  %v2816_v36 = vld [vmem:[#allocation3 + $0x10] sm:$0xff]  ;;  %v2821_v40 = vld [vmem:[#allocation3 + $0x18] sm:$0xff] }
 0x13f   : > { %1857 = vmatprep.subr.bf16.mxu1 %v2297_v5  ;;  %v978_v53 = vsel %vm518_vm0, %v672_v49, 0  ;;  %v1818_v15 = vunpack.c.h.bf16 %v1819_v7 }
 0x140   : > { %505 = vst.msk [vmem:[#allocation2] sm:$0xf] %vm504_vm2, %v500_v42  ;;  %506 = vst.msk [vmem:[#allocation2 + $0x4] sm:$0xf] %vm504_vm2, %v501_v43 }
 0x141   : > { %507 = vst.msk [vmem:[#allocation2 + $0x8] sm:$0xf] %vm504_vm2, %v502_v44  ;;  %508 = vst.msk [vmem:[#allocation2 + $0xc] sm:$0xf] %vm504_vm2, %v503_v45 }
 0x147   : > { %v823_v50 = vld [vmem:[#allocation2] sm:$0xf]  ;;  %v824_v51 = vld [vmem:[#allocation2 + $0x4] sm:$0xf] }
 0x148   : > { %1842 = vmatmul.mubr.msk.bf16.vlgmr.msra.gmra.mrb[0].mxu0 %vm518_vm0, %v823_v50  ;;  %1848 = vmatmul.mubr.msk.bf16.vlgmr.msra.gmra.mrb[0].mxu1 %vm518_vm0, %v824_v51  ;;  %v825_v54 = vld [vmem:[#allocation2 + $0x8] sm:$0xf]  ;;  %v826_v55 = vld [vmem:[#allocation2 + $0xc] sm:$0xf] }
 0x149   : > { %1852 = vmatpush3.bf16.xpose.msra.mxu0 %v932_v52  ;;  %1858 = vmatpush3.bf16.xpose.msra.mxu1 %v978_v53 }
 0x14a   : > { %1853 = vmatprep.mubr.msk.bf16.mxu0 %vm2298_vm1, %v2297_v5  ;;  %1859 = vmatprep.mubr.msk.bf16.mxu1 %vm2298_vm1, %v2297_v5 }
 0x14b   : > { %1863 = vmatprep.subr.bf16.mxu0 %v2297_v5  ;;  %1869 = vmatprep.subr.bf16.mxu1 %v2297_v5 }
 0x150   : > { %1854 = vmatmul.mubr.msk.bf16.vlgmr.msra.gmra.mrb[4].mxu0 %vm518_vm0, %v825_v54  ;;  %1860 = vmatmul.mubr.msk.bf16.vlgmr.msra.gmra.mrb[4].mxu1 %vm518_vm0, %v826_v55 }
 0x151   : > { %1865 = vmatprep.mubr.msk.bf16.mxu0 %vm2298_vm1, %v2297_v5  ;;  %1871 = vmatprep.mubr.msk.bf16.mxu1 %vm2298_vm1, %v2297_v5 }
 0x21b   : > { %v876_v60 = vpop.f32.mrb[0].mxu0  ;;  %v922_v61 = vpop.f32.mrb[0].mxu1 }
 0x21c   : > { %v2770_v62 = vadd.f32 %v1813_v58, %v876_v60  ;;  %v2772_v63 = vadd.f32 %v1814_v59, %v922_v61  ;;  %v1843_v1 = vpop.f32.mrb[1].mxu0  ;;  %v1849_v2 = vpop.f32.mrb[1].mxu1 }
 0x21d   : > { %v879_v3 = vpop.f32.mrb[2].mxu0  ;;  %v925_v6 = vpop.f32.mrb[2].mxu1 }
 0x21e   : > { %v1844_v8 = vpop.f32.mrb[3].mxu0  ;;  %v1850_v9 = vpop.f32.mrb[3].mxu1  ;;  %v1027_v10 = vsel %vm518_vm0, %v2772_v63, -inf  ;;  %v1024_v11 = vsel %vm518_vm0, %v2770_v62, -inf }
 0x21f   : > { %1028 = vmax.xlane.f32.xlu1 %v1027_v10  ;;  %1025 = vmax.xlane.f32.xlu0 %v1024_v11 }
 0x223   : > { %v968_v16 = vpop.f32.mrb[4].mxu0  ;;  %v1014_v18 = vpop.f32.mrb[4].mxu1 }
 0x224   : > { %v2780_v19 = vadd.f32 %v1817_v12, %v968_v16  ;;  %v1855_v20 = vpop.f32.mrb[5].mxu0  ;;  %v1861_v22 = vpop.f32.mrb[5].mxu1  ;;  %v2782_v25 = vadd.f32 %v1818_v15, %v1014_v18 }
 0x225   : > { %v971_v23 = vpop.f32.mrb[6].mxu0  ;;  %v1017_v24 = vpop.f32.mrb[6].mxu1 }
 0x226   : > { %v1856_v26 = vpop.f32.mrb[7].mxu0  ;;  %v1862_v28 = vpop.f32.mrb[7].mxu1  ;;  %v1030_v29 = vsel %vm518_vm0, %v2780_v19, -inf  ;;  %v1033_v30 = vsel %vm518_vm0, %v2782_v25, -inf }
 0x227   : > { %1031 = vmax.xlane.f32.xlu0 %v1030_v29 }
 0x22b   : > { %1034 = vmax.xlane.f32.xlu0 %v1033_v30 }
 0x230   : > { %673 = vrot.lane.b32.xlu1 %v2663_v0, %s2302_s28 }
 0x234   : > { %677 = vrot.lane.b32.xlu1 %v2696_v21, %s2302_s28 }
 0x238   : > { %679 = vrot.lane.b32.xlu1 %v2686_v13, %s2302_s28 }
 0x241   : > { %675 = vrot.lane.b32.xlu0 %v2688_v14, %s2302_s28 }
 0x2ac   : > { %v1029_v33 = vpop.xlane.xlu1 %1028  ;;  %v1026_v34 = vpop.xlane.xlu0 %1025 }
 0x2ad   : > { %v2801_v35 = vmax.f32 %v2796_v31, %v1029_v33  ;;  %v2804_v0 = vmax.f32 %v2798_v32, %v1026_v34 }
 0x2af   : > { %v1041_v21 = vsub.f32 %v2796_v31, %v2801_v35  ;;  %1339 = vst.msk [vmem:[#allocation3 + $0x8] sm:$0xff] %vm509_vm3, %v2801_v35  ;;  %v1040_v13 = vsub.f32 %v2798_v32, %v2804_v0  ;;  %1338 = vst.msk [vmem:[#allocation3] sm:$0xff] %vm509_vm3, %v2804_v0  ;;  %1059 = vperm.xlu1 %2018, %v2801_v35   ;;  %1054 = vperm.xlu0 %2017, %v2804_v0   ;;  %v1085_v32 = vld [vmem:[#allocation4 + $0x8] sm:$0xff]  ;;  %v1084_v0 = vld [vmem:[#allocation4] sm:$0xff] }
 0x2b0   : > { %v674_v14 = vpop.permute.xlu1 %673 }
 0x2b1   : > { %v684_v46 = vshrl.u32 %v674_v14, 16 }
 0x2b4   : > { %v678_v37 = vpop.permute.xlu1 %677  ;;  %v1032_v38 = vpop.xlane.xlu0 %1031 }
 0x2b5   : > { %v2819_v39 = vmax.f32 %v2816_v36, %v1032_v38  ;;  %v690_v47 = vshrl.u32 %v678_v37, 16 }
 0x2b7   : > { %v1042_v41 = vsub.f32 %v2816_v36, %v2819_v39  ;;  %1340 = vst.msk [vmem:[#allocation3 + $0x10] sm:$0xff] %vm509_vm3, %v2819_v39  ;;  %1064 = vperm.xlu1 %2018, %v2819_v39  }
 0x2b8   : > { %v680_v42 = vpop.permute.xlu1 %679  ;;  %v1035_v43 = vpop.xlane.xlu0 %1034 }
 0x2b9   : > { %v691_v44 = vshrl.u32 %v680_v42, 16  ;;  %v2829_v45 = vmax.f32 %v2821_v40, %v1035_v43  ;;  %v689_v48 = vpack.i.b16 %v680_v42, %v678_v37 }
 0x2bb   : > { %v1043_v49 = vsub.f32 %v2821_v40, %v2829_v45  ;;  %1341 = vst.msk [vmem:[#allocation3 + $0x18] sm:$0xff] %vm509_vm3, %v2829_v45  ;;  %1069 = vperm.xlu0 %2017, %v2829_v45   ;;  %v692_v51 = vpack.i.b16 %v691_v44, %v690_v47  ;;  %v708_v54 = vrot.slane %v689_v48, %v2692_v17  ;;  %v1086_v40 = vld [vmem:[#allocation4 + $0x10] sm:$0xff] }
 0x2bc   : > { %v676_v50 = vpop.permute.xlu0 %675 }
 0x2bd   : > { %v683_v52 = vpack.i.b16 %v676_v50, %v674_v14  ;;  %v685_v53 = vshrl.u32 %v676_v50, 16  ;;  %v742_v57 = vrot.slane %v692_v51, %v2692_v17 }
 0x2bf   : > { %v686_v55 = vpack.i.b16 %v685_v53, %v684_v46  ;;  %v700_v56 = vrot.slane %v683_v52, %v2692_v17 }
 0x2c1   : > { %v709_v58 = vcombine.low %v700_v56, %v708_v54  ;;  %v710_v59 = vcombine.high %v700_v56, %v708_v54  ;;  %v734_v60 = vrot.slane %v686_v55, %v2692_v17 }
 0x2c3   : > { %v717_v61 = vrot.slane %v709_v58, %v2703_v27  ;;  %v724_v1 = vrot.slane %v710_v59, %v2703_v27  ;;  %v743_v2 = vcombine.low %v734_v60, %v742_v57  ;;  %v744_v3 = vcombine.high %v734_v60, %v742_v57 }
 0x2c5   : > { %v751_v6 = vrot.slane %v743_v2, %v2703_v27  ;;  %v758_v7 = vrot.slane %v744_v3, %v2703_v27  ;;  %v761_v8 = vcombine.low %v717_v61, %v724_v1  ;;  %v1791_v9 = vcombine.high %v717_v61, %v724_v1 }
 0x2c7   : > { %v768_v10 = vrot.slane %v761_v8, %v2692_v17  ;;  %v776_v11 = vrot.slane %v1791_v9, %v2692_v17  ;;  %v786_v12 = vcombine.low %v751_v6, %v758_v7  ;;  %v1792_v15 = vcombine.high %v751_v6, %v758_v7 }
 0x2c8   : > { %v1046_v9 = vmul.f32 1.442695, %v1041_v21 }
 0x2c9   : > { %v793_v16 = vrot.slane %v786_v12, %v2692_v17  ;;  %v801_v18 = vrot.slane %v1792_v15, %v2692_v17  ;;  %v777_v20 = vcombine.low %v768_v10, %v776_v11  ;;  %v1044_v10 = vmul.f32 1.442695, %v1040_v13 }
 0x2ca   : > { %v1048_v11 = vmul.f32 1.442695, %v1042_v41  ;;  %v1050_v12 = vmul.f32 1.442695, %v1043_v49 }
 0x2cb   : > { %v784_v22 = vrot.slane %v777_v20, %v2703_v27  ;;  %v802_v23 = vcombine.low %v793_v16, %v801_v18  ;;  %v1087_v20 = vld [vmem:[#allocation4 + $0x18] sm:$0xff] }
 0x2cd   : > { %v809_v24 = vrot.slane %v802_v23, %v2703_v27  ;;  %v785_v26 = vcombine.high %v784_v22, %v2296_v4  ;;  %v814_v29 = vshrl.u32 %v784_v22, 16 }
 0x2cf   : > { %v813_v28 = vpack.i.b16 %v809_v24, %v784_v22  ;;  %v815_v30 = vshrl.u32 %v809_v24, 16  ;;  %v810_v33 = vcombine.high %v809_v24, %v2296_v4  ;;  %v820_v34 = vshrl.u32 %v785_v26, 16 }
 0x2d1   : > { %v1150_v14 = vsel %vm1148_vm4, %v813_v28, 0  ;;  %v816_v37 = vpack.i.b16 %v815_v30, %v814_v29  ;;  %v819_v38 = vpack.i.b16 %v810_v33, %v785_v26  ;;  %v821_v42 = vshrl.u32 %v810_v33, 16 }
 0x2d2   : > { %1864 = vmatpush3.bf16.msra.mxu0 %v1150_v14 }
 0x2d3   : > { %v1196_v43 = vsel %vm1148_vm4, %v816_v37, 0  ;;  %1875 = vmatprep.subr.bf16.mxu0 %v2297_v5  ;;  %v1242_v44 = vsel %vm1148_vm4, %v819_v38, 0  ;;  %v822_v46 = vpack.i.b16 %v821_v42, %v820_v34  ;;  %v1114_v42 = vld [vmem:[#allocation5 + $0x8] sm:$0xff] }
 0x2d4   : > { %1870 = vmatpush3.bf16.msra.mxu1 %v1196_v43 }
 0x2d5   : > { %1881 = vmatprep.subr.bf16.mxu1 %v2297_v5  ;;  %v1288_v47 = vsel %vm1148_vm4, %v822_v46, 0 }
 0x32e   : > { %v1060_v4 = vpop.permute.xlu1 %1059  ;;  %v1055_v48 = vpop.permute.xlu0 %1054 }
 0x32f   : > { %v1073_v50 = vsub.f32 %v2772_v63, %v1060_v4  ;;  %v1072_v51 = vsub.f32 %v2770_v62, %v1055_v48 }
 0x331   : > { %v1078_v52 = vmul.f32 1.442695, %v1073_v50  ;;  %v1076_v53 = vmul.f32 1.442695, %v1072_v51 }
 0x333   : > { %2021 = vpow2.f32 %v1078_v52 }
 0x334   : > { %2023 = vpow2.f32 %v1076_v53 }
 0x336   : > { %v1065_v54 = vpop.permute.xlu1 %1064 }
 0x337   : > { %v1074_v55 = vsub.f32 %v2780_v19, %v1065_v54 }
 0x339   : > { %v1080_v56 = vmul.f32 1.442695, %v1074_v55 }
 0x33a   : > { %v1070_v57 = vpop.permute.xlu0 %1069 }
 0x33b   : > { %2025 = vpow2.f32 %v1080_v56  ;;  %v1075_v58 = vsub.f32 %v2782_v25, %v1070_v57 }
 0x33d   : > { %v2022_v59 = vpop.eup %2021  ;;  %v1082_v60 = vmul.f32 1.442695, %v1075_v58 }
 0x33e   : > { %v2024_v61 = vpop.eup %2023  ;;  %v1095_v1 = vsel %vm518_vm0, %v2022_v59, 0.0  ;;  %v1142_v63 = vpack.c.bf16 %v2022_v59, %v2022_v59  ;;  %v1115_v59 = vld [vmem:[#allocation5 + $0x10] sm:$0xff] }
 0x33f   : > { %2027 = vpow2.f32 %v1082_v60  ;;  %1096 = vadd.xlane.f32.xlu0 %v1095_v1  ;;  %v1092_v62 = vsel %vm518_vm0, %v2024_v61, 0.0  ;;  %v1141_v2 = vpack.c.bf16 %v2024_v61, %v2024_v61  ;;  %v1116_v1 = vld [vmem:[#allocation5 + $0x18] sm:$0xff] }
 0x340   : > { %1093 = vadd.xlane.f32.xlu1 %v1092_v62  ;;  %1872 = vmatmul.mubr.msk.bf16.vlgmr.msra.gmra.mrb[8].mxu1 %vm518_vm0, %v1142_v63  ;;  %2029 = vpow2.f32 %v1046_v9 }
 0x341   : > { %1866 = vmatmul.mubr.msk.bf16.vlgmr.msra.gmra.mrb[8].mxu0 %vm518_vm0, %v1141_v2  ;;  %1882 = vmatpush3.bf16.msra.mxu1 %v1288_v47  ;;  %2031 = vpow2.f32 %v1044_v10 }
 0x342   : > { %1876 = vmatpush3.bf16.msra.mxu0 %v1242_v44  ;;  %1877 = vmatprep.mubr.msk.bf16.mxu0 %vm2298_vm1, %v2297_v5  ;;  %2033 = vpow2.f32 %v1048_v11  ;;  %v1113_v44 = vld [vmem:[#allocation5] sm:$0xff] }
 0x343   : > { %1883 = vmatprep.mubr.msk.bf16.mxu1 %vm2298_vm1, %v2297_v5  ;;  %1887 = vmatprep.subr.bf16.mxu0 %v2297_v5  ;;  %2035 = vpow2.f32 %v1050_v12  ;;  %v1534_v12 = vld [vmem:[%s287_s30] sm:$0xf]  ;;  %s2306_s30 = smov [#allocation16]  }
 0x344   : > { %s2171_s23 = sshll.u32 %s2306_s30, 4  ;;  %s2172_s23 = int_to_ptr.vmem [resolvable:$false] %s2171_s23 }
 0x345   : > { %v2026_v19 = vpop.eup %2025  ;;  %s2173_s11 = scalar_lea.vmem %s2172_s23, 128  ;;  %p2174_p9 = scmp.lt.s32.totalorder %s2925_s7, %s2172_s23 }
 0x346   : > { %v1098_v25 = vsel %vm518_vm0, %v2026_v19, 0.0  ;;  %v1143_v3 = vpack.c.bf16 %v2026_v19, %v2026_v19  ;;  %p2175_p4 = scmp.lt.s32.totalorder %s2173_s11, %s2167_s25 }
 0x347   : > { %1099 = vadd.xlane.f32.xlu0 %v1098_v25 }
 0x348   : > { %p2176_p10 = por %p2175_p4, %p2174_p9 }
 0x349   : > { %v2028_v6 = vpop.eup %2027  ;;  %1878 = vmatmul.mubr.msk.bf16.vlgmr.msra.gmra.mrb[12].mxu0 %vm518_vm0, %v1143_v3 }
 0x34a   : > { %v1101_v7 = vsel %vm518_vm0, %v2028_v6, 0.0  ;;  %v1144_v8 = vpack.c.bf16 %v2028_v6, %v2028_v6  ;;  %1891 = vmatprep.mubr.msk.bf16.mxu0 %vm2298_vm1, %v2297_v5  ;;  %v2030_v15 = vpop.eup %2029  ;;  %p2177_p8 = pnand %p2176_p10, %p2170_p2 }
 0x34b   : > { %1102 = vadd.xlane.f32.xlu1 %v1101_v7  ;;  %v2032_v16 = vpop.eup %2031  ;;  %v1089_v21 = vmul.f32 %v2030_v15, %v1085_v32 }
 0x34c   : > { %1884 = vmatmul.mubr.msk.bf16.vlgmr.msra.gmra.mrb[12].mxu1 %vm518_vm0, %v1144_v8  ;;  %v2034_v31 = vpop.eup %2033  ;;  %v1088_v13 = vmul.f32 %v2032_v16, %v1084_v0 }
 0x34d   : > { %v2036_v35 = vpop.eup %2035  ;;  %v1090_v45 = vmul.f32 %v2034_v31, %v1086_v40 }
 0x34e   : > { %v1091_v24 = vmul.f32 %v2036_v35, %v1087_v20 }
 0x35c   : > { %1124 = vperm.xlu1 %2018, %v2030_v15   ;;  %v1535_v15 = vunpack.c.l.bf16 %v1534_v12 }
 0x35d   : > { %1119 = vperm.xlu0 %2017, %v2032_v16  }
 0x35e   : > { %v1803_v16 = vmul.f32 -1.442695, %v1535_v15 }
 0x360   : > { %1129 = vperm.xlu1 %2018, %v2034_v31  }
 0x361   : > { %1134 = vperm.xlu0 %2017, %v2036_v35  }
 0x3cc   : > { %v1097_v36 = vpop.xlane.xlu0 %1096 }
 0x3cd   : > { %v1094_v39 = vpop.xlane.xlu1 %1093  ;;  %v1105_v41 = vadd.f32 %v1097_v36, %v1089_v21 }
 0x3ce   : > { %v1104_v18 = vadd.f32 %v1094_v39, %v1088_v13 }
 0x3cf   : > { %1110 = vst.msk [vmem:[#allocation4 + $0x8] sm:$0xff] %vm509_vm3, %v1105_v41 }
 0x3d0   : > { %1109 = vst.msk [vmem:[#allocation4] sm:$0xff] %vm509_vm3, %v1104_v18 }
 0x3d4   : > { %v1100_v49 = vpop.xlane.xlu0 %1099 }
 0x3d5   : > { %v1106_v22 = vadd.f32 %v1100_v49, %v1090_v45 }
 0x3d6   : > { %v1346_v23 = vld [vmem:[#allocation4 + $0x8] sm:$0xff] }
 0x3d7   : > { %1111 = vst.msk [vmem:[#allocation4 + $0x10] sm:$0xff] %vm509_vm3, %v1106_v22  ;;  %v1345_v26 = vld [vmem:[#allocation4] sm:$0xff]  ;;  %2037 = vrcp.f32 %v1346_v23 }
 0x3d8   : > { %v1103_v28 = vpop.xlane.xlu1 %1102  ;;  %2039 = vrcp.f32 %v1345_v26 }
 0x3d9   : > { %v1107_v29 = vadd.f32 %v1103_v28, %v1091_v24 }
 0x3db   : > { %1112 = vst.msk [vmem:[#allocation4 + $0x18] sm:$0xff] %vm509_vm3, %v1107_v29 }
 0x3dc   : > { %v1125_v43 = vpop.permute.xlu1 %1124  ;;  %v1120_v46 = vpop.permute.xlu0 %1119 }
 0x3dd   : > { %v1138_v47 = vmul.f32 %v1125_v43, %v1114_v42  ;;  %v1137_v4 = vmul.f32 %v1120_v46, %v1113_v44  ;;  %v2019_v42 = vld [vmem:[#allocation14] sm:$0xff]  }
 0x3de   : > { %v1347_v30 = vld [vmem:[#allocation4 + $0x10] sm:$0xff]  ;;  %1888 = vmatpush3.bf16.msra.mxu0 %v2019_v42 }
 0x3df   : > { %2041 = vrcp.f32 %v1347_v30  ;;  %1889 = vmatprep.subr.bf16.mxu0 %v2297_v5 }
 0x3e0   : > { %v1130_v60 = vpop.permute.xlu1 %1129  ;;  %v1135_v63 = vpop.permute.xlu0 %1134 }
 0x3e1   : > { %v2038_v33 = vpop.eup %2037  ;;  %v1139_v61 = vmul.f32 %v1130_v60, %v1115_v59  ;;  %v1140_v25 = vmul.f32 %v1135_v63, %v1116_v1 }
 0x3e2   : > { %v2040_v34 = vpop.eup %2039  ;;  %1364 = vperm.xlu0 %2017, %v2038_v33   ;;  %v1348_v14 = vld [vmem:[#allocation4 + $0x18] sm:$0xff] }
 0x3e3   : > { %1359 = vperm.xlu1 %2018, %v2040_v34   ;;  %2043 = vrcp.f32 %v1348_v14 }
 0x3e4   : > { %2045 = vpow2.f32 %v1803_v16 }
 0x3e9   : > { %v2042_v37 = vpop.eup %2041 }
 0x3ea   : > { %1369 = vperm.xlu1 %2018, %v2042_v37  }
 0x3ed   : > { %v2044_v38 = vpop.eup %2043 }
 0x3ee   : > { %1374 = vperm.xlu0 %2017, %v2044_v38   ;;  %v2046_v24 = vpop.eup %2045 }
 0x3ef   : > { %v1539_v38 = vadd.f32 1.0, %v2046_v24 }
 0x3f1   : > { %2047 = vrcp.f32 %v1539_v38 }
 0x413   : > { %v1232_v48 = vpop.f32.mrb[8].mxu1 }
 0x414   : > { %v1186_v50 = vpop.f32.mrb[8].mxu0  ;;  %v1331_v51 = vadd.f32 %v1232_v48, %v1138_v47  ;;  %v1873_v52 = vpop.f32.mrb[9].mxu1 }
 0x415   : > { %v1330_v53 = vadd.f32 %v1186_v50, %v1137_v4  ;;  %v1867_v54 = vpop.f32.mrb[9].mxu0  ;;  %v1235_v55 = vpop.f32.mrb[10].mxu1 }
 0x416   : > { %1335 = vst.msk [vmem:[#allocation5 + $0x8] sm:$0xff] %vm518_vm0, %v1331_v51  ;;  %v1189_v56 = vpop.f32.mrb[10].mxu0  ;;  %v1874_v57 = vpop.f32.mrb[11].mxu1 }
 0x417   : > { %1334 = vst.msk [vmem:[#allocation5] sm:$0xff] %vm518_vm0, %v1330_v53  ;;  %v1868_v58 = vpop.f32.mrb[11].mxu0  ;;  %v2020_v56 = vld [vmem:[#allocation14 + $0x8] sm:$0xff]  }
 0x418   : > { %1890 = vmatpush3.bf16.msra.mxu0 %v2020_v56 }
 0x41c   : > { %v1278_v62 = vpop.f32.mrb[12].mxu0 }
 0x41d   : > { %v1332_v2 = vadd.f32 %v1278_v62, %v1139_v61  ;;  %v1879_v19 = vpop.f32.mrb[13].mxu0  ;;  %v1354_v39 = vld [vmem:[#allocation5 + $0x8] sm:$0xff] }
 0x41e   : > { %v1281_v3 = vpop.f32.mrb[14].mxu0  ;;  %v1353_v13 = vld [vmem:[#allocation5] sm:$0xff] }
 0x41f   : > { %1336 = vst.msk [vmem:[#allocation5 + $0x10] sm:$0xff] %vm518_vm0, %v1332_v2  ;;  %v1880_v6 = vpop.f32.mrb[15].mxu0  ;;  %v1324_v7 = vpop.f32.mrb[12].mxu1 }
 0x420   : > { %v1333_v8 = vadd.f32 %v1324_v7, %v1140_v25  ;;  %v1885_v9 = vpop.f32.mrb[13].mxu1 }
 0x421   : > { %v1327_v10 = vpop.f32.mrb[14].mxu1 }
 0x422   : > { %1337 = vst.msk [vmem:[#allocation5 + $0x18] sm:$0xff] %vm518_vm0, %v1333_v8  ;;  %v1886_v11 = vpop.f32.mrb[15].mxu1 }
 0x426   : > { %v1355_v0 = vld [vmem:[#allocation5 + $0x10] sm:$0xff] }
 0x429   : > { %v1356_v41 = vld [vmem:[#allocation5 + $0x18] sm:$0xff] }
 0x461   : > { %v1365_v35 = vpop.permute.xlu0 %1364 }
 0x462   : > { %v1360_v31 = vpop.permute.xlu1 %1359  ;;  %v1378_v40 = vmul.f32 %v1365_v35, %v1354_v39 }
 0x463   : > { %v1377_v36 = vmul.f32 %v1360_v31, %v1353_v13 }
 0x469   : > { %v1370_v32 = vpop.permute.xlu1 %1369 }
 0x46a   : > { %v1379_v21 = vmul.f32 %v1370_v32, %v1355_v0 }
 0x46c   : > { %v1381_v45 = vcombine.low %v1377_v36, %v1379_v21  ;;  %v1382_v49 = vcombine.high %v1377_v36, %v1379_v21 }
 0x46d   : > { %v1375_v18 = vpop.permute.xlu0 %1374 }
 0x46e   : > { %v1380_v20 = vmul.f32 %v1375_v18, %v1356_v41  ;;  %v1389_v26 = vrot.slane %v1381_v45, %v2692_v17  ;;  %v1396_v28 = vrot.slane %v1382_v49, %v2692_v17 }
 0x470   : > { %v1397_v22 = vcombine.low %v1378_v40, %v1380_v20  ;;  %v1398_v23 = vcombine.high %v1378_v40, %v1380_v20 }
 0x472   : > { %v1405_v29 = vrot.slane %v1397_v22, %v2692_v17  ;;  %v1412_v30 = vrot.slane %v1398_v23, %v2692_v17 }
 0x474   : > { %v1413_v33 = vcombine.low %v1389_v26, %v1405_v29  ;;  %v1414_v34 = vcombine.high %v1389_v26, %v1405_v29  ;;  %v1429_v14 = vcombine.low %v1396_v28, %v1412_v30  ;;  %v1430_v37 = vcombine.high %v1396_v28, %v1412_v30 }
 0x476   : > { %v1421_v43 = vrot.slane %v1413_v33, %v2703_v27  ;;  %v1428_v44 = vrot.slane %v1414_v34, %v2703_v27  ;;  %v1437_v46 = vrot.slane %v1429_v14, %v2703_v27  ;;  %v1444_v47 = vrot.slane %v1430_v37, %v2703_v27 }
 0x478   : > { %v1449_v4 = vcombine.low %v1421_v43, %v1428_v44  ;;  %v1801_v48 = vcombine.high %v1421_v43, %v1428_v44  ;;  %v1465_v50 = vcombine.low %v1437_v46, %v1444_v47  ;;  %v1802_v51 = vcombine.high %v1437_v46, %v1444_v47 }
 0x47a   : > { %v1456_v52 = vrot.slane %v1449_v4, %v2692_v17  ;;  %v1464_v53 = vrot.slane %v1801_v48, %v2692_v17  ;;  %v1472_v54 = vrot.slane %v1465_v50, %v2692_v17  ;;  %v1480_v55 = vrot.slane %v1802_v51, %v2692_v17  ;;  %v2048_v17 = vpop.eup %2047 }
 0x47c   : > { %v1482_v57 = vcombine.high %v1456_v52, %v1464_v53  ;;  %v1498_v58 = vcombine.high %v1472_v54, %v1480_v55  ;;  %v1481_v59 = vcombine.low %v1456_v52, %v1464_v53  ;;  %v1497_v60 = vcombine.low %v1472_v54, %v1480_v55 }
 0x47e   : > { %v1496_v61 = vrot.slane %v1482_v57, %v2703_v27  ;;  %v1512_v1 = vrot.slane %v1498_v58, %v2703_v27  ;;  %v1489_v5 = vrot.slane %v1481_v59, %v2703_v27  ;;  %v1505_v63 = vrot.slane %v1497_v60, %v2703_v27 }
 0x480   : > { %v1515_v62 = vcombine.low %v1496_v61, %v1512_v1  ;;  %v1514_v2 = vcombine.high %v1489_v5, %v1505_v63  ;;  %v1513_v19 = vcombine.low %v1489_v5, %v1505_v63  ;;  %v1516_v25 = vcombine.high %v1496_v61, %v1512_v1 }
 0x482   : > { %1522 = vrot.lane.b32.xlu0 %v1515_v62, %s2303_s12  ;;  %1518 = vrot.lane.b32.xlu1 %v1514_v2, %s2304_s8 }
 0x486   : > { %1526 = vrot.lane.b32.xlu1 %v1516_v25, %s2305_s17  ;;  %1543 = vrot.lane.b32.xlu0 %v2048_v17, %s2302_s28 }
 0x4f4   : > { %v1523_v3 = vpop.permute.xlu0 %1522  ;;  %v1519_v6 = vpop.permute.xlu1 %1518 }
 0x4f5   : > { %v1529_v7 = vsel %vm518_vm0, %v1513_v19, %v1519_v6 }
 0x4f6   : > { %v1531_v9 = vsel %vm1530_vm5, %v1529_v7, %v1523_v3 }
 0x4f8   : > { %v1527_v27 = vpop.permute.xlu1 %1526  ;;  %v1544_v8 = vpop.permute.xlu0 %1543 }
 0x4f9   : > { %v1533_v10 = vsel %vm1532_vm6, %v1531_v9, %v1527_v27 }
 0x4fa   : > { %v1546_v11 = vmul.f32 %v1544_v8, %v1533_v10 }
 0x4fc   : > { %v1547_v12 = vpack.c.bf16 %v1546_v11, %v1546_v11 }
 0x4fe   : > { %1892 = vmatmul.mubr.msk.bf16.vlgmr.msra.gmra.mrb[16].mxu0 %vm1564_vm7, %v1547_v12 }
 0x5d1   : > { %v1602_v15 = vpop.f32.mrb[16].mxu0 }
 0x5d2   : > { %v1608_v16 = vpack.c.bf16 %v1602_v15, %v1602_v15  ;;  %v1893_v31 = vpop.f32.mrb[17].mxu0 }
 0x5d3   : > { %v1605_v35 = vpop.f32.mrb[18].mxu0 }
 0x5d4   : > { %v1894_v32 = vpop.f32.mrb[19].mxu0  ;;  %1610 = vst.msk [vmem:[%s343_s27] sm:$0xf] %vm1609_vm8, %v1608_v16 }
 0x5d5   : > { %2180 = shalt.err (!%p2177_p8)
}
 0x5d6   : > { %s2181_s6 = scalar_lea.hbm %s2923_s14, 64  ;;  %s2185_s19 = scalar_lea.hbm %s3043_s18, 128 }
 0x5d7   : > { %p2182_p7 = scmp.ne.s32.totalorder %s2923_s14, %s2181_s6  ;;  %p2186_p12 = scmp.lt.u32.totalorder %s2923_s14, %s3043_s18 }
 0x5d8   : > { %p2187_p1 = scmp.lt.u32.totalorder %s2185_s19, %s2181_s6  ;;  %p2189_p11 = scmp.lt.u32.totalorder %s2181_s6, %s2923_s14 }
 0x5d9   : > { %p2183_p6 = pnand %p2182_p7, %p3044_p3 }
 0x5da   : > { %p2188_p0 = por %p2187_p1, %p2186_p12 }
 0x5db   : > { %p2184_p5 = pneg %p2183_p6 }
 0x5dc   : > { %p2190_p13 = por %p2189_p11, %p2188_p0 }
 0x5de   : > { %p2191_p2 = pnand %p2190_p13, %p2184_p5 }
 0x5e0   : > { %2194 = shalt.err (!%p2191_p2)
}
 0x5e1   : > { %1905 = dma.vmem_to_hbm [thread:$0]  (%p3044_p3), %s2925_s7, 64, %s2923_s14, %s1612_s0  }
 0x5e2 PF: > { %s3045_s2 = sld [smem:[#allocation23_spill]]  ;;  %s3046_s16 = sld [smem:[#allocation28_spill]] }
 0x5e3   : > { %s3047_s28 = sld [smem:[#allocation25_spill]] }
 0x5e8   : > { %s1638_s12 = sand.u32 1, %s3045_s2   ;;  %p3048_p9 = scmp.ne.s32.totalorder %s3046_s16, 0 }
 0x5e9   : > { %p3049_p4 = scmp.ge.s32.totalorder %s3047_s28, 2  ;;  %s1639_s8 = scalar_lea.sflag [#allocation10], %s1638_s12 }
 0x5eb   : > { %p1922_p10 = pnand %p3049_p4, %p3048_p9 }
 0x5ed   : > { %2248 = dma.done.wait (!%p1922_p10), %s1639_s8, 64  }
 0x5ee   : > { %2250 = vsyncadd (!%p1922_p10), %s1639_s8, 4294967232  ;;  %s26_s27 = sadd.s32 1, %s3047_s28   ;;  %s3050_s17 = sld [smem:[#allocation22_spill]] }
 0x5ef   : > { %p23_p8 = scmp.ge.s32.totalorder %s26_s27, 4   ;;  %s3051_s22 = sld [smem:[#allocation29_spill]] }
 0x5f0   : > { %s3052_s13 = sld [smem:[#allocation24_spill]]  ;;  %s3053_s25 = sld [smem:[#allocation27_spill]] }
 0x5f1   : > { %s3054_s7 = sld [smem:[#allocation26_spill]]  ;;  %s3055_s20 = smov %s2257_s21 }
 0x5f2   : > { %s3057_s23 = smov %s2269_s24  ;;  %s3059_s0 = smov %s2281_s26 }
 0x5f3   :  { %25 = sbr.rel (!%p23_p8) target bundleno = 16 (0x10), region = 117 }
 0x5f4   : > { %s3056_s21 = smov %s3050_s17 }
 0x5f6   : > { %s3058_s24 = smov %s3052_s13 }
 0x5f7   : > { %s3060_s26 = smov %s3054_s7 }
 0x5fa   :  { %1644 = vsyncpa [#allocation9], 1 }
 0x5fb   :  { %1646 = vsyncpa [#allocation9 + $0x1], 1 }
 0x5fc   :  { %1647 = vsyncpa [#allocation12], 1 }
 0x5fd   :  { %1649 = vsyncpa [#allocation12 + $0x1], 1 }
 0x5fe   :  { %1650 = vsyncpa [#allocation15], 1 }
 0x5ff   :  { %1651 = vsyncpa [#allocation10], 1 }
 0x600   :  { %1653 = vsyncpa [#allocation10 + $0x1], 1 }

// kernel: diffusion_transformer_forward.12
= control target key start
LH: loop header
LB: loop body
LE: loop exit
PB: predicated region body
PF: predicated region fallthrough
CT: control target
= control target key end

     0   :  { %s2394_s0 = inlined_call_operand.hbm [shape: bf16[2,8,32], index: 0, kind: input, shape index: {}, may-alias: {0,10}]   ;;  %s2395_s1 = inlined_call_operand.hbm [shape: bf16[2,8,32], index: 1, kind: input, shape index: {}]   ;;  %s2396_s2 = inlined_call_operand.hbm [shape: bf16[2,8,32], index: 2, kind: input, shape index: {}]   ;;  %s2397_s3 = inlined_call_operand.hbm [shape: bf16[2,8,32], index: 3, kind: input, shape index: {}]   ;;  %s2398_s4 = inlined_call_operand.hbm [shape: bf16[32,64], index: 4, kind: input, shape index: {}]   ;;  %s2399_s5 = inlined_call_operand.hbm [shape: bf16[1,64], index: 5, kind: input, shape index: {}]   ;;  %s2400_s6 = inlined_call_operand.hbm [shape: bf16[32,64], index: 6, kind: input, shape index: {}]   ;;  %s2401_s7 = inlined_call_operand.hbm [shape: bf16[1,64], index: 7, kind: input, shape index: {}]   ;;  %s2402_s8 = inlined_call_operand.hbm [shape: bf16[32,192], index: 8, kind: input, shape index: {}]   ;;  %s2403_s9 = inlined_call_operand.hbm [shape: bf16[64,32], index: 9, kind: input, shape index: {}]   ;;  %s2404_s10 = inlined_call_operand.hbm [shape: bf16[2,8,32], index: 10, kind: output, shape index: {}, may-alias: {0,10}]  }
   0x1   :  { %2434 = sst [smem:[#allocation37_spill]] %s2395_s1 }
   0x2   :  { %2435 = sst [smem:[#allocation38_spill]] %s2397_s3 }
   0x3   :  { %2436 = sst [smem:[#allocation39_spill]] %s2398_s4 }
   0x4   :  { %2437 = sst [smem:[#allocation40_spill]] %s2399_s5 }
   0x5   :  { %2438 = sst [smem:[#allocation41_spill]] %s2400_s6 }
   0x6   :  { %2439 = sst [smem:[#allocation42_spill]] %s2401_s7 }
   0x7   :  { %2440 = sst [smem:[#allocation43_spill]] %s2404_s10 }
   0x8   :  { %15 = vsyncpa [#allocation3], 0 }
   0x9   :  { %17 = vsyncpa [#allocation3 + $0x1], 0 }
   0xa   :  { %18 = vsyncpa [#allocation6], 0 }
   0xb   :  { %20 = vsyncpa [#allocation6 + $0x1], 0 }
   0xc   :  { %21 = vsyncpa [#allocation9], 0 }
   0xd   :  { %23 = vsyncpa [#allocation9 + $0x1], 0 }
   0xe   :  { %24 = vsyncpa [#allocation12], 0 }
   0xf   :  { %25 = vsyncpa [#allocation15], 0 }
  0x10   :  { %26 = vsyncpa [#allocation18], 0 }
  0x11   :  { %27 = vsyncpa [#allocation4], 0 }
  0x12   :  { %29 = vsyncpa [#allocation4 + $0x1], 0  ;;  %s1904_s13 = smov 0   ;;  %s1906_s14 = smov 0  }
  0x13   :  { %s1908_s15 = smov 0   ;;  %s1910_s16 = smov 0  }
  0x14   :  { %s1912_s17 = smov 0   ;;  %s1914_s18 = smov 0  }
  0x15 LB: > { %2441 = sst [smem:[#allocation28_spill]] %s1806_s13  ;;  %s1935_s19 = sadd.s32 4294967295, %s1826_s18   ;;  %s1826_s18 = sphi %s1914_s18, %s35_s18   ;;  %s1822_s17 = sphi %s1912_s17, %s2498_s17   ;;  %s1818_s16 = sphi %s1910_s16, %s2497_s16   ;;  %s1814_s15 = sphi %s1908_s15, %s2501_s15   ;;  %s1810_s14 = sphi %s1906_s14, %s2500_s14   ;;  %s1806_s13 = sphi %s1904_s13, %s2499_s13  }
  0x16   : > { %2442 = sst [smem:[#allocation29_spill]] %s1818_s16  ;;  %p1166_p0 = scmp.ge.s32.totalorder %s1826_s18, 1 }
  0x17   : > { %2443 = sst [smem:[#allocation30_spill]] %s1822_s17  ;;  %p2408_p1 = scmp.eq.s32.totalorder %s1935_s19, 0 }
  0x18   : > { %2444 = sst [smem:[#allocation31_spill]] %s1935_s19  ;;  %p318_p2 = scmp.lt.s32.totalorder %s1826_s18, 3 }
  0x19   : > { %s1828_s21 = smov [#allocation10]   ;;  %s1829_s24 = smov [#allocation11]  }
  0x1a   : > { %p1940_p3 = pnand %p1166_p0, %p318_p2  ;;  %s330_s22 = sshll.u32 %s1828_s21, 4  ;;  %s1944_s22 = int_to_ptr.vmem [resolvable:$true] %s330_s22 }
  0x1b   : > { %s344_s25 = sshll.u32 %s1829_s24, 4  ;;  %s1830_s26 = smov [#allocation14]   ;;  %s1955_s25 = int_to_ptr.vmem [resolvable:$true] %s344_s25 }
  0x1c   : > { %s2445_s20 = scalar_select %p1940_p3, 1, 0 }
  0x1d   : > { %p1290_p4 = pneg %p1940_p3  ;;  %s1957_s27 = sshll.u32 %s1830_s26, 4  ;;  %s369_s27 = int_to_ptr.vmem [resolvable:$true] %s1957_s27 }
  0x1e   : > { %2446 = sst [smem:[#allocation32_spill]] %s2445_s20  ;;  %s2448_s4 = sld [smem:[#allocation39_spill]] }
  0x1f   : > { %p1951_p6 = pnand %p1290_p4, %p2408_p1 }
  0x21   : > { %s2447_s23 = scalar_select %p1951_p6, 1, 0 }
  0x22   : > { %p1967_p8 = pneg %p1951_p6 }
  0x24   : > { %s1432_s30 = scalar_lea.hbm %s2448_s4, 256 }
  0x25   : > { %p1433_p7 = scmp.ne.s32.totalorder %s2448_s4, %s1432_s30  ;;  %p1439_p11 = scmp.lt.u32.totalorder %s1432_s30, %s2448_s4 }
  0x26   : > { %s2449_s21 = scalar_select %p1967_p8, 1, 0 }
  0x27   : > { %p1435_p9 = pnand %p1967_p8, %p1433_p7 }
  0x29   : > { %p1436_p10 = pneg %p1435_p9 }
  0x2b   : > { %p1441_p12 = pnand %p1439_p11, %p1436_p10 }
  0x2d   : > { %1444 = shalt.err (!%p1441_p12)
}
  0x2e   : > { %s1445_s28 = scalar_lea.vmem %s1944_s22, 256  ;;  %p1453_p4 = scmp.lt.s32.totalorder %s1944_s22, %s1944_s22 }
  0x2f   : > { %p1446_p13 = scmp.ne.s32.totalorder %s1944_s22, %s1445_s28  ;;  %p1454_p5 = scmp.lt.s32.totalorder %s1445_s28, %s1445_s28 }
  0x31   : > { %p1448_p0 = pnand %p1446_p13, %p1967_p8  ;;  %p1455_p7 = por %p1454_p5, %p1453_p4 }
  0x33   : > { %p1449_p2 = pneg %p1448_p0 }
  0x35   : > { %p1456_p9 = pnand %p1455_p7, %p1449_p2 }
  0x37   : > { %1459 = shalt.err (!%p1456_p9)
}
  0x38   : > { %s2410_s29 = smov 64   ;;  %s2412_s30 = smov 4  }
  0x39   : > { %1293 = dma.hbm_to_vmem [thread:$0]  (!%p1951_p6), %s2448_s4, 256, %s1944_s22, [#allocation9], %s2410_s29, %s2410_s29, %s2412_s30  }
  0x3a   : > { %s2450_s5 = sld [smem:[#allocation40_spill]] }
  0x40   : > { %s1460_s28 = scalar_lea.hbm %s2450_s5, 16 }
  0x41   : > { %p1461_p5 = scmp.ne.s32.totalorder %s2450_s5, %s1460_s28  ;;  %p1467_p12 = scmp.lt.u32.totalorder %s1460_s28, %s2450_s5 }
  0x43   : > { %p1463_p10 = pnand %p1461_p5, %p1967_p8 }
  0x45   : > { %p1464_p11 = pneg %p1463_p10 }
  0x47   : > { %p1469_p13 = pnand %p1467_p12, %p1464_p11 }
  0x49   : > { %1472 = shalt.err (!%p1469_p13)
}
  0x4a   : > { %s1473_s22 = scalar_lea.vmem %s1955_s25, 16  ;;  %s1480_s10 = scalar_lea.vmem %s1955_s25, 32 }
  0x4b   : > { %p1474_p0 = scmp.ne.s32.totalorder %s1955_s25, %s1473_s22  ;;  %p1481_p7 = scmp.lt.s32.totalorder %s1955_s25, %s1955_s25 }
  0x4c   : > { %p1482_p9 = scmp.lt.s32.totalorder %s1480_s10, %s1473_s22 }
  0x4d   : > { %p1476_p2 = pnand %p1474_p0, %p1967_p8 }
  0x4e   : > { %p1483_p5 = por %p1482_p9, %p1481_p7 }
  0x4f   : > { %p1477_p4 = pneg %p1476_p2 }
  0x51   : > { %p1484_p10 = pnand %p1483_p5, %p1477_p4 }
  0x53   : > { %1487 = shalt.err (!%p1484_p10)
}
  0x54   : > { %1296 = dma.hbm_to_vmem [thread:$0]  (!%p1951_p6), %s2450_s5, 16, %s1955_s25, [#allocation12]  }
  0x55   : > { %s2451_s7 = sld [smem:[#allocation42_spill]] }
  0x5b   : > { %s1488_s12 = scalar_lea.hbm %s2451_s7, 16 }
  0x5c   : > { %p1489_p11 = scmp.ne.s32.totalorder %s2451_s7, %s1488_s12  ;;  %p1495_p0 = scmp.lt.u32.totalorder %s1488_s12, %s2451_s7 }
  0x5e   : > { %p1491_p12 = pnand %p1489_p11, %p1967_p8 }
  0x60   : > { %p1492_p13 = pneg %p1491_p12 }
  0x62   : > { %p1497_p2 = pnand %p1495_p0, %p1492_p13 }
  0x64   : > { %1500 = shalt.err (!%p1497_p2)
}
  0x65   : > { %s1501_s10 = scalar_lea.vmem %s369_s27, 16  ;;  %s1508_s25 = scalar_lea.vmem %s369_s27, 32 }
  0x66   : > { %p1502_p4 = scmp.ne.s32.totalorder %s369_s27, %s1501_s10  ;;  %p1509_p5 = scmp.lt.s32.totalorder %s369_s27, %s369_s27 }
  0x67   : > { %p1510_p10 = scmp.lt.s32.totalorder %s1508_s25, %s1501_s10 }
  0x68   : > { %p1504_p7 = pnand %p1502_p4, %p1967_p8 }
  0x69   : > { %p1511_p1 = por %p1510_p10, %p1509_p5 }
  0x6a   : > { %p1505_p9 = pneg %p1504_p7 }
  0x6c   : > { %p1512_p3 = pnand %p1511_p1, %p1505_p9 }
  0x6e   : > { %1515 = shalt.err (!%p1512_p3)
}
  0x6f   : > { %1302 = dma.hbm_to_vmem [thread:$0]  (!%p1951_p6), %s2451_s7, 16, %s369_s27, [#allocation15]  }
  0x70   : > { %s1165_s20 = sadd.s32 4294967294, %s1826_s18   ;;  %s47_s11 = sadd.s32 1, %s1822_s17 }
  0x71   : > { %s56_s12 = sadd.s32 1, %s1814_s15  ;;  %p49_p1 = scmp.ge.s32.totalorder %s47_s11, 2 }
  0x72   : > { %p63_p3 = scmp.ne.s32.totalorder %s1814_s15, %s1810_s14  ;;  %p64_p11 = scmp.eq.s32.totalorder %s1826_s18, 0 }
  0x73   : > { %p69_p12 = scmp.ne.s32.totalorder %s1810_s14, %s1806_s13  ;;  %s2503_s11 = smov (%p49_p1, %s47_s11), 0 }
  0x74   : > { %2452 = sst [smem:[#allocation33_spill]] %s2503_s11  ;;  %p2044_p13 = por %p64_p11, %p63_p3 }
  0x75   : > { %p2454_p0 = scmp.eq.s32.totalorder %s1935_s19, 0  ;;  %s51_s26 = ssub.s32 %s1822_s17, %s2503_s11 }
  0x76   : > { %p305_p4 = scmp.eq.s32.totalorder %s1935_s19, 1  ;;  %p54_p7 = scmp.eq.s32.totalorder %s51_s26, 0 }
  0x77   : > { %p2050_p2 = por %p2454_p0, %p69_p12  ;;  %p311_p9 = scmp.eq.s32.totalorder %s1165_s20, 1 }
  0x78   : > { %p2057_p5 = por %p305_p4, %p63_p3  ;;  %p1332_p10 = scmp.lt.s32.totalorder %s1826_s18, 2 }
  0x79   : > { %s2455_s27 = scalar_select %p2050_p2, 1, 0 }
  0x7a   : > { %s2456_s28 = scalar_select %p2057_p5, 1, 0 }
  0x7b   : > { %s2063_s22 = scalar_select %p54_p7, %s1814_s15, %s56_s12  }
  0x7c   : > { %2457 = sst [smem:[#allocation34_spill]] %s2456_s28  ;;  %p2065_p1 = por %p311_p9, %p69_p12 }
  0x7d   : > { %2458 = sst [smem:[#allocation35_spill]] %s2063_s22  ;;  %s2414_s25 = sand.u32 1, %s1814_s15  }
  0x7e   : > { %s2459_s10 = scalar_select %p2065_p1, 1, 0 }
  0x7f   : > { %s2072_s3 = sshll.u32 %s2414_s25, 2  ;;  %s2075_s16 = sshll.u32 %s1822_s17, 6 }
  0x80   : > { %2460 = sst [smem:[#allocation36_spill]] %s2459_s10  ;;  %p2079_p3 = pnand %p1332_p10, %p2044_p13 }
  0x81   : > { %s2418_s12 = sand.u32 1, %s1826_s18   ;;  %s2462_s1 = sld [smem:[#allocation37_spill]] }
  0x82   : > { %s2461_s20 = scalar_select %p2079_p3, 1, 0 }
  0x83   : > { %s428_s25 = scalar_lea.vmem [#allocation5], %s2072_s3  ;;  %s2095_s24 = scalar_lea.sflag [#allocation6], %s2418_s12 }
  0x84   : > { %s436_s4 = sshll.u32 %s428_s25, 4  ;;  %p2101_p12 = pneg %p2079_p3  ;;  %s2091_s4 = int_to_ptr.vmem [resolvable:$true] %s436_s4 }
  0x86   : > { %s2463_s7 = scalar_select %p2101_p12, 1, 0 }
  0x87   : > { %s2088_s30 = scalar_lea.hbm %s2462_s1, %s2075_s16  ;;  %s1521_s25 = scalar_lea.hbm %s2462_s1, 128 }
  0x88   : > { %s1516_s5 = scalar_lea.hbm %s2088_s30, 64  ;;  %p1522_p4 = scmp.lt.u32.totalorder %s2088_s30, %s2462_s1 }
  0x89   : > { %p1517_p11 = scmp.ne.s32.totalorder %s2088_s30, %s1516_s5  ;;  %p1523_p7 = scmp.lt.u32.totalorder %s1521_s25, %s1516_s5 }
  0x8a   : > { %p1525_p10 = scmp.lt.u32.totalorder %s1516_s5, %s2088_s30 }
  0x8b   : > { %p1519_p13 = pnand %p2101_p12, %p1517_p11  ;;  %p1524_p9 = por %p1523_p7, %p1522_p4 }
  0x8d   : > { %p1520_p0 = pneg %p1519_p13  ;;  %p1526_p1 = por %p1525_p10, %p1524_p9 }
  0x8f   : > { %p1527_p5 = pnand %p1526_p1, %p1520_p0 }
  0x91   : > { %1530 = shalt.err (!%p1527_p5)
}
  0x92   : > { %s1531_s12 = scalar_lea.vmem %s2091_s4, 64  ;;  %s1833_s29 = smov [#allocation5]  }
  0x93   : > { %p1532_p11 = scmp.ne.s32.totalorder %s2091_s4, %s1531_s12  ;;  %s1536_s26 = sshll.u32 %s1833_s29, 4  ;;  %s1537_s26 = int_to_ptr.vmem [resolvable:$false] %s1536_s26 }
  0x94   : > { %s1538_s17 = scalar_lea.vmem %s1537_s26, 128  ;;  %p1539_p6 = scmp.lt.s32.totalorder %s2091_s4, %s1537_s26 }
  0x95   : > { %p1534_p13 = pnand %p1532_p11, %p2101_p12  ;;  %p1540_p8 = scmp.lt.s32.totalorder %s1538_s17, %s1531_s12 }
  0x97   : > { %p1535_p2 = pneg %p1534_p13  ;;  %p1541_p4 = por %p1540_p8, %p1539_p6 }
  0x99   : > { %p1542_p7 = pnand %p1541_p4, %p1535_p2 }
  0x9b   : > { %1545 = shalt.err (!%p1542_p7)
}
  0x9c   : > { %1315 = dma.hbm_to_vmem [thread:$0]  (!%p2079_p3), %s2088_s30, 64, %s2091_s4, %s2095_s24  }
  0x9d   : > { %s1834_s5 = smov [#allocation13]   ;;  %s1835_s25 = smov [#allocation16]  }
  0x9e   : > { %s354_s11 = sshll.u32 %s1834_s5, 4  ;;  %s378_s1 = sshll.u32 %s1835_s25, 4  ;;  %s355_s11 = int_to_ptr.vmem [resolvable:$true] %s354_s11  ;;  %s379_s1 = int_to_ptr.vmem [resolvable:$true] %s378_s1 }
  0x9f   : > { %s2464_s6 = sld [smem:[#allocation41_spill]]  ;;  %p2465_p8 = scmp.ne.s32.totalorder %s2449_s21, 0 }
  0xa5   : > { %s1546_s26 = scalar_lea.hbm %s2464_s6, 256 }
  0xa6   : > { %p1547_p6 = scmp.ne.s32.totalorder %s2464_s6, %s1546_s26  ;;  %p1553_p1 = scmp.lt.u32.totalorder %s1546_s26, %s2464_s6 }
  0xa8   : > { %p1549_p2 = pnand %p1547_p6, %p2465_p8 }
  0xaa   : > { %p1550_p5 = pneg %p1549_p2 }
  0xac   : > { %p1555_p0 = pnand %p1553_p1, %p1550_p5 }
  0xae   : > { %1558 = shalt.err (!%p1555_p0)
}
  0xaf   : > { %s1559_s4 = scalar_lea.vmem %s355_s11, 256  ;;  %p1567_p13 = scmp.lt.s32.totalorder %s355_s11, %s355_s11 }
  0xb0   : > { %p1560_p9 = scmp.ne.s32.totalorder %s355_s11, %s1559_s4  ;;  %p1568_p4 = scmp.lt.s32.totalorder %s1559_s4, %s1559_s4 }
  0xb2   : > { %p1562_p10 = pnand %p1560_p9, %p2465_p8  ;;  %p1569_p7 = por %p1568_p4, %p1567_p13 }
  0xb4   : > { %p1563_p11 = pneg %p1562_p10 }
  0xb6   : > { %p1570_p3 = pnand %p1569_p7, %p1563_p11 }
  0xb8   : > { %1573 = shalt.err (!%p1570_p3)
}
  0xb9   : > { %p2466_p6 = scmp.ne.s32.totalorder %s2447_s23, 0  ;;  %s2467_s30 = smov 4  }
  0xba   : > { %s2468_s22 = smov 64   ;;  %s1574_s29 = scalar_lea.hbm %s2402_s8, 512 }
  0xbb   : > { %1299 = dma.hbm_to_vmem [thread:$0]  (!%p2466_p6), %s2464_s6, 256, %s355_s11, [#allocation12], %s2468_s22, %s2468_s22, %s2467_s30  }
  0xbc   : > { %p1575_p2 = scmp.ne.s32.totalorder %s2402_s8, %s1574_s29  ;;  %p1581_p1 = scmp.lt.u32.totalorder %s1574_s29, %s2402_s8 }
  0xbe   : > { %p1577_p3 = pnand %p1575_p2, %p2465_p8 }
  0xc0   : > { %p1578_p5 = pneg %p1577_p3 }
  0xc2   : > { %p1583_p0 = pnand %p1581_p1, %p1578_p5 }
  0xc4   : > { %1586 = shalt.err (!%p1583_p0)
}
  0xc5   : > { %s1587_s13 = scalar_lea.vmem %s379_s1, 512  ;;  %p1595_p13 = scmp.lt.s32.totalorder %s379_s1, %s379_s1 }
  0xc6   : > { %p1588_p9 = scmp.ne.s32.totalorder %s379_s1, %s1587_s13  ;;  %p1596_p4 = scmp.lt.s32.totalorder %s1587_s13, %s1587_s13 }
  0xc8   : > { %p1590_p10 = pnand %p1588_p9, %p2465_p8  ;;  %p1597_p7 = por %p1596_p4, %p1595_p13 }
  0xca   : > { %p1591_p11 = pneg %p1590_p10 }
  0xcc   : > { %p1598_p12 = pnand %p1597_p7, %p1591_p11 }
  0xce   : > { %1601 = shalt.err (!%p1598_p12)
}
  0xcf   : > { %s1836_s11 = smov 128   ;;  %s1837_s10 = smov 8  }
  0xd0   : > { %1305 = dma.hbm_to_vmem [thread:$0]  (!%p2466_p6), %s2402_s8, 512, %s379_s1, [#allocation15], %s1836_s11, %s1836_s11, %s1837_s10  }
  0xd1   : > { %s1838_s29 = smov [#allocation17]   ;;  %s1602_s4 = scalar_lea.hbm %s2403_s9, 512 }
  0xd2   : > { %s391_s26 = sshll.u32 %s1838_s29, 4  ;;  %p1603_p12 = scmp.ne.s32.totalorder %s2403_s9, %s1602_s4  ;;  %s392_s26 = int_to_ptr.vmem [resolvable:$true] %s391_s26 }
  0xd3   : > { %p1609_p5 = scmp.lt.u32.totalorder %s1602_s4, %s2403_s9 }
  0xd4   : > { %p1605_p2 = pnand %p1603_p12, %p2465_p8 }
  0xd6   : > { %p1606_p3 = pneg %p1605_p2 }
  0xd8   : > { %p1611_p1 = pnand %p1609_p5, %p1606_p3 }
  0xda   : > { %1614 = shalt.err (!%p1611_p1)
}
  0xdb   : > { %s1615_s1 = scalar_lea.vmem %s392_s26, 512  ;;  %p1623_p11 = scmp.lt.s32.totalorder %s392_s26, %s392_s26 }
  0xdc   : > { %p1616_p0 = scmp.ne.s32.totalorder %s392_s26, %s1615_s1  ;;  %p1624_p13 = scmp.lt.s32.totalorder %s1615_s1, %s1615_s1 }
  0xde   : > { %p1618_p9 = pnand %p1616_p0, %p2465_p8  ;;  %p1625_p4 = por %p1624_p13, %p1623_p11 }
  0xe0   : > { %p1619_p10 = pneg %p1618_p9 }
  0xe2   : > { %p1626_p7 = pnand %p1625_p4, %p1619_p10 }
  0xe4   : > { %1629 = shalt.err (!%p1626_p7)
}
  0xe5   : > { %1308 = dma.hbm_to_vmem [thread:$0]  (!%p2466_p6), %s2403_s9, 512, %s392_s26, [#allocation18], %s2468_s22, %s2468_s22, %s2467_s30  }
  0xe6   : > { %s2189_s11 = scalar_lea.hbm %s2394_s0, %s2075_s16  ;;  %s409_s23 = scalar_lea.vmem [#allocation2], %s2072_s3 }
  0xe7   : > { %s417_s10 = sshll.u32 %s409_s23, 4  ;;  %s2469_s5 = sand.u32 1, %s1814_s15   ;;  %s418_s10 = int_to_ptr.vmem [resolvable:$true] %s417_s10 }
  0xe8   : > { %s406_s25 = scalar_lea.sflag [#allocation3], %s2469_s5  ;;  %s1630_s29 = scalar_lea.hbm %s2189_s11, 64 }
  0xe9   : > { %p1631_p8 = scmp.ne.s32.totalorder %s2189_s11, %s1630_s29  ;;  %p2470_p12 = scmp.ne.s32.totalorder %s2463_s7, 0 }
  0xea   : > { %s1635_s26 = scalar_lea.hbm %s2394_s0, 128  ;;  %p1636_p6 = scmp.lt.u32.totalorder %s2189_s11, %s2394_s0 }
  0xeb   : > { %p1633_p2 = pnand %p1631_p8, %p2470_p12  ;;  %p1637_p5 = scmp.lt.u32.totalorder %s1635_s26, %s1630_s29 }
  0xec   : > { %p1639_p0 = scmp.lt.u32.totalorder %s1630_s29, %s2189_s11 }
  0xed   : > { %p1634_p3 = pneg %p1633_p2  ;;  %p1638_p1 = por %p1637_p5, %p1636_p6 }
  0xef   : > { %p1640_p9 = por %p1639_p0, %p1638_p1 }
  0xf1   : > { %p1641_p10 = pnand %p1640_p9, %p1634_p3 }
  0xf3   : > { %1644 = shalt.err (!%p1641_p10)
}
  0xf4   : > { %s1645_s4 = scalar_lea.vmem %s418_s10, 64  ;;  %s1839_s13 = smov [#allocation2]  }
  0xf5   : > { %p1646_p11 = scmp.ne.s32.totalorder %s418_s10, %s1645_s4  ;;  %s1650_s1 = sshll.u32 %s1839_s13, 4  ;;  %s1651_s1 = int_to_ptr.vmem [resolvable:$false] %s1650_s1 }
  0xf6   : > { %s1652_s6 = scalar_lea.vmem %s1651_s1, 128  ;;  %p1653_p7 = scmp.lt.s32.totalorder %s418_s10, %s1651_s1 }
  0xf7   : > { %p1648_p13 = pnand %p1646_p11, %p2470_p12  ;;  %p1654_p8 = scmp.lt.s32.totalorder %s1652_s6, %s1645_s4 }
  0xf9   : > { %p1649_p4 = pneg %p1648_p13  ;;  %p1655_p2 = por %p1654_p8, %p1653_p7 }
  0xfb   : > { %p1656_p5 = pnand %p1655_p2, %p1649_p4 }
  0xfd   : > { %1659 = shalt.err (!%p1656_p5)
}
  0xfe   : > { %p2471_p6 = scmp.ne.s32.totalorder %s2461_s20, 0  ;;  %s2215_s28 = scalar_lea.hbm %s2396_s2, %s2075_s16 }
  0xff   : > { %s447_s23 = scalar_lea.vmem [#allocation7], %s2072_s3  ;;  %s1660_s29 = scalar_lea.hbm %s2215_s28, 64 }
 0x100   : > { %1312 = dma.hbm_to_vmem [thread:$0]  (!%p2471_p6), %s2189_s11, 64, %s418_s10, %s406_s25  }
 0x101   : > { %s455_s5 = sshll.u32 %s447_s23, 4  ;;  %p1661_p3 = scmp.ne.s32.totalorder %s2215_s28, %s1660_s29  ;;  %s456_s5 = int_to_ptr.vmem [resolvable:$true] %s455_s5 }
 0x102   : > { %s1665_s11 = scalar_lea.hbm %s2396_s2, 128  ;;  %p1666_p9 = scmp.lt.u32.totalorder %s2215_s28, %s2396_s2 }
 0x103   : > { %p1663_p1 = pnand %p1661_p3, %p2470_p12  ;;  %p1667_p10 = scmp.lt.u32.totalorder %s1665_s11, %s1660_s29 }
 0x104   : > { %p1669_p13 = scmp.lt.u32.totalorder %s1660_s29, %s2215_s28 }
 0x105   : > { %p1664_p0 = pneg %p1663_p1  ;;  %p1668_p11 = por %p1667_p10, %p1666_p9 }
 0x107   : > { %p1670_p4 = por %p1669_p13, %p1668_p11 }
 0x109   : > { %p1671_p7 = pnand %p1670_p4, %p1664_p0 }
 0x10b   : > { %1674 = shalt.err (!%p1671_p7)
}
 0x10c   : > { %s1675_s26 = scalar_lea.vmem %s456_s5, 64  ;;  %s1840_s12 = smov [#allocation7]  }
 0x10d   : > { %p1676_p8 = scmp.ne.s32.totalorder %s456_s5, %s1675_s26  ;;  %s1680_s17 = sshll.u32 %s1840_s12, 4  ;;  %s1681_s17 = int_to_ptr.vmem [resolvable:$false] %s1680_s17 }
 0x10e   : > { %s1682_s4 = scalar_lea.vmem %s1681_s17, 128  ;;  %p1683_p3 = scmp.lt.s32.totalorder %s456_s5, %s1681_s17 }
 0x10f   : > { %p1678_p2 = pnand %p1676_p8, %p2470_p12  ;;  %p1684_p1 = scmp.lt.s32.totalorder %s1682_s4, %s1675_s26 }
 0x111   : > { %p1679_p5 = pneg %p1678_p2  ;;  %p1685_p6 = por %p1684_p1, %p1683_p3 }
 0x113   : > { %p1686_p9 = pnand %p1685_p6, %p1679_p5 }
 0x115   : > { %1689 = shalt.err (!%p1686_p9)
}
 0x116   : > { %p2472_p10 = scmp.ne.s32.totalorder %s2461_s20, 0  ;;  %s2473_s6 = sld [smem:[#allocation38_spill]] }
 0x117   : > { %s466_s21 = scalar_lea.vmem [#allocation8], %s2072_s3  ;;  %s2474_s29 = sand.u32 1, %s1826_s18  }
 0x118   : > { %1318 = dma.hbm_to_vmem [thread:$0]  (!%p2472_p10), %s2215_s28, 64, %s456_s5, %s2095_s24  }
 0x119   : > { %s474_s23 = sshll.u32 %s466_s21, 4  ;;  %s463_s30 = scalar_lea.sflag [#allocation9], %s2474_s29  ;;  %s475_s23 = int_to_ptr.vmem [resolvable:$true] %s474_s23 }
 0x11c   : > { %s2240_s19 = scalar_lea.hbm %s2473_s6, %s2075_s16  ;;  %s1695_s5 = scalar_lea.hbm %s2473_s6, 128 }
 0x11d   : > { %s1690_s22 = scalar_lea.hbm %s2240_s19, 64  ;;  %p1696_p13 = scmp.lt.u32.totalorder %s2240_s19, %s2473_s6 }
 0x11e   : > { %p1691_p6 = scmp.ne.s32.totalorder %s2240_s19, %s1690_s22  ;;  %p1697_p4 = scmp.lt.u32.totalorder %s1695_s5, %s1690_s22 }
 0x11f   : > { %p1699_p8 = scmp.lt.u32.totalorder %s1690_s22, %s2240_s19 }
 0x120   : > { %p1693_p0 = pnand %p1691_p6, %p2470_p12  ;;  %p1698_p7 = por %p1697_p4, %p1696_p13 }
 0x122   : > { %p1694_p11 = pneg %p1693_p0  ;;  %p1700_p2 = por %p1699_p8, %p1698_p7 }
 0x124   : > { %p1701_p5 = pnand %p1700_p2, %p1694_p11 }
 0x126   : > { %1704 = shalt.err (!%p1701_p5)
}
 0x127   : > { %s1705_s3 = scalar_lea.vmem %s475_s23, 64  ;;  %s1841_s10 = smov [#allocation8]  }
 0x128   : > { %p1706_p3 = scmp.ne.s32.totalorder %s475_s23, %s1705_s3  ;;  %s1710_s25 = sshll.u32 %s1841_s10, 4  ;;  %s1711_s25 = int_to_ptr.vmem [resolvable:$false] %s1710_s25 }
 0x129   : > { %s1712_s26 = scalar_lea.vmem %s1711_s25, 128  ;;  %p1713_p6 = scmp.lt.s32.totalorder %s475_s23, %s1711_s25 }
 0x12a   : > { %p1708_p1 = pnand %p1706_p3, %p2470_p12  ;;  %p1714_p0 = scmp.lt.s32.totalorder %s1712_s26, %s1705_s3 }
 0x12c   : > { %p1709_p9 = pneg %p1708_p1  ;;  %p1715_p10 = por %p1714_p0, %p1713_p6 }
 0x12e   : > { %p1716_p4 = pnand %p1715_p10, %p1709_p9 }
 0x130   : > { %1719 = shalt.err (!%p1716_p4)
}
 0x131   : > { %p2475_p13 = scmp.ne.s32.totalorder %s2461_s20, 0  ;;  %s2476_s12 = sld [smem:[#allocation32_spill]] }
 0x133   : > { %1321 = dma.hbm_to_vmem [thread:$0]  (!%p2475_p13), %s2240_s19, 64, %s475_s23, %s463_s30  }
 0x137   : > { %p2477_p11 = scmp.ne.s32.totalorder %s2476_s12, 0 }
 0x138   : > { %s2265_s7 = sand.u32 (!%p2477_p11), 1, %s1810_s14   ;;  %p2478_p12 = scmp.ne.s32.totalorder (!%p2477_p11), %s2455_s27, 0 }
 0x139   : > { %483 = sbr.rel (%p2477_p11) target bundleno = 1825 (0x721), region = 60  ;;  %s2268_s17 = sshll.u32 (!%p2477_p11), %s2265_s7, 2 }
 0x13a   : > { %s486_s4 = scalar_lea.sflag (!%p2477_p11), [#allocation3], %s2265_s7  ;;  %s489_s13 = scalar_lea.vmem (!%p2477_p11), [#allocation2], %s2268_s17 }
 0x140   : > { %1773 = dma.done.wait (%p2478_p12), %s486_s4, 64  }
 0x141   : > { %1775 = vsyncadd (%p2478_p12), %s486_s4, 4294967232  ;;  %s2479_s20 = sld [smem:[#allocation31_spill]]  ;;  %s498_s21 = scalar_lea.vmem [#allocation5], %s2268_s17 }
 0x147   : > { %s494_s1 = sand.u32 1, %s2479_s20  }
 0x148   : > { %s495_s19 = scalar_lea.sflag [#allocation6], %s494_s1 }
 0x149   : > { %1777 = dma.done.wait (%p2478_p12), %s495_s19, 128  }
 0x14a   : > { %1779 = vsyncadd (%p2478_p12), %s495_s19, 4294967168  ;;  %s507_s23 = scalar_lea.vmem [#allocation7], %s2268_s17  ;;  %s513_s29 = scalar_lea.sflag [#allocation9], %s494_s1 }
 0x14b   : > { %s516_s30 = scalar_lea.vmem [#allocation8], %s2268_s17 }
 0x14c   : > { %1781 = dma.done.wait (%p2478_p12), %s513_s29, 64  }
 0x14d   : > { %1783 = vsyncadd (%p2478_p12), %s513_s29, 4294967232  ;;  %p2480_p10 = scmp.eq.s32.totalorder %s2479_s20, 0 }
 0x14f   : > { %1785 = dma.done.wait (%p2480_p10), [#allocation9], 256   ;;  %p2481_p7 = pmov %p2480_p10 }
 0x151   : > { %1787 = vsyncadd (%p2481_p7), [#allocation9], 4294967040  ;;  %p2482_p8 = pmov %p2481_p7 }
 0x152   : > { %p2483_p2 = pmov %p2481_p7 }
 0x153   : > { %1789 = dma.done.wait (%p2482_p8), [#allocation12], 272  }
 0x154   : > { %1791 = vsyncadd (%p2483_p2), [#allocation12], 4294967024  ;;  %p2484_p5 = pmov %p2483_p2 }
 0x155   : > { %p2485_p3 = pmov %p2483_p2 }
 0x156   : > { %1793 = dma.done.wait (%p2484_p5), [#allocation15], 528  }
 0x157   : > { %1795 = vsyncadd (%p2485_p3), [#allocation15], 4294966768  ;;  %p2486_p1 = pmov %p2483_p2 }
 0x159   : > { %1797 = dma.done.wait (%p2486_p1), [#allocation18], 512   ;;  %p2487_p9 = pmov %p2486_p1 }
 0x15a   : > { %v1842_v0 = vmov 0.0   ;;  %vm1843_vm0 = vmmov 0   ;;  %v1404_v1 = vld [vmem:[#allocation10] sm:$0xff]   ;;  %v1405_v2 = vld [vmem:[#allocation10 + $0x8] sm:$0xff]   ;;  %vm618_vm1 = vcmask 261120   ;;  %v1406_v4 = vld [vmem:[#allocation13] sm:$0xff]   ;;  %v602_v7 = vlaneseq }
 0x15b   : > { %1799 = vsyncadd (%p2487_p9), [#allocation18], 4294966784  ;;  %1228 = vmatprep.subr.bf16.mxu0 %v1842_v0  ;;  %1232 = vmatprep.mubr.msk.bf16.mxu0 %vm1843_vm0, %v1842_v0  ;;  %v595_v3 = vld [vmem:[%s498_s21] sm:$0xf]  ;;  %v1407_v5 = vld [vmem:[#allocation13 + $0x8] sm:$0xff]   ;;  %s1844_s27 = smov 96  }
 0x15c   : > { %1236 = vmatprep.subr.bf16.mxu1 %v1842_v0  ;;  %1240 = vmatprep.mubr.msk.bf16.mxu1 %vm1843_vm0, %v1842_v0  ;;  %v672_v6 = vld [vmem:[%s507_s23] sm:$0xf]  ;;  %v603_v8 = vshrl.u32 %v602_v7, 7  ;;  %v668_v21 = vld [vmem:[%s516_s30] sm:$0xf]  ;;  %v1845_v46 = vmov 0  }
 0x15d   : > { %1229 = vmatpush3.bf16.msra.mxu0 %v1404_v1  ;;  %1237 = vmatpush3.bf16.msra.mxu1 %v1406_v4  ;;  %v600_v9 = vld [vmem:[#allocation11] sm:$0x1]  ;;  %v593_v22 = vld [vmem:[%s489_s13] sm:$0xf]  ;;  %v669_v23 = vunpack.c.l.bf16 %v668_v21  ;;  %v1411_v45 = vld [vmem:[#allocation16 + $0x10] ss:$8 sps:$4 sm:$0xff]  }
 0x15e   : > { %1230 = vmatprep.subr.bf16.mxu0 %v1842_v0  ;;  %1238 = vmatprep.subr.bf16.mxu1 %v1842_v0  ;;  %v601_v10 = vunpack.c.l.bf16 %v600_v9  ;;  %v604_v11 = vsub.s32 0, %v603_v8  ;;  %v594_v24 = vunpack.c.l.bf16 %v593_v22  ;;  %v677_v29 = vld [vmem:[#allocation14] sm:$0x1]  ;;  %v1408_v42 = vld [vmem:[#allocation16] ss:$8 sps:$4 sm:$0xff]   ;;  %v1416_v63 = vld [vmem:[#allocation17 + $0x10] sm:$0xff]  }
 0x15f   : > { %v678_v30 = vunpack.c.l.bf16 %v677_v29  ;;  %v1410_v43 = vld [vmem:[#allocation16 + $0x4] ss:$8 sps:$4 sm:$0xff]   ;;  %v1413_v44 = vld [vmem:[#allocation16 + $0x14] ss:$8 sps:$4 sm:$0xff]   ;;  %s1846_s22 = smov 64   ;;  %s2488_s24 = sld [smem:[#allocation29_spill]] }
 0x160   : > { %v605_v12 = vrot.slane %v601_v10, %v604_v11  ;;  %v1414_v60 = vld [vmem:[#allocation17] sm:$0xff]   ;;  %v1415_v61 = vld [vmem:[#allocation17 + $0x8] sm:$0xff]   ;;  %v1417_v4 = vld [vmem:[#allocation17 + $0x18] sm:$0xff]   ;;  %vm886_vm2 = vcmask 523264   ;;  %s1847_s28 = smov 32   ;;  %s2489_s5 = sld [smem:[#allocation34_spill]] }
 0x161   : > { %1231 = vmatpush3.bf16.msra.mxu0 %v1405_v2  ;;  %1239 = vmatpush3.bf16.msra.mxu1 %v1407_v5  ;;  %v682_v31 = vrot.slane %v678_v30, %v604_v11  ;;  %s591_s11 = scalar_lea.vmem [#allocation19], %s2268_s17  ;;  %vm941_vm3 = vcmask 257024   ;;  %s2490_s26 = sld [smem:[#allocation43_spill]] }
 0x162   : > { %1244 = vmatprep.subr.bf16.mxu1 %v1842_v0  ;;  %792 = vmatprep.subr.bf16.mxu0 %v1410_v43  ;;  %s958_s3 = sshll.u32 %s591_s11, 4  ;;  %s944_s4 = scalar_lea.sflag [#allocation4], %s2265_s7  ;;  %s2347_s3 = int_to_ptr.vmem [resolvable:$true] %s958_s3 }
 0x163   : > { %s1720_s13 = scalar_lea.vmem %s2347_s3, 64  ;;  %s1848_s17 = smov [#allocation19]  }
 0x164   : > { %1233 = vmatmul.mubr.msk.bf16.vlgmr.msra.gmra.mrb[0].mxu0 %vm618_vm1, %v595_v3  ;;  %1241 = vmatmul.mubr.msk.bf16.vlgmr.msra.gmra.mrb[0].mxu1 %vm618_vm1, %v672_v6  ;;  %p1721_p6 = scmp.ne.s32.totalorder %s2347_s3, %s1720_s13  ;;  %s1724_s20 = sshll.u32 %s1848_s17, 4  ;;  %s1725_s20 = int_to_ptr.vmem [resolvable:$false] %s1724_s20 }
 0x165   : > { %1252 = vmatprep.mubr.msk.bf16.mxu1 %vm1843_vm0, %v1842_v0  ;;  %793 = vmatpush1.bf16.msra.mxu0 %v1408_v42  ;;  %s1214_s16 = sshll.u32 %s2488_s24, 6  ;;  %s1726_s1 = scalar_lea.vmem %s1725_s20, 128 }
 0x166   : > { %794 = vmatprep.subr.bf16.mxu0 %v1413_v44  ;;  %824 = vmatprep.mubr.bf16.mxu0 %v1845_v46  ;;  %p2491_p0 = scmp.ne.s32.totalorder %s2489_s5, 0  ;;  %p1727_p11 = scmp.lt.s32.totalorder %s2347_s3, %s1725_s20 }
 0x167   : > { %1245 = vmatpush3.bf16.msra.mxu1 %v1414_v60  ;;  %s2345_s12 = scalar_lea.hbm %s2490_s26, %s1214_s16  ;;  %p1728_p12 = scmp.lt.s32.totalorder %s1726_s1, %s1720_s13 }
 0x168   : > { %1246 = vmatprep.subr.bf16.mxu1 %v1842_v0  ;;  %p1722_p4 = pnand %p1721_p6, %p2491_p0 }
 0x169   : > { %795 = vmatpush1.bf16.msra.mxu0 %v1411_v45  ;;  %p1729_p10 = por %p1728_p12, %p1727_p11 }
 0x16a   : > { %p1723_p13 = pneg %p1722_p4 }
 0x16b   : > { %1247 = vmatpush3.bf16.msra.mxu1 %v1415_v61 }
 0x16c   : > { %1248 = vmatprep.subr.bf16.mxu1 %v1842_v0  ;;  %p1730_p7 = pnand %p1729_p10, %p1723_p13 }
 0x16f   : > { %1249 = vmatpush3.bf16.msra.mxu1 %v1416_v63 }
 0x170   : > { %1250 = vmatprep.subr.bf16.mxu1 %v1842_v0 }
 0x173   : > { %1251 = vmatpush3.bf16.msra.mxu1 %v1417_v4 }
 0x237   : > { %v656_v13 = vpop.f32.mrb[0].mxu0  ;;  %v732_v32 = vpop.f32.mrb[0].mxu1 }
 0x238   : > { %v657_v14 = vadd.f32 %v656_v13, %v605_v12  ;;  %v1234_v15 = vpop.f32.mrb[1].mxu0  ;;  %v733_v33 = vadd.f32 %v732_v32, %v682_v31  ;;  %v1242_v34 = vpop.f32.mrb[1].mxu1 }
 0x239   : > { %v659_v16 = vpop.f32.mrb[2].mxu0  ;;  %v735_v35 = vpop.f32.mrb[2].mxu1 }
 0x23a   : > { %v1197_v17 = vmul.f32 -1.442695, %v657_v14  ;;  %v1235_v18 = vpop.f32.mrb[3].mxu0  ;;  %v1243_v36 = vpop.f32.mrb[3].mxu1  ;;  %760 = vrot.lane.b32.xlu1 %v733_v33, %s1844_s27  ;;  %v1201_v47 = vmul.f32 -1.442695, %v733_v33 }
 0x23c   : > { %1418 = vpow2.f32 %v1197_v17 }
 0x246   : > { %v1419_v19 = vpop.eup %1418 }
 0x247   : > { %v665_v20 = vadd.f32 1.0, %v1419_v19 }
 0x249   : > { %1420 = vrcp.f32 %v665_v20 }
 0x24a   : > { %1422 = vpow2.f32 %v1201_v47 }
 0x253   : > { %v2323_v25 = vpop.eup %1420 }
 0x254   : > { %v670_v26 = vmul.f32 %v2323_v25, %v669_v23  ;;  %v1423_v48 = vpop.eup %1422 }
 0x255   : > { %v755_v51 = vadd.f32 1.0, %v1423_v48 }
 0x256   : > { %v2326_v27 = vadd.f32 %v670_v26, %v594_v24 }
 0x258   : > { %v738_v28 = vsel %vm618_vm1, %v2326_v27, 0.0 }
 0x259   : > { %739 = vadd.xlane.f32.xlu0 %v738_v28 }
 0x2ac   : > { %v761_v56 = vpop.permute.xlu1 %760 }
 0x2e6   : > { %v740_v37 = vpop.xlane.xlu0 %739 }
 0x2e7   : > { %v742_v38 = vmul.f32 0.03125, %v740_v37 }
 0x2e9   : > { %v743_v39 = vsub.f32 %v2326_v27, %v742_v38 }
 0x2eb   : > { %v744_v40 = vmul.f32 %v743_v39, %v743_v39 }
 0x2ed   : > { %v745_v41 = vsel %vm618_vm1, %v744_v40, 0.0 }
 0x2ee   : > { %746 = vadd.xlane.f32.xlu0 %v745_v41 }
 0x37b   : > { %v747_v49 = vpop.xlane.xlu0 %746 }
 0x37c   : > { %v748_v50 = vmul.f32 0.03125, %v747_v49 }
 0x37e   : > { %v749_v52 = vadd.f32 1e-05, %v748_v50 }
 0x380   : > { %1424 = vrsqrt.f32 %v749_v52 }
 0x381   : > { %1426 = vrcp.f32 %v755_v51 }
 0x38a   : > { %v1425_v53 = vpop.eup %1424 }
 0x38b   : > { %v751_v54 = vmul.f32 %v1425_v53, %v743_v39  ;;  %v1427_v55 = vpop.eup %1426 }
 0x38d   : > { %v758_v57 = vmul.f32 %v1427_v55, %v751_v54 }
 0x38f   : > { %v763_v58 = vadd.f32 %v761_v56, %v758_v57 }
 0x391   : > { %v764_v59 = vpack.c.bf16 %v763_v58, %v763_v58 }
 0x393   : > { %1206 = vmatmul.mubr.msk.bf16.vlgmr.msra.gmra.mrb[4].mxu0 %vm618_vm1, %v764_v59 }
 0x466   : > { %v826_v62 = vpop.f32.mrb[4].mxu0 }
 0x467   : > { %841 = vrot.lane.b32.xlu1 %v826_v62, %s1846_s22  ;;  %v828_v1 = vpop.f32.mrb[5].mxu0  ;;  %v1207_v5 = vmul.f32 -1.442695, %v826_v62 }
 0x468   : > { %846 = vrot.lane.b32.xlu0 %v828_v1, %s1846_s22  ;;  %v830_v2 = vpop.f32.mrb[6].mxu0 }
 0x469   : > { %v831_v3 = vpop.f32.mrb[7].mxu0  ;;  %1428 = vpow2.f32 %v1207_v5 }
 0x473   : > { %v1429_v6 = vpop.eup %1428 }
 0x474   : > { %v836_v7 = vadd.f32 1.0, %v1429_v6 }
 0x476   : > { %1430 = vrcp.f32 %v836_v7 }
 0x480   : > { %v1431_v8 = vpop.eup %1430 }
 0x481   : > { %v839_v9 = vmul.f32 %v1431_v8, %v826_v62 }
 0x4d9   : > { %v842_v10 = vpop.permute.xlu1 %841 }
 0x4da   : > { %v844_v11 = vmul.f32 %v842_v10, %v839_v9  ;;  %v847_v12 = vpop.permute.xlu0 %846 }
 0x4dc   : > { %v849_v13 = vmul.f32 %v847_v12, %v844_v11 }
 0x4de   : > { %v850_v14 = vpack.c.bf16 %v849_v13, %v849_v13 }
 0x4e0   : > { %860 = vrot.lane.b32.xlu1 %v850_v14, %s1846_s22 }
 0x552   : > { %v861_v15 = vpop.permute.xlu1 %860 }
 0x553   : > { %1253 = vmatmul.mubr.msk.bf16.vlgmr.msra.gmra.mrb[4].mxu1 %vm886_vm2, %v861_v15 }
 0x626   : > { %v924_v0 = vpop.f32.mrb[4].mxu1 }
 0x627   : > { %931 = vrot.lane.b32.xlu1 %v924_v0, %s1847_s28  ;;  %v1254_v16 = vpop.f32.mrb[5].mxu1 }
 0x628   : > { %v927_v17 = vpop.f32.mrb[6].mxu1 }
 0x629   : > { %v1255_v18 = vpop.f32.mrb[7].mxu1 }
 0x699   : > { %v932_v19 = vpop.permute.xlu1 %931 }
 0x69a   : > { %v934_v20 = vmul.f32 %v2323_v25, %v932_v19 }
 0x69c   : > { %936 = vrot.lane.b32.xlu1 %v934_v20, %s1844_s27 }
 0x70e   : > { %v937_v21 = vpop.permute.xlu1 %936 }
 0x70f   : > { %v939_v22 = vadd.f32 %v937_v21, %v2326_v27 }
 0x711   : > { %v940_v23 = vpack.c.bf16 %v939_v22, %v939_v22 }
 0x713   : > { %942 = vst.msk [vmem:[%s591_s11] sm:$0xf] %vm941_vm3, %v940_v23 }
 0x714   : > { %1733 = shalt.err (!%p1730_p7)
}
 0x715   : > { %s1734_s7 = scalar_lea.hbm %s2345_s12, 64  ;;  %s1738_s23 = scalar_lea.hbm %s2490_s26, 128 }
 0x716   : > { %p1735_p8 = scmp.ne.s32.totalorder %s2345_s12, %s1734_s7  ;;  %p1739_p3 = scmp.lt.u32.totalorder %s2345_s12, %s2490_s26 }
 0x717   : > { %p1740_p1 = scmp.lt.u32.totalorder %s1738_s23, %s1734_s7  ;;  %p1742_p6 = scmp.lt.u32.totalorder %s1734_s7, %s2345_s12 }
 0x718   : > { %p1736_p2 = pnand %p1735_p8, %p2491_p0 }
 0x719   : > { %p1741_p9 = por %p1740_p1, %p1739_p3 }
 0x71a   : > { %p1737_p5 = pneg %p1736_p2 }
 0x71b   : > { %p1743_p4 = por %p1742_p6, %p1741_p9 }
 0x71d   : > { %p1744_p13 = pnand %p1743_p4, %p1737_p5 }
 0x71f   : > { %1747 = shalt.err (!%p1744_p13)
}
 0x720   : > { %1288 = dma.vmem_to_hbm [thread:$0]  (%p2491_p0), %s2347_s3, 64, %s2345_s12, %s944_s4  }
 0x721 PF: > { %s2492_s27 = sld [smem:[#allocation28_spill]]  ;;  %s2493_s22 = sld [smem:[#allocation36_spill]] }
 0x722   : > { %p2495_p12 = scmp.ge.s32.totalorder %s1826_s18, 2 }
 0x727   : > { %s970_s24 = sand.u32 1, %s2492_s27   ;;  %p2494_p11 = scmp.ne.s32.totalorder %s2493_s22, 0 }
 0x728   : > { %s971_s28 = scalar_lea.sflag [#allocation4], %s970_s24 }
 0x729   : > { %p1323_p10 = pnand %p2495_p12, %p2494_p11 }
 0x72b   : > { %1801 = dma.done.wait (!%p1323_p10), %s971_s28, 64  }
 0x72c   : > { %1803 = vsyncadd (!%p1323_p10), %s971_s28, 4294967232  ;;  %s35_s18 = sadd.s32 1, %s1826_s18   ;;  %s2496_s5 = sld [smem:[#allocation35_spill]] }
 0x72d   : > { %p32_p7 = scmp.ge.s32.totalorder %s35_s18, 4   ;;  %s2497_s16 = sld [smem:[#allocation30_spill]] }
 0x72e   : > { %s2498_s17 = sld [smem:[#allocation33_spill]]  ;;  %s2499_s13 = smov %s1810_s14 }
 0x72f   : > { %s2500_s14 = smov %s1814_s15  ;;  %34 = sbr.rel (!%p32_p7) target bundleno = 21 (0x15), region = 166 }
 0x732   : > { %s2501_s15 = smov %s2496_s5 }
 0x736   :  { %976 = vsyncpa [#allocation3], 1 }
 0x737   :  { %978 = vsyncpa [#allocation3 + $0x1], 1 }
 0x738   :  { %979 = vsyncpa [#allocation6], 1 }
 0x739   :  { %981 = vsyncpa [#allocation6 + $0x1], 1 }
 0x73a   :  { %982 = vsyncpa [#allocation9], 1 }
 0x73b   :  { %984 = vsyncpa [#allocation9 + $0x1], 1 }
 0x73c   :  { %985 = vsyncpa [#allocation12], 1 }
 0x73d   :  { %986 = vsyncpa [#allocation15], 1 }
 0x73e   :  { %987 = vsyncpa [#allocation18], 1 }
 0x73f   :  { %988 = vsyncpa [#allocation4], 1 }
 0x740   :  { %990 = vsyncpa [#allocation4 + $0x1], 1 }

</bundles_post_ra>
